<compile_context>
chip_gen: v7x
topology: tpu7x:2x2x1
jax: 0.10.0
libtpu: 0.0.40
codegen_flags: <defaults>
</compile_context>

<pallas_src>
import numpy as np
import jax
import jax.numpy as jnp
from jax import lax
from jax.experimental import pallas as pl
from jax.experimental.pallas import tpu as pltpu

# ------------------------------ static sizes --------------------------------
H_IN = W_IN = 36
K = 5
C1, C2 = 10, 20          # conv out channels
F_HID = 50
N_OUT = 10               # per head
W_PAD = 40               # per-input-channel padded width (aligns conv1 contraction)
N1 = 512                 # conv1 matmul N: 2 col-parity blocks of 256 lanes (160 used: c*16+j2)
N2 = 256                 # conv2 matmul N: 2 col-parity blocks of 128 lanes (120 used: co*6+j2)


# ------------------------------ fused kernel --------------------------------
def multilenet_kernel(x4_ref, a1_ref, b1_ref, a2_ref, b2_ref,
                      w3_ref, b3_ref, wh_ref, bh_ref, out_ref):
    f32 = jnp.float32
    TB = x4_ref.shape[0]

    out_ref[...] = jnp.zeros(out_ref.shape, f32)

    # ---- conv1: 5 banded matmuls, register accumulation ----------------------
    # acc1 row  t*32 + m*8 + a   <-> conv1 output row i = 4a + m of sample t
    # acc1 lane dj*256 + c*16+j2 <-> conv1 output (channel c, col 2*j2 + dj)
    acc1 = None
    for ki in range(K):
        pieces = []
        for t in range(TB):
            for m in range(4):
                s = m + ki
                lo = s // 4
                pieces.append(x4_ref[t, s % 4, lo:lo + 8, :])       # (8, cin*40)
        slab = jnp.concatenate(pieces, axis=0)                      # (TB*32, cin*40)
        r = jnp.dot(slab, a1_ref[ki], preferred_element_type=f32)   # (TB*32, 512)
        acc1 = r if acc1 is None else acc1 + r

    # ---- maxpool(2) + bias + ReLU (aligned slices, elementwise max only) -----
    b1row = b1_ref[...]                                             # (1, 256)
    y1e, y1o = [], []                                               # per-sample even/odd pooled rows
    for t in range(TB):
        a = acc1[t * 32:(t + 1) * 32]
        cm = jnp.maximum(a[:, 0:256], a[:, 256:512])                # max over col parity
        y1e.append(jnp.maximum(jnp.maximum(cm[0:8], cm[8:16]) + b1row, 0.0))     # rows 0,2,..,14
        y1o.append(jnp.maximum(jnp.maximum(cm[16:24], cm[24:32]) + b1row, 0.0))  # rows 1,3,..,15

    # ---- conv2: 5 banded matmuls ----------------------------------------------
    # acc2 row t*16 + di*8 + b <-> conv2 output row i = 2b + di (b <= 5 valid,
    # rows 6,7 are don't-care and come from rolled-around pooled rows).
    acc2 = None
    for ki in range(K):
        pieces = []
        for t in range(TB):
            for di in range(2):
                p = di + ki
                src = y1e[t] if p % 2 == 0 else y1o[t]
                off = p // 2
                if off:
                    src = pltpu.roll(src, shift=8 - off, axis=0)    # row b -> pooled row b+off
                pieces.append(src)                                   # (8, 256)
        slab = jnp.concatenate(pieces, axis=0)                       # (TB*16, 256)
        r = jnp.dot(slab, a2_ref[ki], preferred_element_type=f32)    # (TB*16, 256)
        acc2 = r if acc2 is None else acc2 + r

    # ---- maxpool(2) + bias + ReLU ---------------------------------------------
    b2row = b2_ref[...]                                              # (1, 128)
    y2 = []
    for t in range(TB):
        a = acc2[t * 16:(t + 1) * 16]
        cm = jnp.maximum(a[:, 0:128], a[:, 128:256])
        y2.append(jnp.maximum(jnp.maximum(cm[0:8], cm[8:16]) + b2row, 0.0))  # (8,128), rows 0..5 valid

    # ---- shared Linear(720, 50) + ReLU as ONE matmul ---------------------------
    # P[t*8+s, s*128+f] = sum_k y2_t[s, k] * w3[f, flatten(co, s, j2)]
    y2_all = jnp.concatenate(y2, axis=0)                             # (TB*8, 128)
    P = jnp.dot(y2_all, w3_ref[...], preferred_element_type=f32)     # (TB*8, 768)
    b3row = b3_ref[...]                                              # (1, 128)

    # ---- both private heads fused, lane-dense 128-wide store -------------------
    for t in range(TB):
        h = b3row
        for s in range(6):
            r0 = t * 8 + s
            h = h + P[r0:r0 + 1, s * 128:(s + 1) * 128]              # 128-aligned lane block
        h = jnp.maximum(h, 0.0)                                      # (1, 128), lanes >= 50 are 0
        out_ref[0, t:t + 1, :] = (jnp.dot(h, wh_ref[...], preferred_element_type=f32)
                                  + bh_ref[...])


# ------------------------------ wrapper --------------------------------------
def multi_lenet_forward(x_nchw, kp, grid_blocks=2):
    """Pallas-backed forward. x_nchw: (B, C_in, 36, 36) float32."""
    B, cin = x_nchw.shape[0], x_nchw.shape[1]
    G = max(1, min(B, grid_blocks))          # >= 2 blocks when possible (v7x megacore)
    TB = -(-B // G)                          # samples per grid step (folded into matmul M)
    Bp = G * TB
    CW = cin * W_PAD

    x = x_nchw.astype(jnp.float32)
    if Bp != B:
        x = jnp.pad(x, ((0, Bp - B), (0, 0), (0, 0), (0, 0)))
    # lanes = ci*40 + j (width zero-padded 36 -> 40 so the conv1 contraction is aligned)
    xl = jnp.pad(jnp.transpose(x, (0, 2, 1, 3)),
                 ((0, 0), (0, 0), (0, 0), (0, W_PAD - W_IN)))
    xl = xl.reshape(Bp, H_IN, CW)
    # split rows mod 4: x4[b, q, a, :] = xl[b, 4a + q, :]  (keeps all in-kernel row reads contiguous)
    x4 = jnp.transpose(xl.reshape(Bp, 9, 4, CW), (0, 2, 1, 3))

    out = pl.pallas_call(
        multilenet_kernel,
        out_shape=jax.ShapeDtypeStruct((G, 8, 128), jnp.float32),
        grid=(G,),
        in_specs=[
            pl.BlockSpec((TB, 4, 9, CW), lambda g: (g, 0, 0, 0)),
            pl.BlockSpec((K, CW, N1), lambda g: (0, 0, 0)),
            pl.BlockSpec((1, 256), lambda g: (0, 0)),
            pl.BlockSpec((K, 256, N2), lambda g: (0, 0, 0)),
            pl.BlockSpec((1, 128), lambda g: (0, 0)),
            pl.BlockSpec((128, 6 * 128), lambda g: (0, 0)),
            pl.BlockSpec((1, 128), lambda g: (0, 0)),
            pl.BlockSpec((128, 128), lambda g: (0, 0)),
            pl.BlockSpec((1, 128), lambda g: (0, 0)),
        ],
        out_specs=pl.BlockSpec((1, 8, 128), lambda g: (g, 0, 0)),
        compiler_params=pltpu.CompilerParams(dimension_semantics=("parallel",)),
    )(x4, kp["A1"], kp["b1row"], kp["A2"], kp["b2row"],
      kp["W3"], kp["b3row"], kp["Whead"], kp["bhead"])

    out = out[:, :TB, :].reshape(G * TB, 128)[:B]
    return dict(logits_l=out[:, :N_OUT], logits_r=out[:, N_OUT:2 * N_OUT])


# ------------------------------ parameters -----------------------------------
def init_raw_params(key, c_in=1):
    """PyTorch-layout weights with default-style uniform init (deterministic)."""
    def uni(k, shape, fan_in):
        bound = 1.0 / np.sqrt(fan_in)
        return jax.random.uniform(k, shape, jnp.float32, -bound, bound)

    ks = jax.random.split(key, 10)
    return dict(
        w1=uni(ks[0], (C1, c_in, K, K), c_in * K * K),
        b1=uni(ks[1], (C1,), c_in * K * K),
        w2=uni(ks[2], (C2, C1, K, K), C1 * K * K),
        b2=uni(ks[3], (C2,), C1 * K * K),
        w3=uni(ks[4], (F_HID, C2 * 36), C2 * 36),
        b3=uni(ks[5], (F_HID,), C2 * 36),
        wl=uni(ks[6], (N_OUT, F_HID), F_HID),
        bl=uni(ks[7], (N_OUT,), F_HID),
        wr=uni(ks[8], (N_OUT, F_HID), F_HID),
        br=uni(ks[9], (N_OUT,), F_HID),
    )


def pack_params(raw, c_in=1):
    """One-time host-side repack into banded conv matrices + fused FC/head weights."""
    w1 = np.asarray(raw["w1"], np.float32)
    b1 = np.asarray(raw["b1"], np.float32)
    w2 = np.asarray(raw["w2"], np.float32)
    b2 = np.asarray(raw["b2"], np.float32)
    w3 = np.asarray(raw["w3"], np.float32)
    b3 = np.asarray(raw["b3"], np.float32)
    wl = np.asarray(raw["wl"], np.float32)
    bl = np.asarray(raw["bl"], np.float32)
    wr = np.asarray(raw["wr"], np.float32)
    br = np.asarray(raw["br"], np.float32)

    # conv1 band: A1[ki][ci*40 + j_in, dj*256 + c*16 + j2] = w1[c, ci, ki, j_in - (2*j2+dj)]
    A1 = np.zeros((K, c_in * W_PAD, N1), np.float32)
    for ki in range(K):
        for c in range(C1):
            for ci in range(c_in):
                for j2 in range(16):
                    for dj in range(2):
                        jo = 2 * j2 + dj
                        A1[ki, ci * W_PAD + jo: ci * W_PAD + jo + K,
                           dj * 256 + c * 16 + j2] = w1[c, ci, ki, :]
    b1row = np.zeros((1, 256), np.float32)
    b1row[0, :C1 * 16] = np.repeat(b1, 16)

    # conv2 band: A2[ki][ci*16 + j_in, dj*128 + co*6 + j2] = w2[co, ci, ki, j_in - (2*j2+dj)]
    A2 = np.zeros((K, 256, N2), np.float32)
    for ki in range(K):
        for co in range(C2):
            for ci in range(C1):
                for j2 in range(6):
                    for dj in range(2):
                        jo = 2 * j2 + dj
                        A2[ki, ci * 16 + jo: ci * 16 + jo + K,
                           dj * 128 + co * 6 + j2] = w2[co, ci, ki, :]
    b2row = np.zeros((1, 128), np.float32)
    b2row[0, :C2 * 6] = np.repeat(b2, 6)

    # Linear(720,50): W3[co*6 + j2, s*128 + f] = w3[f, co*36 + s*6 + j2]  (NCHW flatten baked in)
    W3 = np.zeros((128, 6 * 128), np.float32)
    for s in range(6):
        for co in range(C2):
            for j2 in range(6):
                W3[co * 6 + j2, s * 128: s * 128 + F_HID] = w3[:, co * 36 + s * 6 + j2]
    b3row = np.zeros((1, 128), np.float32)
    b3row[0, :F_HID] = b3

    # both private heads fused, padded to 128 output lanes (lane-dense final store)
    Whead = np.zeros((128, 128), np.float32)
    Whead[:F_HID, :N_OUT] = wl.T
    Whead[:F_HID, N_OUT:2 * N_OUT] = wr.T
    bhead = np.zeros((1, 128), np.float32)
    bhead[0, :N_OUT] = bl
    bhead[0, N_OUT:2 * N_OUT] = br

    packed = dict(A1=A1, b1row=b1row, A2=A2, b2row=b2row,
                  W3=W3, b3row=b3row, Whead=Whead, bhead=bhead)
    return {k: jnp.asarray(v) for k, v in packed.items()}


# ------------------------------ pure-JAX reference ---------------------------
def ref_forward(x_nchw, raw):
    hp = lax.Precision.HIGHEST
    B = x_nchw.shape[0]
    y = lax.conv_general_dilated(x_nchw, raw["w1"], (1, 1), "VALID",
                                 dimension_numbers=("NCHW", "OIHW", "NCHW"),
                                 precision=hp) + raw["b1"][None, :, None, None]
    y = lax.reduce_window(y, -jnp.inf, lax.max, (1, 1, 2, 2), (1, 1, 2, 2), "VALID")
    y = jnp.maximum(y, 0.0)
    y = lax.conv_general_dilated(y, raw["w2"], (1, 1), "VALID",
                                 dimension_numbers=("NCHW", "OIHW", "NCHW"),
                                 precision=hp) + raw["b2"][None, :, None, None]
    y = lax.reduce_window(y, -jnp.inf, lax.max, (1, 1, 2, 2), (1, 1, 2, 2), "VALID")
    y = jnp.maximum(y, 0.0)
    flat = y.reshape(B, -1)                                          # NCHW flatten
    h = jnp.maximum(jnp.dot(flat, raw["w3"].T, precision=hp) + raw["b3"], 0.0)
    return dict(logits_l=jnp.dot(h, raw["wl"].T, precision=hp) + raw["bl"],
                logits_r=jnp.dot(h, raw["wr"].T, precision=hp) + raw["br"])


# --------------------------------- main ---------------------------------------
if __name__ == "__main__":
    key = jax.random.PRNGKey(0)
    k_x, k_p = jax.random.split(key)

    B, C_IN = 4, 1                                     # 36x36 forced by Linear(720, 50)
    x = jax.random.normal(k_x, (B, C_IN, H_IN, W_IN), jnp.float32)   # NCHW like PyTorch
    raw = init_raw_params(k_p, c_in=C_IN)
    packed = pack_params(raw, c_in=C_IN)

    fwd = jax.jit(multi_lenet_forward)
    out = jax.block_until_ready(fwd(x, packed))

    ref = jax.block_until_ready(ref_forward(x, raw))
    np.testing.assert_allclose(np.asarray(out["logits_l"]),
                               np.asarray(ref["logits_l"]), rtol=2e-4, atol=2e-5)
    np.testing.assert_allclose(np.asarray(out["logits_r"]),
                               np.asarray(ref["logits_r"]), rtol=2e-4, atol=2e-5)
    assert out["logits_l"].shape == (B, N_OUT) and out["logits_r"].shape == (B, N_OUT)

    print("KERNEL_OK")
</pallas_src>

<mosaic_0001>
module attributes {stable_mosaic.version = 11 : i64} {
  func.func @multilenet_kernel(%arg0: i32, %arg1: memref<2x4x9x40xf32, #tpu.memory_space<vmem>>, %arg2: memref<5x40x512xf32, #tpu.memory_space<vmem>>, %arg3: memref<1x256xf32, #tpu.memory_space<vmem>>, %arg4: memref<5x256x256xf32, #tpu.memory_space<vmem>>, %arg5: memref<1x128xf32, #tpu.memory_space<vmem>>, %arg6: memref<128x768xf32, #tpu.memory_space<vmem>>, %arg7: memref<1x128xf32, #tpu.memory_space<vmem>>, %arg8: memref<128x128xf32, #tpu.memory_space<vmem>>, %arg9: memref<1x128xf32, #tpu.memory_space<vmem>>, %arg10: memref<1x8x128xf32, #tpu.memory_space<vmem>>) attributes {dimension_semantics = [#tpu.dimension_semantics<parallel>], iteration_bounds = array<i64: 2>, scalar_prefetch = 0 : i64, scratch_operands = 0 : i64, tpu.core_type = #tpu.core_type<tc>, window_params = [{transform_indices = @transform_0, window_bounds = array<i64: 2, 4, 9, 40>}, {pipeline_mode = #tpu.pipeline_mode<synchronous>, transform_indices = @transform_1, window_bounds = array<i64: 5, 40, 512>}, {pipeline_mode = #tpu.pipeline_mode<synchronous>, transform_indices = @transform_2, window_bounds = array<i64: 1, 256>}, {pipeline_mode = #tpu.pipeline_mode<synchronous>, transform_indices = @transform_3, window_bounds = array<i64: 5, 256, 256>}, {pipeline_mode = #tpu.pipeline_mode<synchronous>, transform_indices = @transform_4, window_bounds = array<i64: 1, 128>}, {pipeline_mode = #tpu.pipeline_mode<synchronous>, transform_indices = @transform_5, window_bounds = array<i64: 128, 768>}, {pipeline_mode = #tpu.pipeline_mode<synchronous>, transform_indices = @transform_6, window_bounds = array<i64: 1, 128>}, {pipeline_mode = #tpu.pipeline_mode<synchronous>, transform_indices = @transform_7, window_bounds = array<i64: 128, 128>}, {pipeline_mode = #tpu.pipeline_mode<synchronous>, transform_indices = @transform_8, window_bounds = array<i64: 1, 128>}, {transform_indices = @transform_9, window_bounds = array<i64: 1, 8, 128>}]} {
    %cst = arith.constant 0.000000e+00 : f32
    %0 = vector.broadcast %cst : f32 to vector<1x8x128xf32>
    %c0 = arith.constant 0 : index
    %c0_0 = arith.constant 0 : index
    %c0_1 = arith.constant 0 : index
    %1 = vector.load %arg10[%c0, %c0_0, %c0_1] : memref<1x8x128xf32, #tpu.memory_space<vmem>>, vector<1x8x128xf32>
    tpu.vector_store %arg10[%c0, %c0_0, %c0_1], %0 {strides = array<i32>} : memref<1x8x128xf32, #tpu.memory_space<vmem>>, vector<1x8x128xf32>,
    %c0_2 = arith.constant 0 : index
    %c0_3 = arith.constant 0 : index
    %c0_4 = arith.constant 0 : index
    %c0_5 = arith.constant 0 : index
    %2 = vector.load %arg1[%c0_2, %c0_3, %c0_4, %c0_5] : memref<2x4x9x40xf32, #tpu.memory_space<vmem>>, vector<1x1x8x40xf32>
    %3 = vector.shape_cast %2 : vector<1x1x8x40xf32> to vector<8x40xf32>
    %c0_6 = arith.constant 0 : index
    %c1 = arith.constant 1 : index
    %c0_7 = arith.constant 0 : index
    %c0_8 = arith.constant 0 : index
    %4 = vector.load %arg1[%c0_6, %c1, %c0_7, %c0_8] : memref<2x4x9x40xf32, #tpu.memory_space<vmem>>, vector<1x1x8x40xf32>
    %5 = vector.shape_cast %4 : vector<1x1x8x40xf32> to vector<8x40xf32>
    %c0_9 = arith.constant 0 : index
    %c2 = arith.constant 2 : index
    %c0_10 = arith.constant 0 : index
    %c0_11 = arith.constant 0 : index
    %6 = vector.load %arg1[%c0_9, %c2, %c0_10, %c0_11] : memref<2x4x9x40xf32, #tpu.memory_space<vmem>>, vector<1x1x8x40xf32>
    %7 = vector.shape_cast %6 : vector<1x1x8x40xf32> to vector<8x40xf32>
    %c0_12 = arith.constant 0 : index
    %c3 = arith.constant 3 : index
    %c0_13 = arith.constant 0 : index
    %c0_14 = arith.constant 0 : index
    %8 = vector.load %arg1[%c0_12, %c3, %c0_13, %c0_14] : memref<2x4x9x40xf32, #tpu.memory_space<vmem>>, vector<1x1x8x40xf32>
    %9 = vector.shape_cast %8 : vector<1x1x8x40xf32> to vector<8x40xf32>
    %c1_15 = arith.constant 1 : index
    %c0_16 = arith.constant 0 : index
    %c0_17 = arith.constant 0 : index
    %c0_18 = arith.constant 0 : index
    %10 = vector.load %arg1[%c1_15, %c0_16, %c0_17, %c0_18] : memref<2x4x9x40xf32, #tpu.memory_space<vmem>>, vector<1x1x8x40xf32>
    %11 = vector.shape_cast %10 : vector<1x1x8x40xf32> to vector<8x40xf32>
    %c1_19 = arith.constant 1 : index
    %c1_20 = arith.constant 1 : index
    %c0_21 = arith.constant 0 : index
    %c0_22 = arith.constant 0 : index
    %12 = vector.load %arg1[%c1_19, %c1_20, %c0_21, %c0_22] : memref<2x4x9x40xf32, #tpu.memory_space<vmem>>, vector<1x1x8x40xf32>
    %13 = vector.shape_cast %12 : vector<1x1x8x40xf32> to vector<8x40xf32>
    %c1_23 = arith.constant 1 : index
    %c2_24 = arith.constant 2 : index
    %c0_25 = arith.constant 0 : index
    %c0_26 = arith.constant 0 : index
    %14 = vector.load %arg1[%c1_23, %c2_24, %c0_25, %c0_26] : memref<2x4x9x40xf32, #tpu.memory_space<vmem>>, vector<1x1x8x40xf32>
    %15 = vector.shape_cast %14 : vector<1x1x8x40xf32> to vector<8x40xf32>
    %c1_27 = arith.constant 1 : index
    %c3_28 = arith.constant 3 : index
    %c0_29 = arith.constant 0 : index
    %c0_30 = arith.constant 0 : index
    %16 = vector.load %arg1[%c1_27, %c3_28, %c0_29, %c0_30] : memref<2x4x9x40xf32, #tpu.memory_space<vmem>>, vector<1x1x8x40xf32>
    %17 = vector.shape_cast %16 : vector<1x1x8x40xf32> to vector<8x40xf32>
    %18 = tpu.concatenate %3, %5, %7, %9, %11, %13, %15, %17 in 0 : vector<8x40xf32>, vector<8x40xf32>, vector<8x40xf32>, vector<8x40xf32>, vector<8x40xf32>, vector<8x40xf32>, vector<8x40xf32>, vector<8x40xf32> -> vector<64x40xf32>
    %c0_31 = arith.constant 0 : index
    %c0_32 = arith.constant 0 : index
    %c0_33 = arith.constant 0 : index
    %19 = vector.load %arg2[%c0_31, %c0_32, %c0_33] : memref<5x40x512xf32, #tpu.memory_space<vmem>>, vector<1x40x512xf32>
    %20 = vector.shape_cast %19 : vector<1x40x512xf32> to vector<40x512xf32>
    %cst_34 = arith.constant dense<0.000000e+00> : vector<64x512xf32>
    %21 = tpu.matmul %18, %20, %cst_34 {dimension_numbers = #tpu.dot_dimension_numbers<[1], [0], [0], [1], [0, 0, 1, 1], [], []>} : vector<64x40xf32>, vector<40x512xf32>, vector<64x512xf32> -> vector<64x512xf32>
    %c0_35 = arith.constant 0 : index
    %c1_36 = arith.constant 1 : index
    %c0_37 = arith.constant 0 : index
    %c0_38 = arith.constant 0 : index
    %22 = vector.load %arg1[%c0_35, %c1_36, %c0_37, %c0_38] : memref<2x4x9x40xf32, #tpu.memory_space<vmem>>, vector<1x1x8x40xf32>
    %23 = vector.shape_cast %22 : vector<1x1x8x40xf32> to vector<8x40xf32>
    %c0_39 = arith.constant 0 : index
    %c2_40 = arith.constant 2 : index
    %c0_41 = arith.constant 0 : index
    %c0_42 = arith.constant 0 : index
    %24 = vector.load %arg1[%c0_39, %c2_40, %c0_41, %c0_42] : memref<2x4x9x40xf32, #tpu.memory_space<vmem>>, vector<1x1x8x40xf32>
    %25 = vector.shape_cast %24 : vector<1x1x8x40xf32> to vector<8x40xf32>
    %c0_43 = arith.constant 0 : index
    %c3_44 = arith.constant 3 : index
    %c0_45 = arith.constant 0 : index
    %c0_46 = arith.constant 0 : index
    %26 = vector.load %arg1[%c0_43, %c3_44, %c0_45, %c0_46] : memref<2x4x9x40xf32, #tpu.memory_space<vmem>>, vector<1x1x8x40xf32>
    %27 = vector.shape_cast %26 : vector<1x1x8x40xf32> to vector<8x40xf32>
    %c0_47 = arith.constant 0 : index
    %c0_48 = arith.constant 0 : index
    %c1_49 = arith.constant 1 : index
    %c0_50 = arith.constant 0 : index
    %28 = vector.load %arg1[%c0_47, %c0_48, %c1_49, %c0_50] : memref<2x4x9x40xf32, #tpu.memory_space<vmem>>, vector<1x1x8x40xf32>
    %29 = vector.shape_cast %28 : vector<1x1x8x40xf32> to vector<8x40xf32>
    %c1_51 = arith.constant 1 : index
    %c1_52 = arith.constant 1 : index
    %c0_53 = arith.constant 0 : index
    %c0_54 = arith.constant 0 : index
    %30 = vector.load %arg1[%c1_51, %c1_52, %c0_53, %c0_54] : memref<2x4x9x40xf32, #tpu.memory_space<vmem>>, vector<1x1x8x40xf32>
    %31 = vector.shape_cast %30 : vector<1x1x8x40xf32> to vector<8x40xf32>
    %c1_55 = arith.constant 1 : index
    %c2_56 = arith.constant 2 : index
    %c0_57 = arith.constant 0 : index
    %c0_58 = arith.constant 0 : index
    %32 = vector.load %arg1[%c1_55, %c2_56, %c0_57, %c0_58] : memref<2x4x9x40xf32, #tpu.memory_space<vmem>>, vector<1x1x8x40xf32>
    %33 = vector.shape_cast %32 : vector<1x1x8x40xf32> to vector<8x40xf32>
    %c1_59 = arith.constant 1 : index
    %c3_60 = arith.constant 3 : index
    %c0_61 = arith.constant 0 : index
    %c0_62 = arith.constant 0 : index
    %34 = vector.load %arg1[%c1_59, %c3_60, %c0_61, %c0_62] : memref<2x4x9x40xf32, #tpu.memory_space<vmem>>, vector<1x1x8x40xf32>
    %35 = vector.shape_cast %34 : vector<1x1x8x40xf32> to vector<8x40xf32>
    %c1_63 = arith.constant 1 : index
    %c0_64 = arith.constant 0 : index
    %c1_65 = arith.constant 1 : index
    %c0_66 = arith.constant 0 : index
    %36 = vector.load %arg1[%c1_63, %c0_64, %c1_65, %c0_66] : memref<2x4x9x40xf32, #tpu.memory_space<vmem>>, vector<1x1x8x40xf32>
    %37 = vector.shape_cast %36 : vector<1x1x8x40xf32> to vector<8x40xf32>
    %38 = tpu.concatenate %23, %25, %27, %29, %31, %33, %35, %37 in 0 : vector<8x40xf32>, vector<8x40xf32>, vector<8x40xf32>, vector<8x40xf32>, vector<8x40xf32>, vector<8x40xf32>, vector<8x40xf32>, vector<8x40xf32> -> vector<64x40xf32>
    %c1_67 = arith.constant 1 : index
    %c0_68 = arith.constant 0 : index
    %c0_69 = arith.constant 0 : index
    %39 = vector.load %arg2[%c1_67, %c0_68, %c0_69] : memref<5x40x512xf32, #tpu.memory_space<vmem>>, vector<1x40x512xf32>
    %40 = vector.shape_cast %39 : vector<1x40x512xf32> to vector<40x512xf32>
    %cst_70 = arith.constant dense<0.000000e+00> : vector<64x512xf32>
    %41 = tpu.matmul %38, %40, %cst_70 {dimension_numbers = #tpu.dot_dimension_numbers<[1], [0], [0], [1], [0, 0, 1, 1], [], []>} : vector<64x40xf32>, vector<40x512xf32>, vector<64x512xf32> -> vector<64x512xf32>
    %42 = arith.addf %21, %41 : vector<64x512xf32>
    %c0_71 = arith.constant 0 : index
    %c2_72 = arith.constant 2 : index
    %c0_73 = arith.constant 0 : index
    %c0_74 = arith.constant 0 : index
    %43 = vector.load %arg1[%c0_71, %c2_72, %c0_73, %c0_74] : memref<2x4x9x40xf32, #tpu.memory_space<vmem>>, vector<1x1x8x40xf32>
    %44 = vector.shape_cast %43 : vector<1x1x8x40xf32> to vector<8x40xf32>
    %c0_75 = arith.constant 0 : index
    %c3_76 = arith.constant 3 : index
    %c0_77 = arith.constant 0 : index
    %c0_78 = arith.constant 0 : index
    %45 = vector.load %arg1[%c0_75, %c3_76, %c0_77, %c0_78] : memref<2x4x9x40xf32, #tpu.memory_space<vmem>>, vector<1x1x8x40xf32>
    %46 = vector.shape_cast %45 : vector<1x1x8x40xf32> to vector<8x40xf32>
    %c0_79 = arith.constant 0 : index
    %c0_80 = arith.constant 0 : index
    %c1_81 = arith.constant 1 : index
    %c0_82 = arith.constant 0 : index
    %47 = vector.load %arg1[%c0_79, %c0_80, %c1_81, %c0_82] : memref<2x4x9x40xf32, #tpu.memory_space<vmem>>, vector<1x1x8x40xf32>
    %48 = vector.shape_cast %47 : vector<1x1x8x40xf32> to vector<8x40xf32>
    %c0_83 = arith.constant 0 : index
    %c1_84 = arith.constant 1 : index
    %c1_85 = arith.constant 1 : index
    %c0_86 = arith.constant 0 : index
    %49 = vector.load %arg1[%c0_83, %c1_84, %c1_85, %c0_86] : memref<2x4x9x40xf32, #tpu.memory_space<vmem>>, vector<1x1x8x40xf32>
    %50 = vector.shape_cast %49 : vector<1x1x8x40xf32> to vector<8x40xf32>
    %c1_87 = arith.constant 1 : index
    %c2_88 = arith.constant 2 : index
    %c0_89 = arith.constant 0 : index
    %c0_90 = arith.constant 0 : index
    %51 = vector.load %arg1[%c1_87, %c2_88, %c0_89, %c0_90] : memref<2x4x9x40xf32, #tpu.memory_space<vmem>>, vector<1x1x8x40xf32>
    %52 = vector.shape_cast %51 : vector<1x1x8x40xf32> to vector<8x40xf32>
    %c1_91 = arith.constant 1 : index
    %c3_92 = arith.constant 3 : index
    %c0_93 = arith.constant 0 : index
    %c0_94 = arith.constant 0 : index
    %53 = vector.load %arg1[%c1_91, %c3_92, %c0_93, %c0_94] : memref<2x4x9x40xf32, #tpu.memory_space<vmem>>, vector<1x1x8x40xf32>
    %54 = vector.shape_cast %53 : vector<1x1x8x40xf32> to vector<8x40xf32>
    %c1_95 = arith.constant 1 : index
    %c0_96 = arith.constant 0 : index
    %c1_97 = arith.constant 1 : index
    %c0_98 = arith.constant 0 : index
    %55 = vector.load %arg1[%c1_95, %c0_96, %c1_97, %c0_98] : memref<2x4x9x40xf32, #tpu.memory_space<vmem>>, vector<1x1x8x40xf32>
    %56 = vector.shape_cast %55 : vector<1x1x8x40xf32> to vector<8x40xf32>
    %c1_99 = arith.constant 1 : index
    %c1_100 = arith.constant 1 : index
    %c1_101 = arith.constant 1 : index
    %c0_102 = arith.constant 0 : index
    %57 = vector.load %arg1[%c1_99, %c1_100, %c1_101, %c0_102] : memref<2x4x9x40xf32, #tpu.memory_space<vmem>>, vector<1x1x8x40xf32>
    %58 = vector.shape_cast %57 : vector<1x1x8x40xf32> to vector<8x40xf32>
    %59 = tpu.concatenate %44, %46, %48, %50, %52, %54, %56, %58 in 0 : vector<8x40xf32>, vector<8x40xf32>, vector<8x40xf32>, vector<8x40xf32>, vector<8x40xf32>, vector<8x40xf32>, vector<8x40xf32>, vector<8x40xf32> -> vector<64x40xf32>
    %c2_103 = arith.constant 2 : index
    %c0_104 = arith.constant 0 : index
    %c0_105 = arith.constant 0 : index
    %60 = vector.load %arg2[%c2_103, %c0_104, %c0_105] : memref<5x40x512xf32, #tpu.memory_space<vmem>>, vector<1x40x512xf32>
    %61 = vector.shape_cast %60 : vector<1x40x512xf32> to vector<40x512xf32>
    %cst_106 = arith.constant dense<0.000000e+00> : vector<64x512xf32>
    %62 = tpu.matmul %59, %61, %cst_106 {dimension_numbers = #tpu.dot_dimension_numbers<[1], [0], [0], [1], [0, 0, 1, 1], [], []>} : vector<64x40xf32>, vector<40x512xf32>, vector<64x512xf32> -> vector<64x512xf32>
    %63 = arith.addf %42, %62 : vector<64x512xf32>
    %c0_107 = arith.constant 0 : index
    %c3_108 = arith.constant 3 : index
    %c0_109 = arith.constant 0 : index
    %c0_110 = arith.constant 0 : index
    %64 = vector.load %arg1[%c0_107, %c3_108, %c0_109, %c0_110] : memref<2x4x9x40xf32, #tpu.memory_space<vmem>>, vector<1x1x8x40xf32>
    %65 = vector.shape_cast %64 : vector<1x1x8x40xf32> to vector<8x40xf32>
    %c0_111 = arith.constant 0 : index
    %c0_112 = arith.constant 0 : index
    %c1_113 = arith.constant 1 : index
    %c0_114 = arith.constant 0 : index
    %66 = vector.load %arg1[%c0_111, %c0_112, %c1_113, %c0_114] : memref<2x4x9x40xf32, #tpu.memory_space<vmem>>, vector<1x1x8x40xf32>
    %67 = vector.shape_cast %66 : vector<1x1x8x40xf32> to vector<8x40xf32>
    %c0_115 = arith.constant 0 : index
    %c1_116 = arith.constant 1 : index
    %c1_117 = arith.constant 1 : index
    %c0_118 = arith.constant 0 : index
    %68 = vector.load %arg1[%c0_115, %c1_116, %c1_117, %c0_118] : memref<2x4x9x40xf32, #tpu.memory_space<vmem>>, vector<1x1x8x40xf32>
    %69 = vector.shape_cast %68 : vector<1x1x8x40xf32> to vector<8x40xf32>
    %c0_119 = arith.constant 0 : index
    %c2_120 = arith.constant 2 : index
    %c1_121 = arith.constant 1 : index
    %c0_122 = arith.constant 0 : index
    %70 = vector.load %arg1[%c0_119, %c2_120, %c1_121, %c0_122] : memref<2x4x9x40xf32, #tpu.memory_space<vmem>>, vector<1x1x8x40xf32>
    %71 = vector.shape_cast %70 : vector<1x1x8x40xf32> to vector<8x40xf32>
    %c1_123 = arith.constant 1 : index
    %c3_124 = arith.constant 3 : index
    %c0_125 = arith.constant 0 : index
    %c0_126 = arith.constant 0 : index
    %72 = vector.load %arg1[%c1_123, %c3_124, %c0_125, %c0_126] : memref<2x4x9x40xf32, #tpu.memory_space<vmem>>, vector<1x1x8x40xf32>
    %73 = vector.shape_cast %72 : vector<1x1x8x40xf32> to vector<8x40xf32>
    %c1_127 = arith.constant 1 : index
    %c0_128 = arith.constant 0 : index
    %c1_129 = arith.constant 1 : index
    %c0_130 = arith.constant 0 : index
    %74 = vector.load %arg1[%c1_127, %c0_128, %c1_129, %c0_130] : memref<2x4x9x40xf32, #tpu.memory_space<vmem>>, vector<1x1x8x40xf32>
    %75 = vector.shape_cast %74 : vector<1x1x8x40xf32> to vector<8x40xf32>
    %c1_131 = arith.constant 1 : index
    %c1_132 = arith.constant 1 : index
    %c1_133 = arith.constant 1 : index
    %c0_134 = arith.constant 0 : index
    %76 = vector.load %arg1[%c1_131, %c1_132, %c1_133, %c0_134] : memref<2x4x9x40xf32, #tpu.memory_space<vmem>>, vector<1x1x8x40xf32>
    %77 = vector.shape_cast %76 : vector<1x1x8x40xf32> to vector<8x40xf32>
    %c1_135 = arith.constant 1 : index
    %c2_136 = arith.constant 2 : index
    %c1_137 = arith.constant 1 : index
    %c0_138 = arith.constant 0 : index
    %78 = vector.load %arg1[%c1_135, %c2_136, %c1_137, %c0_138] : memref<2x4x9x40xf32, #tpu.memory_space<vmem>>, vector<1x1x8x40xf32>
    %79 = vector.shape_cast %78 : vector<1x1x8x40xf32> to vector<8x40xf32>
    %80 = tpu.concatenate %65, %67, %69, %71, %73, %75, %77, %79 in 0 : vector<8x40xf32>, vector<8x40xf32>, vector<8x40xf32>, vector<8x40xf32>, vector<8x40xf32>, vector<8x40xf32>, vector<8x40xf32>, vector<8x40xf32> -> vector<64x40xf32>
    %c3_139 = arith.constant 3 : index
    %c0_140 = arith.constant 0 : index
    %c0_141 = arith.constant 0 : index
    %81 = vector.load %arg2[%c3_139, %c0_140, %c0_141] : memref<5x40x512xf32, #tpu.memory_space<vmem>>, vector<1x40x512xf32>
    %82 = vector.shape_cast %81 : vector<1x40x512xf32> to vector<40x512xf32>
    %cst_142 = arith.constant dense<0.000000e+00> : vector<64x512xf32>
    %83 = tpu.matmul %80, %82, %cst_142 {dimension_numbers = #tpu.dot_dimension_numbers<[1], [0], [0], [1], [0, 0, 1, 1], [], []>} : vector<64x40xf32>, vector<40x512xf32>, vector<64x512xf32> -> vector<64x512xf32>
    %84 = arith.addf %63, %83 : vector<64x512xf32>
    %c0_143 = arith.constant 0 : index
    %c0_144 = arith.constant 0 : index
    %c1_145 = arith.constant 1 : index
    %c0_146 = arith.constant 0 : index
    %85 = vector.load %arg1[%c0_143, %c0_144, %c1_145, %c0_146] : memref<2x4x9x40xf32, #tpu.memory_space<vmem>>, vector<1x1x8x40xf32>
    %86 = vector.shape_cast %85 : vector<1x1x8x40xf32> to vector<8x40xf32>
    %c0_147 = arith.constant 0 : index
    %c1_148 = arith.constant 1 : index
    %c1_149 = arith.constant 1 : index
    %c0_150 = arith.constant 0 : index
    %87 = vector.load %arg1[%c0_147, %c1_148, %c1_149, %c0_150] : memref<2x4x9x40xf32, #tpu.memory_space<vmem>>, vector<1x1x8x40xf32>
    %88 = vector.shape_cast %87 : vector<1x1x8x40xf32> to vector<8x40xf32>
    %c0_151 = arith.constant 0 : index
    %c2_152 = arith.constant 2 : index
    %c1_153 = arith.constant 1 : index
    %c0_154 = arith.constant 0 : index
    %89 = vector.load %arg1[%c0_151, %c2_152, %c1_153, %c0_154] : memref<2x4x9x40xf32, #tpu.memory_space<vmem>>, vector<1x1x8x40xf32>
    %90 = vector.shape_cast %89 : vector<1x1x8x40xf32> to vector<8x40xf32>
    %c0_155 = arith.constant 0 : index
    %c3_156 = arith.constant 3 : index
    %c1_157 = arith.constant 1 : index
    %c0_158 = arith.constant 0 : index
    %91 = vector.load %arg1[%c0_155, %c3_156, %c1_157, %c0_158] : memref<2x4x9x40xf32, #tpu.memory_space<vmem>>, vector<1x1x8x40xf32>
    %92 = vector.shape_cast %91 : vector<1x1x8x40xf32> to vector<8x40xf32>
    %c1_159 = arith.constant 1 : index
    %c0_160 = arith.constant 0 : index
    %c1_161 = arith.constant 1 : index
    %c0_162 = arith.constant 0 : index
    %93 = vector.load %arg1[%c1_159, %c0_160, %c1_161, %c0_162] : memref<2x4x9x40xf32, #tpu.memory_space<vmem>>, vector<1x1x8x40xf32>
    %94 = vector.shape_cast %93 : vector<1x1x8x40xf32> to vector<8x40xf32>
    %c1_163 = arith.constant 1 : index
    %c1_164 = arith.constant 1 : index
    %c1_165 = arith.constant 1 : index
    %c0_166 = arith.constant 0 : index
    %95 = vector.load %arg1[%c1_163, %c1_164, %c1_165, %c0_166] : memref<2x4x9x40xf32, #tpu.memory_space<vmem>>, vector<1x1x8x40xf32>
    %96 = vector.shape_cast %95 : vector<1x1x8x40xf32> to vector<8x40xf32>
    %c1_167 = arith.constant 1 : index
    %c2_168 = arith.constant 2 : index
    %c1_169 = arith.constant 1 : index
    %c0_170 = arith.constant 0 : index
    %97 = vector.load %arg1[%c1_167, %c2_168, %c1_169, %c0_170] : memref<2x4x9x40xf32, #tpu.memory_space<vmem>>, vector<1x1x8x40xf32>
    %98 = vector.shape_cast %97 : vector<1x1x8x40xf32> to vector<8x40xf32>
    %c1_171 = arith.constant 1 : index
    %c3_172 = arith.constant 3 : index
    %c1_173 = arith.constant 1 : index
    %c0_174 = arith.constant 0 : index
    %99 = vector.load %arg1[%c1_171, %c3_172, %c1_173, %c0_174] : memref<2x4x9x40xf32, #tpu.memory_space<vmem>>, vector<1x1x8x40xf32>
    %100 = vector.shape_cast %99 : vector<1x1x8x40xf32> to vector<8x40xf32>
    %101 = tpu.concatenate %86, %88, %90, %92, %94, %96, %98, %100 in 0 : vector<8x40xf32>, vector<8x40xf32>, vector<8x40xf32>, vector<8x40xf32>, vector<8x40xf32>, vector<8x40xf32>, vector<8x40xf32>, vector<8x40xf32> -> vector<64x40xf32>
    %c4 = arith.constant 4 : index
    %c0_175 = arith.constant 0 : index
    %c0_176 = arith.constant 0 : index
    %102 = vector.load %arg2[%c4, %c0_175, %c0_176] : memref<5x40x512xf32, #tpu.memory_space<vmem>>, vector<1x40x512xf32>
    %103 = vector.shape_cast %102 : vector<1x40x512xf32> to vector<40x512xf32>
    %cst_177 = arith.constant dense<0.000000e+00> : vector<64x512xf32>
    %104 = tpu.matmul %101, %103, %cst_177 {dimension_numbers = #tpu.dot_dimension_numbers<[1], [0], [0], [1], [0, 0, 1, 1], [], []>} : vector<64x40xf32>, vector<40x512xf32>, vector<64x512xf32> -> vector<64x512xf32>
    %105 = arith.addf %84, %104 : vector<64x512xf32>
    %c0_178 = arith.constant 0 : index
    %c0_179 = arith.constant 0 : index
    %106 = vector.load %arg3[%c0_178, %c0_179] : memref<1x256xf32, #tpu.memory_space<vmem>>, vector<1x256xf32>
    %107 = vector.extract_strided_slice %105 {offsets = [0, 0], sizes = [32, 512], strides = [1, 1]} : vector<64x512xf32> to vector<32x512xf32>
    %108 = vector.extract_strided_slice %107 {offsets = [0, 0], sizes = [32, 256], strides = [1, 1]} : vector<32x512xf32> to vector<32x256xf32>
    %109 = vector.extract_strided_slice %107 {offsets = [0, 256], sizes = [32, 256], strides = [1, 1]} : vector<32x512xf32> to vector<32x256xf32>
    %110 = arith.maximumf %108, %109 : vector<32x256xf32>
    %111 = vector.extract_strided_slice %110 {offsets = [0, 0], sizes = [8, 256], strides = [1, 1]} : vector<32x256xf32> to vector<8x256xf32>
    %112 = vector.extract_strided_slice %110 {offsets = [8, 0], sizes = [8, 256], strides = [1, 1]} : vector<32x256xf32> to vector<8x256xf32>
    %113 = arith.maximumf %111, %112 : vector<8x256xf32>
    %114 = vector.broadcast %106 : vector<1x256xf32> to vector<8x256xf32>
    %115 = arith.addf %113, %114 : vector<8x256xf32>
    %cst_180 = arith.constant 0.000000e+00 : f32
    %116 = vector.broadcast %cst_180 : f32 to vector<8x256xf32>
    %117 = arith.maximumf %115, %116 : vector<8x256xf32>
    %118 = vector.extract_strided_slice %110 {offsets = [16, 0], sizes = [8, 256], strides = [1, 1]} : vector<32x256xf32> to vector<8x256xf32>
    %119 = vector.extract_strided_slice %110 {offsets = [24, 0], sizes = [8, 256], strides = [1, 1]} : vector<32x256xf32> to vector<8x256xf32>
    %120 = arith.maximumf %118, %119 : vector<8x256xf32>
    %121 = vector.broadcast %106 : vector<1x256xf32> to vector<8x256xf32>
    %122 = arith.addf %120, %121 : vector<8x256xf32>
    %cst_181 = arith.constant 0.000000e+00 : f32
    %123 = vector.broadcast %cst_181 : f32 to vector<8x256xf32>
    %124 = arith.maximumf %122, %123 : vector<8x256xf32>
    %125 = vector.extract_strided_slice %105 {offsets = [32, 0], sizes = [32, 512], strides = [1, 1]} : vector<64x512xf32> to vector<32x512xf32>
    %126 = vector.extract_strided_slice %125 {offsets = [0, 0], sizes = [32, 256], strides = [1, 1]} : vector<32x512xf32> to vector<32x256xf32>
    %127 = vector.extract_strided_slice %125 {offsets = [0, 256], sizes = [32, 256], strides = [1, 1]} : vector<32x512xf32> to vector<32x256xf32>
    %128 = arith.maximumf %126, %127 : vector<32x256xf32>
    %129 = vector.extract_strided_slice %128 {offsets = [0, 0], sizes = [8, 256], strides = [1, 1]} : vector<32x256xf32> to vector<8x256xf32>
    %130 = vector.extract_strided_slice %128 {offsets = [8, 0], sizes = [8, 256], strides = [1, 1]} : vector<32x256xf32> to vector<8x256xf32>
    %131 = arith.maximumf %129, %130 : vector<8x256xf32>
    %132 = vector.broadcast %106 : vector<1x256xf32> to vector<8x256xf32>
    %133 = arith.addf %131, %132 : vector<8x256xf32>
    %cst_182 = arith.constant 0.000000e+00 : f32
    %134 = vector.broadcast %cst_182 : f32 to vector<8x256xf32>
    %135 = arith.maximumf %133, %134 : vector<8x256xf32>
    %136 = vector.extract_strided_slice %128 {offsets = [16, 0], sizes = [8, 256], strides = [1, 1]} : vector<32x256xf32> to vector<8x256xf32>
    %137 = vector.extract_strided_slice %128 {offsets = [24, 0], sizes = [8, 256], strides = [1, 1]} : vector<32x256xf32> to vector<8x256xf32>
    %138 = arith.maximumf %136, %137 : vector<8x256xf32>
    %139 = vector.broadcast %106 : vector<1x256xf32> to vector<8x256xf32>
    %140 = arith.addf %138, %139 : vector<8x256xf32>
    %cst_183 = arith.constant 0.000000e+00 : f32
    %141 = vector.broadcast %cst_183 : f32 to vector<8x256xf32>
    %142 = arith.maximumf %140, %141 : vector<8x256xf32>
    %143 = tpu.concatenate %117, %124, %135, %142 in 0 : vector<8x256xf32>, vector<8x256xf32>, vector<8x256xf32>, vector<8x256xf32> -> vector<32x256xf32>
    %c0_184 = arith.constant 0 : index
    %c0_185 = arith.constant 0 : index
    %c0_186 = arith.constant 0 : index
    %144 = vector.load %arg4[%c0_184, %c0_185, %c0_186] : memref<5x256x256xf32, #tpu.memory_space<vmem>>, vector<1x256x256xf32>
    %145 = vector.shape_cast %144 : vector<1x256x256xf32> to vector<256x256xf32>
    %cst_187 = arith.constant dense<0.000000e+00> : vector<32x256xf32>
    %146 = tpu.matmul %143, %145, %cst_187 {dimension_numbers = #tpu.dot_dimension_numbers<[1], [0], [0], [1], [0, 0, 1, 1], [], []>} : vector<32x256xf32>, vector<256x256xf32>, vector<32x256xf32> -> vector<32x256xf32>
    %c7_i32 = arith.constant 7 : i32
    %147 = tpu.dynamic_rotate %117 by %c7_i32 dim 0 : vector<8x256xf32>, i32 -> vector<8x256xf32>
    %c7_i32_188 = arith.constant 7 : i32
    %148 = tpu.dynamic_rotate %135 by %c7_i32_188 dim 0 : vector<8x256xf32>, i32 -> vector<8x256xf32>
    %149 = tpu.concatenate %124, %147, %142, %148 in 0 : vector<8x256xf32>, vector<8x256xf32>, vector<8x256xf32>, vector<8x256xf32> -> vector<32x256xf32>
    %c1_189 = arith.constant 1 : index
    %c0_190 = arith.constant 0 : index
    %c0_191 = arith.constant 0 : index
    %150 = vector.load %arg4[%c1_189, %c0_190, %c0_191] : memref<5x256x256xf32, #tpu.memory_space<vmem>>, vector<1x256x256xf32>
    %151 = vector.shape_cast %150 : vector<1x256x256xf32> to vector<256x256xf32>
    %cst_192 = arith.constant dense<0.000000e+00> : vector<32x256xf32>
    %152 = tpu.matmul %149, %151, %cst_192 {dimension_numbers = #tpu.dot_dimension_numbers<[1], [0], [0], [1], [0, 0, 1, 1], [], []>} : vector<32x256xf32>, vector<256x256xf32>, vector<32x256xf32> -> vector<32x256xf32>
    %153 = arith.addf %146, %152 : vector<32x256xf32>
    %c7_i32_193 = arith.constant 7 : i32
    %154 = tpu.dynamic_rotate %117 by %c7_i32_193 dim 0 : vector<8x256xf32>, i32 -> vector<8x256xf32>
    %c7_i32_194 = arith.constant 7 : i32
    %155 = tpu.dynamic_rotate %124 by %c7_i32_194 dim 0 : vector<8x256xf32>, i32 -> vector<8x256xf32>
    %c7_i32_195 = arith.constant 7 : i32
    %156 = tpu.dynamic_rotate %135 by %c7_i32_195 dim 0 : vector<8x256xf32>, i32 -> vector<8x256xf32>
    %c7_i32_196 = arith.constant 7 : i32
    %157 = tpu.dynamic_rotate %142 by %c7_i32_196 dim 0 : vector<8x256xf32>, i32 -> vector<8x256xf32>
    %158 = tpu.concatenate %154, %155, %156, %157 in 0 : vector<8x256xf32>, vector<8x256xf32>, vector<8x256xf32>, vector<8x256xf32> -> vector<32x256xf32>
    %c2_197 = arith.constant 2 : index
    %c0_198 = arith.constant 0 : index
    %c0_199 = arith.constant 0 : index
    %159 = vector.load %arg4[%c2_197, %c0_198, %c0_199] : memref<5x256x256xf32, #tpu.memory_space<vmem>>, vector<1x256x256xf32>
    %160 = vector.shape_cast %159 : vector<1x256x256xf32> to vector<256x256xf32>
    %cst_200 = arith.constant dense<0.000000e+00> : vector<32x256xf32>
    %161 = tpu.matmul %158, %160, %cst_200 {dimension_numbers = #tpu.dot_dimension_numbers<[1], [0], [0], [1], [0, 0, 1, 1], [], []>} : vector<32x256xf32>, vector<256x256xf32>, vector<32x256xf32> -> vector<32x256xf32>
    %162 = arith.addf %153, %161 : vector<32x256xf32>
    %c7_i32_201 = arith.constant 7 : i32
    %163 = tpu.dynamic_rotate %124 by %c7_i32_201 dim 0 : vector<8x256xf32>, i32 -> vector<8x256xf32>
    %c6_i32 = arith.constant 6 : i32
    %164 = tpu.dynamic_rotate %117 by %c6_i32 dim 0 : vector<8x256xf32>, i32 -> vector<8x256xf32>
    %c7_i32_202 = arith.constant 7 : i32
    %165 = tpu.dynamic_rotate %142 by %c7_i32_202 dim 0 : vector<8x256xf32>, i32 -> vector<8x256xf32>
    %c6_i32_203 = arith.constant 6 : i32
    %166 = tpu.dynamic_rotate %135 by %c6_i32_203 dim 0 : vector<8x256xf32>, i32 -> vector<8x256xf32>
    %167 = tpu.concatenate %163, %164, %165, %166 in 0 : vector<8x256xf32>, vector<8x256xf32>, vector<8x256xf32>, vector<8x256xf32> -> vector<32x256xf32>
    %c3_204 = arith.constant 3 : index
    %c0_205 = arith.constant 0 : index
    %c0_206 = arith.constant 0 : index
    %168 = vector.load %arg4[%c3_204, %c0_205, %c0_206] : memref<5x256x256xf32, #tpu.memory_space<vmem>>, vector<1x256x256xf32>
    %169 = vector.shape_cast %168 : vector<1x256x256xf32> to vector<256x256xf32>
    %cst_207 = arith.constant dense<0.000000e+00> : vector<32x256xf32>
    %170 = tpu.matmul %167, %169, %cst_207 {dimension_numbers = #tpu.dot_dimension_numbers<[1], [0], [0], [1], [0, 0, 1, 1], [], []>} : vector<32x256xf32>, vector<256x256xf32>, vector<32x256xf32> -> vector<32x256xf32>
    %171 = arith.addf %162, %170 : vector<32x256xf32>
    %c6_i32_208 = arith.constant 6 : i32
    %172 = tpu.dynamic_rotate %117 by %c6_i32_208 dim 0 : vector<8x256xf32>, i32 -> vector<8x256xf32>
    %c6_i32_209 = arith.constant 6 : i32
    %173 = tpu.dynamic_rotate %124 by %c6_i32_209 dim 0 : vector<8x256xf32>, i32 -> vector<8x256xf32>
    %c6_i32_210 = arith.constant 6 : i32
    %174 = tpu.dynamic_rotate %135 by %c6_i32_210 dim 0 : vector<8x256xf32>, i32 -> vector<8x256xf32>
    %c6_i32_211 = arith.constant 6 : i32
    %175 = tpu.dynamic_rotate %142 by %c6_i32_211 dim 0 : vector<8x256xf32>, i32 -> vector<8x256xf32>
    %176 = tpu.concatenate %172, %173, %174, %175 in 0 : vector<8x256xf32>, vector<8x256xf32>, vector<8x256xf32>, vector<8x256xf32> -> vector<32x256xf32>
    %c4_212 = arith.constant 4 : index
    %c0_213 = arith.constant 0 : index
    %c0_214 = arith.constant 0 : index
    %177 = vector.load %arg4[%c4_212, %c0_213, %c0_214] : memref<5x256x256xf32, #tpu.memory_space<vmem>>, vector<1x256x256xf32>
    %178 = vector.shape_cast %177 : vector<1x256x256xf32> to vector<256x256xf32>
    %cst_215 = arith.constant dense<0.000000e+00> : vector<32x256xf32>
    %179 = tpu.matmul %176, %178, %cst_215 {dimension_numbers = #tpu.dot_dimension_numbers<[1], [0], [0], [1], [0, 0, 1, 1], [], []>} : vector<32x256xf32>, vector<256x256xf32>, vector<32x256xf32> -> vector<32x256xf32>
    %180 = arith.addf %171, %179 : vector<32x256xf32>
    %c0_216 = arith.constant 0 : index
    %c0_217 = arith.constant 0 : index
    %181 = vector.load %arg5[%c0_216, %c0_217] : memref<1x128xf32, #tpu.memory_space<vmem>>, vector<1x128xf32>
    %182 = vector.extract_strided_slice %180 {offsets = [0, 0], sizes = [16, 256], strides = [1, 1]} : vector<32x256xf32> to vector<16x256xf32>
    %183 = vector.extract_strided_slice %182 {offsets = [0, 0], sizes = [16, 128], strides = [1, 1]} : vector<16x256xf32> to vector<16x128xf32>
    %184 = vector.extract_strided_slice %182 {offsets = [0, 128], sizes = [16, 128], strides = [1, 1]} : vector<16x256xf32> to vector<16x128xf32>
    %185 = arith.maximumf %183, %184 : vector<16x128xf32>
    %186 = vector.extract_strided_slice %185 {offsets = [0, 0], sizes = [8, 128], strides = [1, 1]} : vector<16x128xf32> to vector<8x128xf32>
    %187 = vector.extract_strided_slice %185 {offsets = [8, 0], sizes = [8, 128], strides = [1, 1]} : vector<16x128xf32> to vector<8x128xf32>
    %188 = arith.maximumf %186, %187 : vector<8x128xf32>
    %189 = vector.broadcast %181 : vector<1x128xf32> to vector<8x128xf32>
    %190 = arith.addf %188, %189 : vector<8x128xf32>
    %cst_218 = arith.constant 0.000000e+00 : f32
    %191 = vector.broadcast %cst_218 : f32 to vector<8x128xf32>
    %192 = arith.maximumf %190, %191 : vector<8x128xf32>
    %193 = vector.extract_strided_slice %180 {offsets = [16, 0], sizes = [16, 256], strides = [1, 1]} : vector<32x256xf32> to vector<16x256xf32>
    %194 = vector.extract_strided_slice %193 {offsets = [0, 0], sizes = [16, 128], strides = [1, 1]} : vector<16x256xf32> to vector<16x128xf32>
    %195 = vector.extract_strided_slice %193 {offsets = [0, 128], sizes = [16, 128], strides = [1, 1]} : vector<16x256xf32> to vector<16x128xf32>
    %196 = arith.maximumf %194, %195 : vector<16x128xf32>
    %197 = vector.extract_strided_slice %196 {offsets = [0, 0], sizes = [8, 128], strides = [1, 1]} : vector<16x128xf32> to vector<8x128xf32>
    %198 = vector.extract_strided_slice %196 {offsets = [8, 0], sizes = [8, 128], strides = [1, 1]} : vector<16x128xf32> to vector<8x128xf32>
    %199 = arith.maximumf %197, %198 : vector<8x128xf32>
    %200 = vector.broadcast %181 : vector<1x128xf32> to vector<8x128xf32>
    %201 = arith.addf %199, %200 : vector<8x128xf32>
    %cst_219 = arith.constant 0.000000e+00 : f32
    %202 = vector.broadcast %cst_219 : f32 to vector<8x128xf32>
    %203 = arith.maximumf %201, %202 : vector<8x128xf32>
    %204 = tpu.concatenate %192, %203 in 0 : vector<8x128xf32>, vector<8x128xf32> -> vector<16x128xf32>
    %c0_220 = arith.constant 0 : index
    %c0_221 = arith.constant 0 : index
    %205 = vector.load %arg6[%c0_220, %c0_221] : memref<128x768xf32, #tpu.memory_space<vmem>>, vector<128x768xf32>
    %cst_222 = arith.constant dense<0.000000e+00> : vector<16x768xf32>
    %206 = tpu.matmul %204, %205, %cst_222 {dimension_numbers = #tpu.dot_dimension_numbers<[1], [0], [0], [1], [0, 0, 1, 1], [], []>} : vector<16x128xf32>, vector<128x768xf32>, vector<16x768xf32> -> vector<16x768xf32>
    %c0_223 = arith.constant 0 : index
    %c0_224 = arith.constant 0 : index
    %207 = vector.load %arg7[%c0_223, %c0_224] : memref<1x128xf32, #tpu.memory_space<vmem>>, vector<1x128xf32>
    %208 = vector.extract_strided_slice %206 {offsets = [0, 0], sizes = [1, 128], strides = [1, 1]} : vector<16x768xf32> to vector<1x128xf32>
    %209 = arith.addf %207, %208 : vector<1x128xf32>
    %210 = vector.extract_strided_slice %206 {offsets = [1, 128], sizes = [1, 128], strides = [1, 1]} : vector<16x768xf32> to vector<1x128xf32>
    %211 = arith.addf %209, %210 : vector<1x128xf32>
    %212 = vector.extract_strided_slice %206 {offsets = [2, 256], sizes = [1, 128], strides = [1, 1]} : vector<16x768xf32> to vector<1x128xf32>
    %213 = arith.addf %211, %212 : vector<1x128xf32>
    %214 = vector.extract_strided_slice %206 {offsets = [3, 384], sizes = [1, 128], strides = [1, 1]} : vector<16x768xf32> to vector<1x128xf32>
    %215 = arith.addf %213, %214 : vector<1x128xf32>
    %216 = vector.extract_strided_slice %206 {offsets = [4, 512], sizes = [1, 128], strides = [1, 1]} : vector<16x768xf32> to vector<1x128xf32>
    %217 = arith.addf %215, %216 : vector<1x128xf32>
    %218 = vector.extract_strided_slice %206 {offsets = [5, 640], sizes = [1, 128], strides = [1, 1]} : vector<16x768xf32> to vector<1x128xf32>
    %219 = arith.addf %217, %218 : vector<1x128xf32>
    %cst_225 = arith.constant 0.000000e+00 : f32
    %220 = vector.broadcast %cst_225 : f32 to vector<1x128xf32>
    %221 = arith.maximumf %219, %220 : vector<1x128xf32>
    %c0_226 = arith.constant 0 : index
    %c0_227 = arith.constant 0 : index
    %222 = vector.load %arg8[%c0_226, %c0_227] : memref<128x128xf32, #tpu.memory_space<vmem>>, vector<128x128xf32>
    %cst_228 = arith.constant dense<0.000000e+00> : vector<1x128xf32>
    %223 = tpu.matmul %221, %222, %cst_228 {dimension_numbers = #tpu.dot_dimension_numbers<[1], [0], [0], [1], [0, 0, 1, 1], [], []>} : vector<1x128xf32>, vector<128x128xf32>, vector<1x128xf32> -> vector<1x128xf32>
    %c0_229 = arith.constant 0 : index
    %c0_230 = arith.constant 0 : index
    %224 = vector.load %arg9[%c0_229, %c0_230] : memref<1x128xf32, #tpu.memory_space<vmem>>, vector<1x128xf32>
    %225 = arith.addf %223, %224 : vector<1x128xf32>
    %c0_231 = arith.constant 0 : index
    %c0_232 = arith.constant 0 : index
    %c0_233 = arith.constant 0 : index
    %226 = vector.load %arg10[%c0_231, %c0_232, %c0_233] : memref<1x8x128xf32, #tpu.memory_space<vmem>>, vector<1x1x128xf32>
    %227 = vector.shape_cast %226 : vector<1x1x128xf32> to vector<1x128xf32>
    %228 = vector.shape_cast %225 : vector<1x128xf32> to vector<1x1x128xf32>
    tpu.vector_store %arg10[%c0_231, %c0_232, %c0_233], %228 {strides = array<i32>} : memref<1x8x128xf32, #tpu.memory_space<vmem>>, vector<1x1x128xf32>,
    %229 = vector.extract_strided_slice %206 {offsets = [8, 0], sizes = [1, 128], strides = [1, 1]} : vector<16x768xf32> to vector<1x128xf32>
    %230 = arith.addf %207, %229 : vector<1x128xf32>
    %231 = vector.extract_strided_slice %206 {offsets = [9, 128], sizes = [1, 128], strides = [1, 1]} : vector<16x768xf32> to vector<1x128xf32>
    %232 = arith.addf %230, %231 : vector<1x128xf32>
    %233 = vector.extract_strided_slice %206 {offsets = [10, 256], sizes = [1, 128], strides = [1, 1]} : vector<16x768xf32> to vector<1x128xf32>
    %234 = arith.addf %232, %233 : vector<1x128xf32>
    %235 = vector.extract_strided_slice %206 {offsets = [11, 384], sizes = [1, 128], strides = [1, 1]} : vector<16x768xf32> to vector<1x128xf32>
    %236 = arith.addf %234, %235 : vector<1x128xf32>
    %237 = vector.extract_strided_slice %206 {offsets = [12, 512], sizes = [1, 128], strides = [1, 1]} : vector<16x768xf32> to vector<1x128xf32>
    %238 = arith.addf %236, %237 : vector<1x128xf32>
    %239 = vector.extract_strided_slice %206 {offsets = [13, 640], sizes = [1, 128], strides = [1, 1]} : vector<16x768xf32> to vector<1x128xf32>
    %240 = arith.addf %238, %239 : vector<1x128xf32>
    %cst_234 = arith.constant 0.000000e+00 : f32
    %241 = vector.broadcast %cst_234 : f32 to vector<1x128xf32>
    %242 = arith.maximumf %240, %241 : vector<1x128xf32>
    %c0_235 = arith.constant 0 : index
    %c0_236 = arith.constant 0 : index
    %243 = vector.load %arg8[%c0_235, %c0_236] : memref<128x128xf32, #tpu.memory_space<vmem>>, vector<128x128xf32>
    %cst_237 = arith.constant dense<0.000000e+00> : vector<1x128xf32>
    %244 = tpu.matmul %242, %243, %cst_237 {dimension_numbers = #tpu.dot_dimension_numbers<[1], [0], [0], [1], [0, 0, 1, 1], [], []>} : vector<1x128xf32>, vector<128x128xf32>, vector<1x128xf32> -> vector<1x128xf32>
    %c0_238 = arith.constant 0 : index
    %c0_239 = arith.constant 0 : index
    %245 = vector.load %arg9[%c0_238, %c0_239] : memref<1x128xf32, #tpu.memory_space<vmem>>, vector<1x128xf32>
    %246 = arith.addf %244, %245 : vector<1x128xf32>
    %c0_240 = arith.constant 0 : index
    %c1_241 = arith.constant 1 : index
    %c0_242 = arith.constant 0 : index
    %247 = vector.load %arg10[%c0_240, %c1_241, %c0_242] : memref<1x8x128xf32, #tpu.memory_space<vmem>>, vector<1x1x128xf32>
    %248 = vector.shape_cast %247 : vector<1x1x128xf32> to vector<1x128xf32>
    %249 = vector.shape_cast %246 : vector<1x128xf32> to vector<1x1x128xf32>
    tpu.vector_store %arg10[%c0_240, %c1_241, %c0_242], %249 {strides = array<i32>} : memref<1x8x128xf32, #tpu.memory_space<vmem>>, vector<1x1x128xf32>,
    return
  }
  func.func @transform_0(%arg0: i32) -> (i32, i32, i32, i32) {
    %c0_i32 = arith.constant 0 : i32
    %c0_i32_0 = arith.constant 0 : i32
    %c0_i32_1 = arith.constant 0 : i32
    %c0_i32_2 = arith.constant 0 : i32
    return %arg0, %c0_i32, %c0_i32_0, %c0_i32_1 : i32, i32, i32, i32
  }
  func.func @transform_1(%arg0: i32) -> (i32, i32, i32) {
    %c0_i32 = arith.constant 0 : i32
    %c0_i32_0 = arith.constant 0 : i32
    %c0_i32_1 = arith.constant 0 : i32
    %c0_i32_2 = arith.constant 0 : i32
    return %c0_i32, %c0_i32_0, %c0_i32_1 : i32, i32, i32
  }
  func.func @transform_2(%arg0: i32) -> (i32, i32) {
    %c0_i32 = arith.constant 0 : i32
    %c0_i32_0 = arith.constant 0 : i32
    %c0_i32_1 = arith.constant 0 : i32
    return %c0_i32, %c0_i32_0 : i32, i32
  }
  func.func @transform_3(%arg0: i32) -> (i32, i32, i32) {
    %c0_i32 = arith.constant 0 : i32
    %c0_i32_0 = arith.constant 0 : i32
    %c0_i32_1 = arith.constant 0 : i32
    %c0_i32_2 = arith.constant 0 : i32
    return %c0_i32, %c0_i32_0, %c0_i32_1 : i32, i32, i32
  }
  func.func @transform_4(%arg0: i32) -> (i32, i32) {
    %c0_i32 = arith.constant 0 : i32
    %c0_i32_0 = arith.constant 0 : i32
    %c0_i32_1 = arith.constant 0 : i32
    return %c0_i32, %c0_i32_0 : i32, i32
  }
  func.func @transform_5(%arg0: i32) -> (i32, i32) {
    %c0_i32 = arith.constant 0 : i32
    %c0_i32_0 = arith.constant 0 : i32
    %c0_i32_1 = arith.constant 0 : i32
    return %c0_i32, %c0_i32_0 : i32, i32
  }
  func.func @transform_6(%arg0: i32) -> (i32, i32) {
    %c0_i32 = arith.constant 0 : i32
    %c0_i32_0 = arith.constant 0 : i32
    %c0_i32_1 = arith.constant 0 : i32
    return %c0_i32, %c0_i32_0 : i32, i32
  }
  func.func @transform_7(%arg0: i32) -> (i32, i32) {
    %c0_i32 = arith.constant 0 : i32
    %c0_i32_0 = arith.constant 0 : i32
    %c0_i32_1 = arith.constant 0 : i32
    return %c0_i32, %c0_i32_0 : i32, i32
  }
  func.func @transform_8(%arg0: i32) -> (i32, i32) {
    %c0_i32 = arith.constant 0 : i32
    %c0_i32_0 = arith.constant 0 : i32
    %c0_i32_1 = arith.constant 0 : i32
    return %c0_i32, %c0_i32_0 : i32, i32
  }
  func.func @transform_9(%arg0: i32) -> (i32, i32, i32) {
    %c0_i32 = arith.constant 0 : i32
    %c0_i32_0 = arith.constant 0 : i32
    %c0_i32_1 = arith.constant 0 : i32
    return %arg0, %c0_i32, %c0_i32_0 : i32, i32, i32
  }
}

</mosaic_0001>

<bundles_post_ra>
// kernel: multi_lenet_forward.1
= control target key start
LH: loop header
LB: loop body
LE: loop exit
PB: predicated region body
PF: predicated region fallthrough
CT: control target
= control target key end

     0   :  { %14 = vsyncpa [#allocation3], 0  ;;  %s5664_s0 = inlined_call_operand.vmem [shape: f32[4,4,9,40], index: 0, kind: input, shape index: {}]   ;;  %s5665_s1 = inlined_call_operand.hbm [shape: f32[5,40,512], index: 1, kind: input, shape index: {}]   ;;  %s5666_s2 = inlined_call_operand.hbm [shape: f32[1,256], index: 2, kind: input, shape index: {}]   ;;  %s5667_s3 = inlined_call_operand.hbm [shape: f32[5,256,256], index: 3, kind: input, shape index: {}]   ;;  %s5668_s4 = inlined_call_operand.hbm [shape: f32[1,128], index: 4, kind: input, shape index: {}]   ;;  %s5669_s5 = inlined_call_operand.hbm [shape: f32[128,768], index: 5, kind: input, shape index: {}]   ;;  %s5670_s6 = inlined_call_operand.hbm [shape: f32[1,128], index: 6, kind: input, shape index: {}]   ;;  %s5671_s7 = inlined_call_operand.hbm [shape: f32[128,128], index: 7, kind: input, shape index: {}]   ;;  %s5672_s8 = inlined_call_operand.hbm [shape: f32[1,128], index: 8, kind: input, shape index: {}]   ;;  %s5673_s9 = inlined_call_operand.vmem [shape: f32[2,8,128], index: 9, kind: output, shape index: {}]  }
   0x1   :  { %15 = vsyncpa [#allocation5], 0 }
   0x2   :  { %16 = vsyncpa [#allocation8], 0 }
   0x3   :  { %17 = vsyncpa [#allocation11], 0 }
   0x4   :  { %18 = vsyncpa [#allocation14], 0  ;;  %s4910_s30 = smov 0  }
   0x5 LB: > { %s4840_s10 = smov [#allocation4]   ;;  %s4916_s12 = sadd.s32 4294967295, %s4838_s30   ;;  %s4838_s30 = sphi %s4910_s30, %s24_s30  }
   0x6   : > { %s275_s11 = sshll.u32 %s4840_s10, 4  ;;  %p3552_p0 = scmp.ge.s32.totalorder %s4838_s30, 1  ;;  %s4921_s11 = int_to_ptr.vmem [resolvable:$true] %s275_s11 }
   0x7   : > { %p249_p1 = scmp.lt.s32.totalorder %s4838_s30, 3  ;;  %p5674_p2 = scmp.eq.s32.totalorder %s4916_s12, 0 }
   0x8   : > { %s4841_s14 = smov [#allocation7]   ;;  %s4842_s16 = smov [#allocation10]  }
   0x9   : > { %p4923_p3 = pnand %p3552_p0, %p249_p1  ;;  %s299_s15 = sshll.u32 %s4841_s14, 4  ;;  %s4929_s15 = int_to_ptr.vmem [resolvable:$true] %s299_s15 }
   0xa   : > { %s323_s17 = sshll.u32 %s4842_s16, 4  ;;  %s4843_s19 = smov [#allocation2]   ;;  %s4937_s17 = int_to_ptr.vmem [resolvable:$true] %s323_s17 }
   0xb   : > { %s5676_s13 = scalar_select %p4923_p3, 1, 0 }
   0xc   : > { %p4519_p4 = pneg %p4923_p3  ;;  %s261_s20 = sshll.u32 %s4843_s19, 4  ;;  %s4939_s20 = int_to_ptr.vmem [resolvable:$true] %s261_s20 }
   0xd   : > { %s4588_s23 = scalar_lea.hbm %s5666_s2, 32 }
   0xe   : > { %p4933_p5 = pnand %p5674_p2, %p4519_p4  ;;  %p4589_p6 = scmp.ne.s32.totalorder %s5666_s2, %s4588_s23 }
   0xf   : > { %p4595_p10 = scmp.lt.u32.totalorder %s4588_s23, %s5666_s2 }
  0x10   : > { %p4949_p7 = pneg %p4933_p5 }
  0x12   : > { %p4591_p8 = pnand %p4949_p7, %p4589_p6 }
  0x14   : > { %p4592_p9 = pneg %p4591_p8 }
  0x16   : > { %p4597_p11 = pnand %p4595_p10, %p4592_p9 }
  0x18   : > { %4600 = shalt.err (!%p4597_p11)
}
  0x19   : > { %s4601_s29 = scalar_lea.vmem %s4921_s11, 32  ;;  %p4609_p1 = scmp.lt.s32.totalorder %s4921_s11, %s4921_s11 }
  0x1a   : > { %p4602_p12 = scmp.ne.s32.totalorder %s4921_s11, %s4601_s29  ;;  %p4610_p4 = scmp.lt.s32.totalorder %s4601_s29, %s4601_s29 }
  0x1c   : > { %p4604_p13 = pnand %p4602_p12, %p4949_p7  ;;  %p4611_p6 = por %p4610_p4, %p4609_p1 }
  0x1e   : > { %p4605_p0 = pneg %p4604_p13 }
  0x20   : > { %p4612_p8 = pnand %p4611_p6, %p4605_p0 }
  0x22   : > { %4615 = shalt.err (!%p4612_p8)
}
  0x23   : > { %4525 = dma.hbm_to_vmem [thread:$0]  (!%p4933_p5), %s5666_s2, 32, %s4921_s11, [#allocation5]  }
  0x24   : > { %s4616_s21 = scalar_lea.hbm %s5668_s4, 16 }
  0x25   : > { %p4617_p9 = scmp.ne.s32.totalorder %s5668_s4, %s4616_s21  ;;  %p4623_p12 = scmp.lt.u32.totalorder %s4616_s21, %s5668_s4 }
  0x27   : > { %p4619_p10 = pnand %p4617_p9, %p4949_p7 }
  0x29   : > { %p4620_p11 = pneg %p4619_p10 }
  0x2b   : > { %p4625_p13 = pnand %p4623_p12, %p4620_p11 }
  0x2d   : > { %4628 = shalt.err (!%p4625_p13)
}
  0x2e   : > { %s4629_s11 = scalar_lea.vmem %s4929_s15, 16  ;;  %s4636_s27 = scalar_lea.vmem %s4929_s15, 32 }
  0x2f   : > { %p4630_p0 = scmp.ne.s32.totalorder %s4929_s15, %s4629_s11  ;;  %p4637_p6 = scmp.lt.s32.totalorder %s4929_s15, %s4929_s15 }
  0x30   : > { %p4638_p8 = scmp.lt.s32.totalorder %s4636_s27, %s4629_s11 }
  0x31   : > { %p4632_p1 = pnand %p4630_p0, %p4949_p7 }
  0x32   : > { %p4639_p9 = por %p4638_p8, %p4637_p6 }
  0x33   : > { %p4633_p4 = pneg %p4632_p1 }
  0x35   : > { %p4640_p10 = pnand %p4639_p9, %p4633_p4 }
  0x37   : > { %4643 = shalt.err (!%p4640_p10)
}
  0x38   : > { %4531 = dma.hbm_to_vmem [thread:$0]  (!%p4933_p5), %s5668_s4, 16, %s4929_s15, [#allocation8]  }
  0x39   : > { %s4644_s16 = scalar_lea.hbm %s5670_s6, 16 }
  0x3a   : > { %p4645_p11 = scmp.ne.s32.totalorder %s5670_s6, %s4644_s16  ;;  %p4651_p0 = scmp.lt.u32.totalorder %s4644_s16, %s5670_s6 }
  0x3c   : > { %p4647_p12 = pnand %p4645_p11, %p4949_p7 }
  0x3e   : > { %p4648_p13 = pneg %p4647_p12 }
  0x40   : > { %p4653_p1 = pnand %p4651_p0, %p4648_p13 }
  0x42   : > { %4656 = shalt.err (!%p4653_p1)
}
  0x43   : > { %s4657_s15 = scalar_lea.vmem %s4937_s17, 16  ;;  %s4664_s24 = scalar_lea.vmem %s4937_s17, 32 }
  0x44   : > { %p4658_p4 = scmp.ne.s32.totalorder %s4937_s17, %s4657_s15  ;;  %p4665_p9 = scmp.lt.s32.totalorder %s4937_s17, %s4937_s17 }
  0x45   : > { %p4666_p10 = scmp.lt.s32.totalorder %s4664_s24, %s4657_s15 }
  0x46   : > { %p4660_p6 = pnand %p4658_p4, %p4949_p7 }
  0x47   : > { %p4667_p11 = por %p4666_p10, %p4665_p9 }
  0x48   : > { %p4661_p8 = pneg %p4660_p6 }
  0x4a   : > { %p4668_p12 = pnand %p4667_p11, %p4661_p8 }
  0x4c   : > { %4671 = shalt.err (!%p4668_p12)
}
  0x4d   : > { %4537 = dma.hbm_to_vmem [thread:$0]  (!%p4933_p5), %s5670_s6, 16, %s4937_s17, [#allocation11]  }
  0x4e   : > { %s4672_s29 = scalar_lea.hbm %s5665_s1, 12800 }
  0x4f   : > { %p4673_p13 = scmp.ne.s32.totalorder %s5665_s1, %s4672_s29  ;;  %p4679_p4 = scmp.lt.u32.totalorder %s4672_s29, %s5665_s1 }
  0x51   : > { %p4675_p0 = pnand %p4673_p13, %p4949_p7 }
  0x53   : > { %p4676_p1 = pneg %p4675_p0 }
  0x55   : > { %p4681_p6 = pnand %p4679_p4, %p4676_p1 }
  0x57   : > { %4684 = shalt.err (!%p4681_p6)
}
  0x58   : > { %s4685_s17 = scalar_lea.vmem %s4939_s20, 12800  ;;  %p4693_p11 = scmp.lt.s32.totalorder %s4939_s20, %s4939_s20 }
  0x59   : > { %p4686_p8 = scmp.ne.s32.totalorder %s4939_s20, %s4685_s17  ;;  %p4694_p12 = scmp.lt.s32.totalorder %s4685_s17, %s4685_s17 }
  0x5b   : > { %p4688_p9 = pnand %p4686_p8, %p4949_p7  ;;  %p4695_p13 = por %p4694_p12, %p4693_p11 }
  0x5d   : > { %p4689_p10 = pneg %p4688_p9 }
  0x5f   : > { %p4696_p0 = pnand %p4695_p13, %p4689_p10 }
  0x61   : > { %4699 = shalt.err (!%p4696_p0)
}
  0x62   : > { %s4844_s21 = smov 512   ;;  %s4845_s22 = smov 32  }
  0x63   : > { %4522 = dma.hbm_to_vmem [thread:$0]  (!%p4933_p5), %s5665_s1, 12800, %s4939_s20, [#allocation3], %s4844_s21, %s4844_s21, %s4845_s22  }
  0x64   : > { %s4846_s24 = smov [#allocation6]   ;;  %s4700_s28 = scalar_lea.hbm %s5667_s3, 40960 }
  0x65   : > { %s285_s25 = sshll.u32 %s4846_s24, 4  ;;  %p4701_p1 = scmp.ne.s32.totalorder %s5667_s3, %s4700_s28  ;;  %s286_s25 = int_to_ptr.vmem [resolvable:$true] %s285_s25 }
  0x66   : > { %p4707_p8 = scmp.lt.u32.totalorder %s4700_s28, %s5667_s3 }
  0x67   : > { %p4703_p4 = pnand %p4701_p1, %p4949_p7 }
  0x69   : > { %p4704_p6 = pneg %p4703_p4 }
  0x6b   : > { %p4709_p9 = pnand %p4707_p8, %p4704_p6 }
  0x6d   : > { %4712 = shalt.err (!%p4709_p9)
}
  0x6e   : > { %s4713_s20 = scalar_lea.vmem %s286_s25, 40960  ;;  %p4721_p13 = scmp.lt.s32.totalorder %s286_s25, %s286_s25 }
  0x6f   : > { %p4714_p10 = scmp.ne.s32.totalorder %s286_s25, %s4713_s20  ;;  %p4722_p0 = scmp.lt.s32.totalorder %s4713_s20, %s4713_s20 }
  0x71   : > { %p4716_p11 = pnand %p4714_p10, %p4949_p7  ;;  %p4723_p2 = por %p4722_p0, %p4721_p13 }
  0x73   : > { %p4717_p12 = pneg %p4716_p11 }
  0x75   : > { %p4724_p3 = pnand %p4723_p2, %p4717_p12 }
  0x77   : > { %4727 = shalt.err (!%p4724_p3)
}
  0x78   : > { %s4847_s19 = smov 256   ;;  %s4848_s17 = smov 16  }
  0x79   : > { %4528 = dma.hbm_to_vmem [thread:$0]  (!%p4933_p5), %s5667_s3, 40960, %s286_s25, [#allocation5], %s4847_s19, %s4847_s19, %s4848_s17  }
  0x7a   : > { %s4849_s23 = smov [#allocation9]   ;;  %s4728_s27 = scalar_lea.hbm %s5669_s5, 12288 }
  0x7b   : > { %s309_s15 = sshll.u32 %s4849_s23, 4  ;;  %p4729_p2 = scmp.ne.s32.totalorder %s5669_s5, %s4728_s27  ;;  %s310_s15 = int_to_ptr.vmem [resolvable:$true] %s309_s15 }
  0x7c   : > { %p4735_p4 = scmp.lt.u32.totalorder %s4728_s27, %s5669_s5 }
  0x7d   : > { %p4731_p3 = pnand %p4729_p2, %p4949_p7 }
  0x7f   : > { %p4732_p1 = pneg %p4731_p3 }
  0x81   : > { %p4737_p6 = pnand %p4735_p4, %p4732_p1 }
  0x83   : > { %4740 = shalt.err (!%p4737_p6)
}
  0x84   : > { %s4741_s25 = scalar_lea.vmem %s310_s15, 12288  ;;  %p4749_p11 = scmp.lt.s32.totalorder %s310_s15, %s310_s15 }
  0x85   : > { %p4742_p8 = scmp.ne.s32.totalorder %s310_s15, %s4741_s25  ;;  %p4750_p12 = scmp.lt.s32.totalorder %s4741_s25, %s4741_s25 }
  0x87   : > { %p4744_p9 = pnand %p4742_p8, %p4949_p7  ;;  %p4751_p13 = por %p4750_p12, %p4749_p11 }
  0x89   : > { %p4745_p10 = pneg %p4744_p9 }
  0x8b   : > { %p4752_p0 = pnand %p4751_p13, %p4745_p10 }
  0x8d   : > { %4755 = shalt.err (!%p4752_p0)
}
  0x8e   : > { %s4850_s16 = smov 768   ;;  %s4851_s20 = smov 48  }
  0x8f   : > { %4534 = dma.hbm_to_vmem [thread:$0]  (!%p4933_p5), %s5669_s5, 12288, %s310_s15, [#allocation8], %s4850_s16, %s4850_s16, %s4851_s20  }
  0x90   : > { %s4852_s21 = smov [#allocation12]   ;;  %s4756_s11 = scalar_lea.hbm %s5671_s7, 2048 }
  0x91   : > { %s333_s22 = sshll.u32 %s4852_s21, 4  ;;  %p4757_p2 = scmp.ne.s32.totalorder %s5671_s7, %s4756_s11  ;;  %s334_s22 = int_to_ptr.vmem [resolvable:$true] %s333_s22 }
  0x92   : > { %p4763_p4 = scmp.lt.u32.totalorder %s4756_s11, %s5671_s7 }
  0x93   : > { %p4759_p3 = pnand %p4757_p2, %p4949_p7 }
  0x95   : > { %p4760_p1 = pneg %p4759_p3 }
  0x97   : > { %p4765_p6 = pnand %p4763_p4, %p4760_p1 }
  0x99   : > { %4768 = shalt.err (!%p4765_p6)
}
  0x9a   : > { %s4769_s15 = scalar_lea.vmem %s334_s22, 2048  ;;  %p4777_p11 = scmp.lt.s32.totalorder %s334_s22, %s334_s22 }
  0x9b   : > { %p4770_p8 = scmp.ne.s32.totalorder %s334_s22, %s4769_s15  ;;  %p4778_p12 = scmp.lt.s32.totalorder %s4769_s15, %s4769_s15 }
  0x9d   : > { %p4772_p9 = pnand %p4770_p8, %p4949_p7  ;;  %p4779_p13 = por %p4778_p12, %p4777_p11 }
  0x9f   : > { %p4773_p10 = pneg %p4772_p9 }
  0xa1   : > { %p4780_p0 = pnand %p4779_p13, %p4773_p10 }
  0xa3   : > { %4783 = shalt.err (!%p4780_p0)
}
  0xa4   : > { %s4853_s14 = smov 128   ;;  %s4854_s25 = smov 8  }
  0xa5   : > { %4540 = dma.hbm_to_vmem [thread:$0]  (!%p4933_p5), %s5671_s7, 2048, %s334_s22, [#allocation11], %s4853_s14, %s4853_s14, %s4854_s25  }
  0xa6   : > { %s4855_s19 = smov [#allocation13]   ;;  %s4784_s24 = scalar_lea.hbm %s5672_s8, 16 }
  0xa7   : > { %s347_s17 = sshll.u32 %s4855_s19, 4  ;;  %p4785_p2 = scmp.ne.s32.totalorder %s5672_s8, %s4784_s24  ;;  %s348_s17 = int_to_ptr.vmem [resolvable:$true] %s347_s17 }
  0xa8   : > { %p4791_p4 = scmp.lt.u32.totalorder %s4784_s24, %s5672_s8 }
  0xa9   : > { %p4787_p3 = pnand %p4785_p2, %p4949_p7 }
  0xab   : > { %p4788_p1 = pneg %p4787_p3 }
  0xad   : > { %p4793_p6 = pnand %p4791_p4, %p4788_p1 }
  0xaf   : > { %4796 = shalt.err (!%p4793_p6)
}
  0xb0   : > { %s4797_s22 = scalar_lea.vmem %s348_s17, 16  ;;  %s4804_s10 = scalar_lea.vmem %s348_s17, 32 }
  0xb1   : > { %p4798_p8 = scmp.ne.s32.totalorder %s348_s17, %s4797_s22  ;;  %p4805_p11 = scmp.lt.s32.totalorder %s348_s17, %s348_s17 }
  0xb2   : > { %p4806_p12 = scmp.lt.s32.totalorder %s4804_s10, %s4797_s22 }
  0xb3   : > { %p4800_p9 = pnand %p4798_p8, %p4949_p7 }
  0xb4   : > { %p4807_p13 = por %p4806_p12, %p4805_p11 }
  0xb5   : > { %p4801_p10 = pneg %p4800_p9 }
  0xb7   : > { %p4808_p0 = pnand %p4807_p13, %p4801_p10 }
  0xb9   : > { %4811 = shalt.err (!%p4808_p0)
}
  0xba   : > { %4543 = dma.hbm_to_vmem [thread:$0]  (!%p4933_p5), %s5672_s8, 16, %s348_s17, [#allocation14]  }
  0xbb   : > { %p5679_p2 = scmp.ne.s32.totalorder %s5676_s13, 0 }
  0xbc   : > { %p5680_p3 = scmp.eq.s32.totalorder (!%p5679_p2), %s4916_s12, 0 }
  0xbd   : > { %370 = sbr.rel (%p5679_p2) target bundleno = 1552 (0x610), region = 56 }
  0xc4   : > { %4817 = dma.done.wait (%p5680_p3), [#allocation3], 12800   ;;  %p5681_p7 = pmov %p5680_p3 }
  0xc5   : > { %p5682_p1 = pmov %p5680_p3 }
  0xc6   : > { %4819 = vsyncadd (%p5681_p7), [#allocation3], 4294954496 }
  0xc7   : > { %4821 = dma.done.wait (%p5682_p1), [#allocation5], 40992   ;;  %p5683_p4 = pmov %p5682_p1 }
  0xc8   : > { %p5684_p6 = pmov %p5682_p1 }
  0xc9   : > { %4823 = vsyncadd (%p5683_p4), [#allocation5], 4294926304 }
  0xca   : > { %4825 = dma.done.wait (%p5684_p6), [#allocation8], 12304   ;;  %p5685_p5 = pmov %p5682_p1 }
  0xcb   : > { %p5686_p8 = pmov %p5682_p1 }
  0xcc   : > { %4827 = vsyncadd (%p5685_p5), [#allocation8], 4294954992 }
  0xcd   : > { %4829 = dma.done.wait (%p5686_p8), [#allocation11], 2064   ;;  %p5687_p9 = pmov %p5682_p1 }
  0xce   : > { %p5688_p10 = pmov %p5682_p1 }
  0xcf   : > { %4831 = vsyncadd (%p5687_p9), [#allocation11], 4294965232 }
  0xd0   : > { %4833 = dma.done.wait (%p5688_p10), [#allocation14], 16   ;;  %p5689_p11 = pmov %p5682_p1 }
  0xd1   : > { %s3571_s13 = sshll.u32 %s4916_s12, 1  ;;  %v4856_v0 = vmov 0.0   ;;  %v485_v1 = vld [vmem:[#allocation2 + $0xa8] sm:$0xff]  ;;  %v484_v3 = vld [vmem:[#allocation2 + $0xa0] sm:$0xff]  ;;  %v487_v14 = vld [vmem:[#allocation2 + $0xb8] sm:$0xff]  ;;  %vm504_vm0 = vcmask 326656  }
  0xd2   : > { %4835 = vsyncadd (%p5689_p11), [#allocation14], 4294967280  ;;  %593 = vmatprep.mubr.f32.mxu0 %v4856_v0  ;;  %611 = vmatprep.mubr.f32.mxu1 %v4856_v0  ;;  %p435_p12 = scmp.lt.s32.totalorder %s3571_s13, 3  ;;  %v489_v2 = vld [vmem:[#allocation2 + $0xc8] sm:$0xff]  ;;  %v488_v5 = vld [vmem:[#allocation2 + $0xc0] sm:$0xff]  ;;  %vm4858_vm1 = vmmov 0  }
  0xd3   : > { %v3777_v4 = vpack.c.bf16 %v489_v2, %v485_v1  ;;  %v493_v6 = vld [vmem:[#allocation2 + $0xe8] sm:$0xff]  ;;  %v3779_v8 = vpack.c.bf16 %v488_v5, %v484_v3  ;;  %v492_v10 = vld [vmem:[#allocation2 + $0xe0] sm:$0xff]  ;;  %v491_v15 = vld [vmem:[#allocation2 + $0xd8] sm:$0xff]  ;;  %p441_p13 = scmp.lt.s32.totalorder %s4916_s12, 1 }
  0xd4   : > { %s5691_s13 = smov (!%p435_p12, %s3571_s13), 3  ;;  %v497_v7 = vld [vmem:[#allocation2 + $0x108] sm:$0xff]  ;;  %v496_v11 = vld [vmem:[#allocation2 + $0x100] sm:$0xff]  ;;  %v486_v18 = vld [vmem:[#allocation2 + $0xb0] sm:$0xff]  ;;  %v3785_v25 = vpack.c.bf16 %v491_v15, %v487_v14 }
  0xd5   : > { %v3781_v9 = vpack.c.bf16 %v497_v7, %v493_v6  ;;  %3778 = vmatprep.subr.bf16.mxu0 %v3777_v4  ;;  %4321 = vmatprep.subr.bf16.mxu1 %v3777_v4  ;;  %v3783_v12 = vpack.c.bf16 %v496_v11, %v492_v10  ;;  %s3672_s18 = sshll.u32 %s5691_s13, 6  ;;  %v501_v13 = vld [vmem:[#allocation2 + $0x128] sm:$0xff]  ;;  %v490_v19 = vld [vmem:[#allocation2 + $0xd0] sm:$0xff]  ;;  %v500_v20 = vld [vmem:[#allocation2 + $0x120] sm:$0xff]  ;;  %s5693_s12 = smov (!%p441_p13, %s4916_s12), 1 }
  0xd6   : > { %3780 = vmatpush1.bf16.msra.mxu0 %v3779_v8  ;;  %4324 = vmatpush1.bf16.msra.mxu1 %v3779_v8  ;;  %s5141_s16 = scalar_lea.vmem %s5664_s0, %s3672_s18  ;;  %v462_v16 = vld [vmem:[#allocation2 + $0x8] sm:$0xff]  ;;  %v461_v21 = vld [vmem:[#allocation2] sm:$0xff]  ;;  %v3787_v27 = vpack.c.bf16 %v490_v19, %v486_v18  ;;  %v495_v31 = vld [vmem:[#allocation2 + $0xf8] sm:$0xff]  ;;  %s3574_s20 = sshll.u32 %s5693_s12, 3 }
  0xd7   : > { %3782 = vmatprep.subr.bf16.mxu0 %v3781_v9  ;;  %4322 = vmatprep.subr.bf16.mxu1 %v3781_v9  ;;  %v466_v17 = vld [vmem:[#allocation2 + $0x28] sm:$0xff]  ;;  %v465_v22 = vld [vmem:[#allocation2 + $0x20] sm:$0xff]  ;;  %v5144_v23 = vld [vmem:[%s5141_s16 + $0x10] sm:$0xff]  ;;  %s5637_s21 = scalar_lea.vmem %s5673_s9, %s3574_s20 }
  0xd8   : > { %v5147_v24 = vld [vmem:[%s5141_s16 + $0x1] sm:$0xff]  ;;  %v3793_v26 = vpack.c.bf16 %v466_v17, %v462_v16  ;;  %v3795_v30 = vpack.c.bf16 %v465_v22, %v461_v21  ;;  %v499_v32 = vld [vmem:[#allocation2 + $0x118] sm:$0xff]  ;;  %v494_v35 = vld [vmem:[#allocation2 + $0xf0] sm:$0xff]  ;;  %445 = vst [vmem:[%s5637_s21] sm:$0xff] %v4856_v0 }
  0xd9   : > { %v470_v28 = vld [vmem:[#allocation2 + $0x48] sm:$0xff]  ;;  %v469_v33 = vld [vmem:[#allocation2 + $0x40] sm:$0xff]  ;;  %v498_v36 = vld [vmem:[#allocation2 + $0x110] sm:$0xff]  ;;  %v3789_v40 = vpack.c.bf16 %v499_v32, %v495_v31 }
  0xda   : > { %3784 = vmatpush1.bf16.msra.mxu0 %v3783_v12  ;;  %4325 = vmatpush1.bf16.msra.mxu1 %v3783_v12  ;;  %v474_v29 = vld [vmem:[#allocation2 + $0x68] sm:$0xff]  ;;  %v473_v34 = vld [vmem:[#allocation2 + $0x60] sm:$0xff]  ;;  %v5157_v38 = vld [vmem:[%s5141_s16 + $0x50] sm:$0xff]  ;;  %v3791_v42 = vpack.c.bf16 %v498_v36, %v494_v35 }
  0xdb   : > { %537 = vmatprep.subr.mxu0 %v501_v13  ;;  %4323 = vmatprep.subr.mxu1 %v501_v13  ;;  %v5154_v37 = vld [vmem:[%s5141_s16 + $0x20] sm:$0xff]  ;;  %v3797_v39 = vpack.c.bf16 %v474_v29, %v470_v28  ;;  %v3799_v41 = vpack.c.bf16 %v473_v34, %v469_v33  ;;  %v5167_v43 = vld [vmem:[%s5141_s16 + $0x30] sm:$0xff]  ;;  %v478_v45 = vld [vmem:[#allocation2 + $0x88] sm:$0xff] }
  0xdc   : > { %v5170_v44 = vld [vmem:[%s5141_s16 + $0x60] sm:$0xff]  ;;  %v503_v47 = vld [vmem:[#allocation2 + $0x138] sm:$0xff]  ;;  %v991_v50 = vld [vmem:[#allocation2 + $0x148] sm:$0xff] }
  0xdd   : > { %v477_v46 = vld [vmem:[#allocation2 + $0x80] sm:$0xff]  ;;  %v464_v48 = vld [vmem:[#allocation2 + $0x18] sm:$0xff]  ;;  %v995_v51 = vld [vmem:[#allocation2 + $0x168] sm:$0xff] }
  0xde   : > { %538 = vmatpush1.msra.mxu0 %v500_v20  ;;  %4326 = vmatpush1.msra.mxu1 %v500_v20  ;;  %v468_v49 = vld [vmem:[#allocation2 + $0x38] sm:$0xff]  ;;  %v502_v52 = vld [vmem:[#allocation2 + $0x130] sm:$0xff]  ;;  %v990_v53 = vld [vmem:[#allocation2 + $0x140] sm:$0xff]  ;;  %v3809_v58 = vpack.c.bf16 %v995_v51, %v991_v50 }
  0xdf   : > { %3583 = vmatmul.mubr.msk.f32.vlgmr.msra.gmra.mrb[0].mxu0 %vm504_vm0, %v5144_v23  ;;  %3586 = vmatmul.mubr.msk.f32.vlgmr.msra.gmra.mrb[0].mxu1 %vm504_vm0, %v5147_v24  ;;  %v994_v54 = vld [vmem:[#allocation2 + $0x160] sm:$0xff]  ;;  %v5179_v55 = vld [vmem:[%s5141_s16 + $0x70] sm:$0xff]  ;;  %v3801_v57 = vpack.c.bf16 %v468_v49, %v464_v48  ;;  %v999_v60 = vld [vmem:[#allocation2 + $0x188] sm:$0xff] }
  0xe0   : > { %3786 = vmatprep.subr.bf16.mxu1 %v3785_v25  ;;  %3794 = vmatprep.subr.bf16.mxu0 %v3793_v26  ;;  %v5182_v56 = vld [vmem:[%s5141_s16] sm:$0xff]  ;;  %v3811_v59 = vpack.c.bf16 %v994_v54, %v990_v53  ;;  %v1003_v61 = vld [vmem:[#allocation2 + $0x1a8] sm:$0xff]  ;;  %v463_v2 = vld [vmem:[#allocation2 + $0x10] sm:$0xff] }
  0xe1   : > { %3788 = vmatpush1.bf16.msra.mxu1 %v3787_v27  ;;  %599 = vmatprep.mubr.f32.mxu0 %v4856_v0  ;;  %v998_v62 = vld [vmem:[#allocation2 + $0x180] sm:$0xff]  ;;  %v467_v3 = vld [vmem:[#allocation2 + $0x30] sm:$0xff]  ;;  %v3813_v4 = vpack.c.bf16 %v1003_v61, %v999_v60  ;;  %v472_v5 = vld [vmem:[#allocation2 + $0x58] sm:$0xff] }
  0xe2   : > { %617 = vmatprep.mubr.f32.mxu1 %v4856_v0  ;;  %3796 = vmatpush1.bf16.msra.mxu0 %v3795_v30  ;;  %v1002_v63 = vld [vmem:[#allocation2 + $0x1a0] sm:$0xff]  ;;  %v476_v6 = vld [vmem:[#allocation2 + $0x78] sm:$0xff]  ;;  %v3803_v8 = vpack.c.bf16 %v467_v3, %v463_v2  ;;  %v471_v10 = vld [vmem:[#allocation2 + $0x50] sm:$0xff] }
  0xe3   : > { %3584 = vmatmul.mubr.msk.f32.gmra.mrb[2].mxu0 %vm504_vm0, %v5154_v37  ;;  %3587 = vmatmul.mubr.msk.f32.gmra.mrb[2].mxu1 %vm504_vm0, %v5157_v38  ;;  %v5192_v1 = vld [vmem:[%s5141_s16 + $0x41] sm:$0xff]  ;;  %v3815_v7 = vpack.c.bf16 %v1002_v63, %v998_v62  ;;  %v3805_v9 = vpack.c.bf16 %v476_v6, %v472_v5  ;;  %v475_v11 = vld [vmem:[#allocation2 + $0x70] sm:$0xff]  ;;  %v480_v18 = vld [vmem:[#allocation2 + $0x98] sm:$0xff] }
  0xe4   : > { %3798 = vmatprep.subr.bf16.mxu0 %v3797_v39  ;;  %605 = vmatprep.mubr.f32.mxu0 %v4856_v0  ;;  %v1007_v12 = vld [vmem:[#allocation2 + $0x1c8] sm:$0xff]  ;;  %v3807_v15 = vpack.c.bf16 %v475_v11, %v471_v10  ;;  %v1006_v16 = vld [vmem:[#allocation2 + $0x1c0] sm:$0xff]  ;;  %v993_v19 = vld [vmem:[#allocation2 + $0x158] sm:$0xff] }
  0xe5   : > { %623 = vmatprep.mubr.f32.mxu1 %v4856_v0  ;;  %3790 = vmatprep.subr.bf16.mxu1 %v3789_v40  ;;  %v1278_v13 = vld [vmem:[#allocation2 + $0x1e8] sm:$0xff]  ;;  %v997_v20 = vld [vmem:[#allocation2 + $0x178] sm:$0xff]  ;;  %v5213_v21 = vld [vmem:[%s5141_s16 + $0x40] sm:$0xff] }
  0xe6   : > { %3800 = vmatpush1.bf16.msra.mxu0 %v3799_v41  ;;  %3792 = vmatpush1.bf16.msra.mxu1 %v3791_v42  ;;  %v1282_v14 = vld [vmem:[#allocation2 + $0x208] sm:$0xff]  ;;  %v479_v22 = vld [vmem:[#allocation2 + $0x90] sm:$0xff]  ;;  %v3817_v25 = vpack.c.bf16 %v997_v20, %v993_v19  ;;  %v1277_v26 = vld [vmem:[#allocation2 + $0x1e0] sm:$0xff] }
  0xe7   : > { %3585 = vmatmul.mubr.msk.f32.gmra.mrb[4].mxu0 %vm504_vm0, %v5167_v43  ;;  %3588 = vmatmul.mubr.msk.f32.gmra.mrb[4].mxu1 %vm504_vm0, %v5170_v44  ;;  %v3825_v17 = vpack.c.bf16 %v1282_v14, %v1278_v13  ;;  %v1281_v27 = vld [vmem:[#allocation2 + $0x200] sm:$0xff]  ;;  %v1286_v28 = vld [vmem:[#allocation2 + $0x228] sm:$0xff]  ;;  %v992_v34 = vld [vmem:[#allocation2 + $0x150] sm:$0xff] }
  0xe8   : > { %769 = vmatprep.subr.mxu0 %v478_v45  ;;  %629 = vmatprep.mubr.f32.mxu1 %v4856_v0  ;;  %v1290_v29 = vld [vmem:[#allocation2 + $0x248] sm:$0xff]  ;;  %v3827_v30 = vpack.c.bf16 %v1281_v27, %v1277_v26  ;;  %v1285_v32 = vld [vmem:[#allocation2 + $0x220] sm:$0xff]  ;;  %v996_v35 = vld [vmem:[#allocation2 + $0x170] sm:$0xff] }
  0xe9   : > { %825 = vmatprep.mubr.f32.mxu0 %v4856_v0  ;;  %650 = vmatprep.subr.mxu1 %v503_v47  ;;  %v3829_v31 = vpack.c.bf16 %v1290_v29, %v1286_v28  ;;  %v1289_v33 = vld [vmem:[#allocation2 + $0x240] sm:$0xff]  ;;  %v1001_v39 = vld [vmem:[#allocation2 + $0x198] sm:$0xff]  ;;  %v1294_v41 = vld [vmem:[#allocation2 + $0x268] sm:$0xff]  ;;  %v3819_v42 = vpack.c.bf16 %v996_v35, %v992_v34 }
  0xea   : > { %770 = vmatpush1.msra.mxu0 %v477_v46  ;;  %651 = vmatpush1.msra.mxu1 %v502_v52  ;;  %v3831_v36 = vpack.c.bf16 %v1289_v33, %v1285_v32  ;;  %v1005_v40 = vld [vmem:[#allocation2 + $0x1b8] sm:$0xff]  ;;  %v1000_v46 = vld [vmem:[#allocation2 + $0x190] sm:$0xff]  ;;  %v1565_v48 = vld [vmem:[#allocation2 + $0x288] sm:$0xff] }
  0xeb   : > { %3589 = vmatmul.mubr.msk.f32.gmra.mrb[6].mxu1 %vm504_vm0, %v5179_v55  ;;  %3599 = vmatmul.mubr.msk.f32.vlgmr.msra.gmra.mrb[0].mxu0 %vm504_vm0, %v5182_v56  ;;  %v3821_v45 = vpack.c.bf16 %v1005_v40, %v1001_v39  ;;  %v1004_v47 = vld [vmem:[#allocation2 + $0x1b0] sm:$0xff]  ;;  %v1569_v49 = vld [vmem:[#allocation2 + $0x2a8] sm:$0xff]  ;;  %v1293_v50 = vld [vmem:[#allocation2 + $0x260] sm:$0xff] }
  0xec   : > { %635 = vmatprep.mubr.f32.mxu1 %v4856_v0  ;;  %831 = vmatprep.mubr.f32.mxu0 %v4856_v0  ;;  %v5257_v51 = vld [vmem:[%s5141_s16 + $0x11] sm:$0xff]  ;;  %v3823_v52 = vpack.c.bf16 %v1004_v47, %v1000_v46  ;;  %v3841_v53 = vpack.c.bf16 %v1569_v49, %v1565_v48  ;;  %v1564_v60 = vld [vmem:[#allocation2 + $0x280] sm:$0xff]  ;;  %v1573_v62 = vld [vmem:[#allocation2 + $0x2c8] sm:$0xff] }
  0xed   : > { %3802 = vmatprep.subr.bf16.mxu1 %v3801_v57  ;;  %3810 = vmatprep.subr.bf16.mxu0 %v3809_v58  ;;  %v1009_v54 = vld [vmem:[#allocation2 + $0x1d8] sm:$0xff]  ;;  %v1008_v58 = vld [vmem:[#allocation2 + $0x1d0] sm:$0xff]  ;;  %v1568_v61 = vld [vmem:[#allocation2 + $0x2a0] sm:$0xff] }
  0xee   : > { %3812 = vmatpush1.bf16.msra.mxu0 %v3811_v59  ;;  %v1284_v57 = vld [vmem:[#allocation2 + $0x218] sm:$0xff]  ;;  %v1577_v63 = vld [vmem:[#allocation2 + $0x2e8] sm:$0xff]  ;;  %v3843_v2 = vpack.c.bf16 %v1568_v61, %v1564_v60  ;;  %v1576_v5 = vld [vmem:[#allocation2 + $0x2e0] sm:$0xff] }
  0xef   : > { %3590 = vmatmul.mubr.msk.f32.gmra.mrb[8].mxu1 %vm504_vm0, %v5192_v1  ;;  %3600 = vmatmul.mubr.msk.f32.gmra.mrb[2].mxu0 %vm504_vm0, %v5144_v23  ;;  %v3845_v3 = vpack.c.bf16 %v1577_v63, %v1573_v62  ;;  %v1283_v6 = vld [vmem:[#allocation2 + $0x210] sm:$0xff]  ;;  %v1581_v10 = vld [vmem:[#allocation2 + $0x308] sm:$0xff]  ;;  %v1571_v19 = vld [vmem:[#allocation2 + $0x2b8] sm:$0xff] }
  0xf0   : > { %706 = vmatprep.mubr.f32.mxu1 %v4856_v0  ;;  %837 = vmatprep.mubr.f32.mxu0 %v4856_v0  ;;  %v1287_v13 = vld [vmem:[#allocation2 + $0x230] sm:$0xff]  ;;  %v5339_v26 = vld [vmem:[%s5141_s16 + $0x61] sm:$0xff] }
  0xf1   : > { %3814 = vmatprep.subr.bf16.mxu0 %v3813_v4  ;;  %v1572_v4 = vld [vmem:[#allocation2 + $0x2c0] sm:$0xff]  ;;  %v1291_v14 = vld [vmem:[#allocation2 + $0x250] sm:$0xff] }
  0xf2   : > { %3816 = vmatpush1.bf16.msra.mxu0 %v3815_v7  ;;  %v3847_v7 = vpack.c.bf16 %v1576_v5, %v1572_v4  ;;  %v1295_v20 = vld [vmem:[#allocation2 + $0x270] sm:$0xff]  ;;  %v1900_v28 = vld [vmem:[#allocation6] sm:$0xff]  ;;  %v1976_v4 = vld [vmem:[#allocation6 + $0x238] sm:$0xff] }
  0xf3   : > { %3591 = vmatmul.mubr.msk.f32.vlgmr.msra.gmra.mrb[10].mxu1 %vm504_vm0, %v5144_v23  ;;  %3601 = vmatmul.mubr.msk.f32.gmra.mrb[4].mxu0 %vm504_vm0, %v5154_v37  ;;  %v1902_v29 = vld [vmem:[#allocation6 + $0x10] sm:$0xff]  ;;  %v1904_v33 = vld [vmem:[#allocation6 + $0x20] sm:$0xff]  ;;  %v1909_v35 = vld [vmem:[#allocation6 + $0x48] sm:$0xff] }
  0xf4   : > { %3804 = vmatpush1.bf16.msra.mxu1 %v3803_v8  ;;  %712 = vmatprep.mubr.f32.mxu1 %v4856_v0  ;;  %v1288_v8 = vld [vmem:[#allocation2 + $0x238] sm:$0xff]  ;;  %v1566_v39 = vld [vmem:[#allocation2 + $0x290] sm:$0xff]  ;;  %v1908_v47 = vld [vmem:[#allocation6 + $0x40] sm:$0xff] }
  0xf5   : > { %843 = vmatprep.mubr.f32.mxu0 %v4856_v0  ;;  %3806 = vmatprep.subr.bf16.mxu1 %v3805_v9  ;;  %v1292_v9 = vld [vmem:[#allocation2 + $0x258] sm:$0xff]  ;;  %v1570_v40 = vld [vmem:[#allocation2 + $0x2b0] sm:$0xff]  ;;  %v1912_v5 = vld [vmem:[#allocation6 + $0x60] sm:$0xff] }
  0xf6   : > { %1024 = vmatprep.subr.mxu0 %v1007_v12  ;;  %v3837_v12 = vpack.c.bf16 %v1292_v9, %v1288_v8  ;;  %v1906_v34 = vld [vmem:[#allocation6 + $0x30] sm:$0xff]  ;;  %v3851_v49 = vpack.c.bf16 %v1570_v40, %v1566_v39  ;;  %v1913_v63 = vld [vmem:[#allocation6 + $0x68] sm:$0xff]  ;;  %v1988_v40 = vld [vmem:[#allocation6 + $0x298] sm:$0xff] }
  0xf7   : > { %3592 = vmatmul.mubr.msk.f32.gmra.mrb[12].mxu1 %vm504_vm0, %v5154_v37  ;;  %3602 = vmatmul.mubr.msk.f32.gmra.mrb[6].mxu0 %vm504_vm0, %v5167_v43  ;;  %v1910_v48 = vld [vmem:[#allocation6 + $0x50] sm:$0xff]  ;;  %v1986_v39 = vld [vmem:[#allocation6 + $0x288] sm:$0xff] }
  0xf8   : > { %718 = vmatprep.mubr.f32.mxu1 %v4856_v0  ;;  %849 = vmatprep.mubr.f32.mxu0 %v4856_v0  ;;  %v1582_v60 = vld [vmem:[#allocation2 + $0x310] sm:$0xff] }
  0xf9   : > { %3808 = vmatpush1.bf16.msra.mxu1 %v3807_v15  ;;  %1025 = vmatpush1.msra.mxu0 %v1006_v16  ;;  %v1580_v15 = vld [vmem:[#allocation2 + $0x300] sm:$0xff]  ;;  %v3652_v62 = vld [vmem:[%s5141_s16 + $0x71] sm:$0xff] }
  0xfa   : > { %882 = vmatprep.subr.mxu1 %v480_v18  ;;  %3826 = vmatprep.subr.bf16.mxu0 %v3825_v17  ;;  %v5311_v16 = vld [vmem:[%s5141_s16 + $0x21] sm:$0xff]  ;;  %v3839_v17 = vpack.c.bf16 %v1291_v14, %v1287_v13  ;;  %v1567_v18 = vld [vmem:[#allocation2 + $0x298] sm:$0xff]  ;;  %v1978_v13 = vld [vmem:[#allocation6 + $0x248] sm:$0xff] }
  0xfb   : > { %3593 = vmatmul.mubr.msk.f32.gmra.mrb[14].mxu1 %vm504_vm0, %v5167_v43  ;;  %3603 = vmatmul.mubr.msk.f32.gmra.mrb[8].mxu0 %vm504_vm0, %v5213_v21  ;;  %v1980_v14 = vld [vmem:[#allocation6 + $0x258] sm:$0xff] }
  0xfc   : > { %724 = vmatprep.mubr.f32.mxu1 %v4856_v0  ;;  %855 = vmatprep.mubr.f32.mxu0 %v4856_v0 }
  0xfd   : > { %883 = vmatpush1.msra.mxu1 %v479_v22  ;;  %v1901_v22 = vld [vmem:[#allocation6 + $0x8] sm:$0xff] }
  0xfe   : > { %3818 = vmatprep.subr.bf16.mxu1 %v3817_v25  ;;  %v1903_v25 = vld [vmem:[#allocation6 + $0x18] sm:$0xff] }
  0xff   : > { %3594 = vmatmul.mubr.msk.f32.gmra.mrb[16].mxu1 %vm504_vm0, %v5147_v24  ;;  %3604 = vmatmul.mubr.msk.f32.gmra.mrb[10].mxu0 %vm504_vm0, %v5157_v38  ;;  %v3921_v27 = vpack.c.bf16 %v1903_v25, %v1901_v22  ;;  %v1923_v22 = vld [vmem:[#allocation6 + $0xb8] sm:$0xff] }
 0x100   : > { %730 = vmatprep.mubr.f32.mxu1 %v4856_v0  ;;  %861 = vmatprep.mubr.f32.mxu0 %v4856_v0 }
 0x103   : > { %3595 = vmatmul.mubr.msk.f32.gmra.mrb[18].mxu1 %vm504_vm0, %v5157_v38  ;;  %3605 = vmatmul.mubr.msk.f32.gmra.mrb[12].mxu0 %vm504_vm0, %v5170_v44 }
 0x104   : > { %736 = vmatprep.mubr.f32.mxu1 %v4856_v0  ;;  %867 = vmatprep.mubr.f32.mxu0 %v4856_v0 }
 0x107   : > { %3596 = vmatmul.mubr.msk.f32.gmra.mrb[20].mxu1 %vm504_vm0, %v5170_v44  ;;  %3606 = vmatmul.mubr.msk.f32.gmra.mrb[14].mxu0 %vm504_vm0, %v5179_v55 }
 0x108   : > { %742 = vmatprep.mubr.f32.mxu1 %v4856_v0  ;;  %1080 = vmatprep.mubr.f32.mxu0 %v4856_v0 }
 0x10b   : > { %3597 = vmatmul.mubr.msk.f32.gmra.mrb[22].mxu1 %vm504_vm0, %v5179_v55  ;;  %3617 = vmatmul.mubr.msk.f32.vlgmr.msra.gmra.mrb[0].mxu0 %vm504_vm0, %v5154_v37 }
 0x10c   : > { %748 = vmatprep.mubr.f32.mxu1 %v4856_v0  ;;  %1086 = vmatprep.mubr.f32.mxu0 %v4856_v0 }
 0x10d   : > { %3828 = vmatpush1.bf16.msra.mxu0 %v3827_v30  ;;  %v1907_v30 = vld [vmem:[#allocation6 + $0x38] sm:$0xff] }
 0x10e   : > { %3830 = vmatprep.subr.bf16.mxu0 %v3829_v31  ;;  %v3923_v31 = vpack.c.bf16 %v1902_v29, %v1900_v28  ;;  %v1920_v28 = vld [vmem:[#allocation6 + $0xa0] sm:$0xff] }
 0x10f   : > { %3598 = vmatmul.mubr.msk.f32.gmra.mrb[24].mxu1 %vm504_vm0, %v5192_v1  ;;  %3618 = vmatmul.mubr.msk.f32.gmra.mrb[2].mxu0 %vm504_vm0, %v5167_v43 }
 0x110   : > { %938 = vmatprep.mubr.f32.mxu1 %v4856_v0  ;;  %1092 = vmatprep.mubr.f32.mxu0 %v4856_v0 }
 0x111   : > { %3832 = vmatpush1.bf16.msra.mxu0 %v3831_v36  ;;  %v1911_v36 = vld [vmem:[#allocation6 + $0x58] sm:$0xff] }
 0x112   : > { %1311 = vmatprep.subr.mxu0 %v1294_v41  ;;  %v3927_v41 = vpack.c.bf16 %v1906_v34, %v1904_v33  ;;  %v3929_v46 = vpack.c.bf16 %v1911_v36, %v1909_v35  ;;  %v1925_v34 = vld [vmem:[#allocation6 + $0xc8] sm:$0xff]  ;;  %v1927_v35 = vld [vmem:[#allocation6 + $0xd8] sm:$0xff] }
 0x113   : > { %3607 = vmatmul.mubr.msk.f32.vlgmr.msra.gmra.mrb[10].mxu1 %vm504_vm0, %v5182_v56  ;;  %3619 = vmatmul.mubr.msk.f32.gmra.mrb[4].mxu0 %vm504_vm0, %v5147_v24  ;;  %v1280_v56 = vld [vmem:[#allocation2 + $0x1f8] sm:$0xff]  ;;  %v3945_v36 = vpack.c.bf16 %v1927_v35, %v1925_v34 }
 0x114   : > { %3820 = vmatpush1.bf16.msra.mxu1 %v3819_v42  ;;  %944 = vmatprep.mubr.f32.mxu1 %v4856_v0  ;;  %v3833_v59 = vpack.c.bf16 %v1284_v57, %v1280_v56  ;;  %v1575_v42 = vld [vmem:[#allocation2 + $0x2d8] sm:$0xff] }
 0x115   : > { %1098 = vmatprep.mubr.f32.mxu0 %v4856_v0  ;;  %3822 = vmatprep.subr.bf16.mxu1 %v3821_v45  ;;  %v1579_v45 = vld [vmem:[#allocation2 + $0x2f8] sm:$0xff] }
 0x116   : > { %1312 = vmatpush1.msra.mxu0 %v1293_v50  ;;  %v3853_v50 = vpack.c.bf16 %v1579_v45, %v1575_v42  ;;  %v3651_v56 = vld [vmem:[%s5141_s16 + $0x31] sm:$0xff]  ;;  %v3873_v42 = vpack.c.bf16 %v1988_v40, %v1986_v39  ;;  %v1947_v40 = vld [vmem:[#allocation6 + $0x178] sm:$0xff] }
 0x117   : > { %3608 = vmatmul.mubr.msk.f32.gmra.mrb[12].mxu1 %vm504_vm0, %v5144_v23  ;;  %3620 = vmatmul.mubr.msk.f32.gmra.mrb[6].mxu0 %vm504_vm0, %v5257_v51  ;;  %v5285_v23 = vld [vmem:[%s5141_s16 + $0x51] sm:$0xff] }
 0x118   : > { %950 = vmatprep.mubr.f32.mxu1 %v4856_v0  ;;  %1104 = vmatprep.mubr.f32.mxu0 %v4856_v0  ;;  %v1926_v45 = vld [vmem:[#allocation6 + $0xd0] sm:$0xff]  ;;  %v1945_v39 = vld [vmem:[#allocation6 + $0x168] sm:$0xff] }
 0x119   : > { %3824 = vmatpush1.bf16.msra.mxu1 %v3823_v52  ;;  %3842 = vmatprep.subr.bf16.mxu0 %v3841_v53  ;;  %v1574_v52 = vld [vmem:[#allocation2 + $0x2d0] sm:$0xff] }
 0x11a   : > { %1137 = vmatprep.subr.mxu1 %v1009_v54  ;;  %v1578_v53 = vld [vmem:[#allocation2 + $0x2f0] sm:$0xff]  ;;  %v3931_v54 = vpack.c.bf16 %v1910_v48, %v1908_v47 }
 0x11b   : > { %3609 = vmatmul.mubr.msk.f32.gmra.mrb[14].mxu1 %vm504_vm0, %v5154_v37  ;;  %3621 = vmatmul.mubr.msk.f32.gmra.mrb[8].mxu0 %vm504_vm0, %v5170_v44  ;;  %v3855_v57 = vpack.c.bf16 %v1578_v53, %v1574_v52  ;;  %v1987_v47 = vld [vmem:[#allocation6 + $0x290] sm:$0xff]  ;;  %v1931_v52 = vld [vmem:[#allocation6 + $0xf8] sm:$0xff] }
 0x11c   : > { %956 = vmatprep.mubr.f32.mxu1 %v4856_v0  ;;  %1110 = vmatprep.mubr.f32.mxu0 %v4856_v0  ;;  %v2003_v34 = vld [vmem:[#allocation6 + $0x310] sm:$0xff] }
 0x11d   : > { %1138 = vmatpush1.msra.mxu1 %v1008_v58  ;;  %v1583_v58 = vld [vmem:[#allocation2 + $0x318] sm:$0xff] }
 0x11e   : > { %3834 = vmatprep.subr.bf16.mxu1 %v3833_v59  ;;  %v1970_v59 = vld [vmem:[#allocation6 + $0x208] sm:$0xff] }
 0x11f   : > { %3610 = vmatmul.mubr.msk.f32.gmra.mrb[16].mxu1 %vm504_vm0, %v5167_v43  ;;  %3622 = vmatmul.mubr.msk.f32.gmra.mrb[10].mxu0 %vm504_vm0, %v5179_v55 }
 0x120   : > { %962 = vmatprep.mubr.f32.mxu1 %v4856_v0  ;;  %1116 = vmatprep.mubr.f32.mxu0 %v4856_v0 }
 0x123   : > { %3611 = vmatmul.mubr.msk.f32.gmra.mrb[18].mxu1 %vm504_vm0, %v5213_v21  ;;  %3623 = vmatmul.mubr.msk.f32.gmra.mrb[12].mxu0 %vm504_vm0, %v5192_v1  ;;  %v3849_v21 = vpack.c.bf16 %v1571_v19, %v1567_v18  ;;  %v1979_v18 = vld [vmem:[#allocation6 + $0x250] sm:$0xff] }
 0x124   : > { %968 = vmatprep.mubr.f32.mxu1 %v4856_v0  ;;  %1122 = vmatprep.mubr.f32.mxu0 %v4856_v0 }
 0x127   : > { %3612 = vmatmul.mubr.msk.f32.gmra.mrb[20].mxu1 %vm504_vm0, %v5157_v38  ;;  %3624 = vmatmul.mubr.msk.f32.gmra.mrb[14].mxu0 %vm504_vm0, %v5285_v23  ;;  %v1279_v38 = vld [vmem:[#allocation2 + $0x1f0] sm:$0xff] }
 0x128   : > { %974 = vmatprep.mubr.f32.mxu1 %v4856_v0  ;;  %1367 = vmatprep.mubr.f32.mxu0 %v4856_v0  ;;  %v3835_v11 = vpack.c.bf16 %v1283_v6, %v1279_v38  ;;  %v1914_v38 = vld [vmem:[#allocation6 + $0x70] sm:$0xff]  ;;  %v1973_v6 = vld [vmem:[#allocation6 + $0x220] sm:$0xff] }
 0x129   : > { %v3935_v8 = vpack.c.bf16 %v1914_v38, %v1912_v5  ;;  %v1993_v38 = vld [vmem:[#allocation6 + $0x2c0] sm:$0xff] }
 0x12b   : > { %3613 = vmatmul.mubr.msk.f32.gmra.mrb[22].mxu1 %vm504_vm0, %v5170_v44  ;;  %3635 = vmatmul.mubr.msk.f32.vlgmr.msra.gmra.mrb[0].mxu0 %vm504_vm0, %v5167_v43 }
 0x12c   : > { %980 = vmatprep.mubr.f32.mxu1 %v4856_v0  ;;  %1373 = vmatprep.mubr.f32.mxu0 %v4856_v0 }
 0x12d   : > { %3844 = vmatpush1.bf16.msra.mxu0 %v3843_v2  ;;  %v1915_v2 = vld [vmem:[#allocation6 + $0x78] sm:$0xff] }
 0x12e   : > { %3846 = vmatprep.subr.bf16.mxu0 %v3845_v3  ;;  %v1974_v3 = vld [vmem:[#allocation6 + $0x228] sm:$0xff] }
 0x12f   : > { %3614 = vmatmul.mubr.msk.f32.gmra.mrb[24].mxu1 %vm504_vm0, %v5179_v55  ;;  %3636 = vmatmul.mubr.msk.f32.gmra.mrb[2].mxu0 %vm504_vm0, %v5147_v24 }
 0x130   : > { %1193 = vmatprep.mubr.f32.mxu1 %v4856_v0  ;;  %1379 = vmatprep.mubr.f32.mxu0 %v4856_v0 }
 0x131   : > { %3848 = vmatpush1.bf16.msra.mxu0 %v3847_v7  ;;  %v1975_v7 = vld [vmem:[#allocation6 + $0x230] sm:$0xff] }
 0x132   : > { %1598 = vmatprep.subr.mxu0 %v1581_v10  ;;  %v3863_v9 = vpack.c.bf16 %v1975_v7, %v1973_v6  ;;  %v1917_v10 = vld [vmem:[#allocation6 + $0x88] sm:$0xff]  ;;  %v1995_v6 = vld [vmem:[#allocation6 + $0x2d0] sm:$0xff] }
 0x133   : > { %3625 = vmatmul.mubr.msk.f32.vlgmr.msra.gmra.mrb[10].mxu1 %vm504_vm0, %v5154_v37  ;;  %3637 = vmatmul.mubr.msk.f32.gmra.mrb[4].mxu0 %vm504_vm0, %v5257_v51  ;;  %v1296_v37 = vld [vmem:[#allocation2 + $0x278] sm:$0xff] }
 0x134   : > { %3836 = vmatpush1.bf16.msra.mxu1 %v3835_v11  ;;  %1199 = vmatprep.mubr.f32.mxu1 %v4856_v0  ;;  %v1919_v11 = vld [vmem:[#allocation6 + $0x98] sm:$0xff] }
 0x135   : > { %1385 = vmatprep.mubr.f32.mxu0 %v4856_v0  ;;  %3838 = vmatprep.subr.bf16.mxu1 %v3837_v12  ;;  %v3937_v12 = vpack.c.bf16 %v1919_v11, %v1917_v10  ;;  %v1939_v10 = vld [vmem:[#allocation6 + $0x138] sm:$0xff] }
 0x136   : > { %1599 = vmatpush1.msra.mxu0 %v1580_v15  ;;  %v1916_v15 = vld [vmem:[#allocation6 + $0x80] sm:$0xff] }
 0x137   : > { %3626 = vmatmul.mubr.msk.f32.gmra.mrb[12].mxu1 %vm504_vm0, %v5167_v43  ;;  %3638 = vmatmul.mubr.msk.f32.gmra.mrb[6].mxu0 %vm504_vm0, %v5311_v16 }
 0x138   : > { %1205 = vmatprep.mubr.f32.mxu1 %v4856_v0  ;;  %1391 = vmatprep.mubr.f32.mxu0 %v4856_v0 }
 0x139   : > { %3840 = vmatpush1.bf16.msra.mxu1 %v3839_v17  ;;  %3922 = vmatprep.subr.bf16.mxu0 %v3921_v27  ;;  %v1918_v17 = vld [vmem:[#allocation6 + $0x90] sm:$0xff]  ;;  %v1984_v27 = vld [vmem:[#allocation6 + $0x278] sm:$0xff] }
 0x13a   : > { %1424 = vmatprep.subr.mxu1 %v1296_v37  ;;  %v1977_v37 = vld [vmem:[#allocation6 + $0x240] sm:$0xff]  ;;  %v3939_v19 = vpack.c.bf16 %v1918_v17, %v1916_v15 }
 0x13b   : > { %3627 = vmatmul.mubr.msk.f32.gmra.mrb[14].mxu1 %vm504_vm0, %v5147_v24  ;;  %3639 = vmatmul.mubr.msk.f32.gmra.mrb[8].mxu0 %vm504_vm0, %v5179_v55  ;;  %v1936_v15 = vld [vmem:[#allocation6 + $0x120] sm:$0xff] }
 0x13c   : > { %1211 = vmatprep.mubr.f32.mxu1 %v4856_v0  ;;  %1397 = vmatprep.mubr.f32.mxu0 %v4856_v0 }
 0x13d   : > { %1425 = vmatpush1.msra.mxu1 %v1295_v20  ;;  %v3867_v20 = vpack.c.bf16 %v1979_v18, %v1977_v37  ;;  %v1938_v37 = vld [vmem:[#allocation6 + $0x130] sm:$0xff]  ;;  %v1997_v18 = vld [vmem:[#allocation6 + $0x2e0] sm:$0xff] }
 0x13e   : > { %3850 = vmatprep.subr.bf16.mxu1 %v3849_v21  ;;  %v1921_v21 = vld [vmem:[#allocation6 + $0xa8] sm:$0xff] }
 0x13f   : > { %3628 = vmatmul.mubr.msk.f32.gmra.mrb[16].mxu1 %vm504_vm0, %v5257_v51  ;;  %3640 = vmatmul.mubr.msk.f32.gmra.mrb[10].mxu0 %vm504_vm0, %v5192_v1  ;;  %v3941_v25 = vpack.c.bf16 %v1923_v22, %v1921_v21  ;;  %v1941_v22 = vld [vmem:[#allocation6 + $0x148] sm:$0xff] }
 0x140   : > { %1217 = vmatprep.mubr.f32.mxu1 %v4856_v0  ;;  %1403 = vmatprep.mubr.f32.mxu0 %v4856_v0 }
 0x143   : > { %3629 = vmatmul.mubr.msk.f32.gmra.mrb[18].mxu1 %vm504_vm0, %v5170_v44  ;;  %3641 = vmatmul.mubr.msk.f32.gmra.mrb[12].mxu0 %vm504_vm0, %v5285_v23  ;;  %v1905_v44 = vld [vmem:[#allocation6 + $0x28] sm:$0xff] }
 0x144   : > { %1223 = vmatprep.mubr.f32.mxu1 %v4856_v0  ;;  %1409 = vmatprep.mubr.f32.mxu0 %v4856_v0  ;;  %v3925_v32 = vpack.c.bf16 %v1907_v30, %v1905_v44  ;;  %v1922_v44 = vld [vmem:[#allocation6 + $0xb0] sm:$0xff]  ;;  %v1981_v30 = vld [vmem:[#allocation6 + $0x260] sm:$0xff] }
 0x147   : > { %3630 = vmatmul.mubr.msk.f32.gmra.mrb[20].mxu1 %vm504_vm0, %v5179_v55  ;;  %3642 = vmatmul.mubr.msk.f32.gmra.mrb[14].mxu0 %vm504_vm0, %v5339_v26 }
 0x148   : > { %1229 = vmatprep.mubr.f32.mxu1 %v4856_v0  ;;  %1654 = vmatprep.mubr.f32.mxu0 %v4856_v0 }
 0x14b   : > { %3631 = vmatmul.mubr.msk.f32.gmra.mrb[22].mxu1 %vm504_vm0, %v5192_v1  ;;  %3653 = vmatmul.mubr.msk.f32.vlgmr.msra.gmra.mrb[0].mxu0 %vm504_vm0, %v5147_v24 }
 0x14c   : > { %1235 = vmatprep.mubr.f32.mxu1 %v4856_v0  ;;  %1660 = vmatprep.mubr.f32.mxu0 %v4856_v0 }
 0x14d   : > { %3924 = vmatpush1.bf16.msra.mxu0 %v3923_v31  ;;  %v1983_v31 = vld [vmem:[#allocation6 + $0x270] sm:$0xff] }
 0x14e   : > { %3926 = vmatprep.subr.bf16.mxu0 %v3925_v32  ;;  %v3943_v32 = vpack.c.bf16 %v1922_v44, %v1920_v28  ;;  %v3871_v33 = vpack.c.bf16 %v1983_v31, %v1981_v30  ;;  %v2002_v28 = vld [vmem:[#allocation6 + $0x308] sm:$0xff]  ;;  %v1940_v44 = vld [vmem:[#allocation6 + $0x140] sm:$0xff] }
 0x14f   : > { %3632 = vmatmul.mubr.msk.f32.gmra.mrb[24].mxu1 %vm504_vm0, %v5285_v23  ;;  %3654 = vmatmul.mubr.msk.f32.gmra.mrb[2].mxu0 %vm504_vm0, %v5257_v51 }
 0x150   : > { %1480 = vmatprep.mubr.f32.mxu1 %v4856_v0  ;;  %1666 = vmatprep.mubr.f32.mxu0 %v4856_v0 }
 0x151   : > { %3928 = vmatpush1.bf16.msra.mxu0 %v3927_v41  ;;  %v1924_v41 = vld [vmem:[#allocation6 + $0xc0] sm:$0xff] }
 0x152   : > { %3930 = vmatprep.subr.bf16.mxu0 %v3929_v46  ;;  %v1985_v46 = vld [vmem:[#allocation6 + $0x280] sm:$0xff]  ;;  %v3947_v48 = vpack.c.bf16 %v1926_v45, %v1924_v41  ;;  %v2006_v41 = vld [vmem:[#allocation6 + $0x328] sm:$0xff]  ;;  %v2008_v45 = vld [vmem:[#allocation6 + $0x338] sm:$0xff] }
 0x153   : > { %3643 = vmatmul.mubr.msk.f32.vlgmr.msra.gmra.mrb[10].mxu1 %vm504_vm0, %v5167_v43  ;;  %3655 = vmatmul.mubr.msk.f32.gmra.mrb[4].mxu0 %vm504_vm0, %v5311_v16  ;;  %v1972_v43 = vld [vmem:[#allocation6 + $0x218] sm:$0xff] }
 0x154   : > { %3852 = vmatpush1.bf16.msra.mxu1 %v3851_v49  ;;  %1486 = vmatprep.mubr.f32.mxu1 %v4856_v0  ;;  %v3857_v61 = vpack.c.bf16 %v1972_v43, %v1970_v59  ;;  %v3875_v49 = vpack.c.bf16 %v1987_v47, %v1985_v46  ;;  %v1930_v59 = vld [vmem:[#allocation6 + $0xf0] sm:$0xff]  ;;  %v1989_v43 = vld [vmem:[#allocation6 + $0x2a0] sm:$0xff] }
 0x155   : > { %1672 = vmatprep.mubr.f32.mxu0 %v4856_v0  ;;  %3854 = vmatprep.subr.bf16.mxu1 %v3853_v50  ;;  %v1929_v50 = vld [vmem:[#allocation6 + $0xe8] sm:$0xff]  ;;  %v1944_v46 = vld [vmem:[#allocation6 + $0x160] sm:$0xff]  ;;  %v1946_v47 = vld [vmem:[#allocation6 + $0x170] sm:$0xff] }
 0x156   : > { %3932 = vmatpush1.bf16.msra.mxu0 %v3931_v54  ;;  %v3949_v53 = vpack.c.bf16 %v1931_v52, %v1929_v50  ;;  %v1990_v54 = vld [vmem:[#allocation6 + $0x2a8] sm:$0xff]  ;;  %v3967_v50 = vpack.c.bf16 %v1946_v47, %v1944_v46  ;;  %v2005_v52 = vld [vmem:[#allocation6 + $0x320] sm:$0xff] }
 0x157   : > { %3644 = vmatmul.mubr.msk.f32.gmra.mrb[12].mxu1 %vm504_vm0, %v5147_v24  ;;  %3656 = vmatmul.mubr.msk.f32.gmra.mrb[6].mxu0 %vm504_vm0, %v3651_v56 }
 0x158   : > { %1492 = vmatprep.mubr.f32.mxu1 %v4856_v0  ;;  %1678 = vmatprep.mubr.f32.mxu0 %v4856_v0 }
 0x159   : > { %3856 = vmatpush1.bf16.msra.mxu1 %v3855_v57  ;;  %v1928_v57 = vld [vmem:[#allocation6 + $0xe0] sm:$0xff] }
 0x15a   : > { %1711 = vmatprep.subr.mxu1 %v1583_v58 }
 0x15b   : > { %3645 = vmatmul.mubr.msk.f32.gmra.mrb[14].mxu1 %vm504_vm0, %v5257_v51  ;;  %3657 = vmatmul.mubr.msk.f32.gmra.mrb[8].mxu0 %vm504_vm0, %v5192_v1 }
 0x15c   : > { %1498 = vmatprep.mubr.f32.mxu1 %v4856_v0  ;;  %1684 = vmatprep.mubr.f32.mxu0 %v4856_v0 }
 0x15d   : > { %1712 = vmatpush1.msra.mxu1 %v1582_v60  ;;  %v1991_v60 = vld [vmem:[#allocation6 + $0x2b0] sm:$0xff] }
 0x15e   : > { %3858 = vmatprep.subr.bf16.mxu1 %v3857_v61  ;;  %v3951_v61 = vpack.c.bf16 %v1930_v59, %v1928_v57  ;;  %v2010_v59 = vld [vmem:[#allocation6 + $0x348] sm:$0xff] }
 0x15f   : > { %3646 = vmatmul.mubr.msk.f32.gmra.mrb[16].mxu1 %vm504_vm0, %v5311_v16  ;;  %3658 = vmatmul.mubr.msk.f32.gmra.mrb[10].mxu0 %vm504_vm0, %v5285_v23 }
 0x160   : > { %1504 = vmatprep.mubr.f32.mxu1 %v4856_v0  ;;  %1690 = vmatprep.mubr.f32.mxu0 %v4856_v0 }
 0x163   : > { %3647 = vmatmul.mubr.msk.f32.gmra.mrb[18].mxu1 %vm504_vm0, %v5179_v55  ;;  %3659 = vmatmul.mubr.msk.f32.gmra.mrb[12].mxu0 %vm504_vm0, %v5339_v26  ;;  %v1971_v55 = vld [vmem:[#allocation6 + $0x210] sm:$0xff] }
 0x164   : > { %1510 = vmatprep.mubr.f32.mxu1 %v4856_v0  ;;  %1696 = vmatprep.mubr.f32.mxu0 %v4856_v0 }
 0x167   : > { %3648 = vmatmul.mubr.msk.f32.gmra.mrb[20].mxu1 %vm504_vm0, %v5192_v1  ;;  %3660 = vmatmul.mubr.msk.f32.gmra.mrb[14].mxu0 %vm504_vm0, %v3652_v62 }
 0x168   : > { %1516 = vmatprep.mubr.f32.mxu1 %v4856_v0 }
 0x16b   : > { %3649 = vmatmul.mubr.msk.f32.gmra.mrb[22].mxu1 %vm504_vm0, %v5285_v23 }
 0x16c   : > { %1522 = vmatprep.mubr.f32.mxu1 %v4856_v0 }
 0x16f   : > { %3650 = vmatmul.mubr.msk.f32.gmra.mrb[24].mxu1 %vm504_vm0, %v5339_v26 }
 0x170   : > { %1767 = vmatprep.mubr.f32.mxu1 %v4856_v0 }
 0x173   : > { %3661 = vmatmul.mubr.msk.f32.vlgmr.msra.gmra.mrb[10].mxu1 %vm504_vm0, %v5147_v24  ;;  %v1969_v24 = vld [vmem:[#allocation6 + $0x200] sm:$0xff] }
 0x174   : > { %1773 = vmatprep.mubr.f32.mxu1 %v4856_v0 }
 0x177   : > { %3662 = vmatmul.mubr.msk.f32.gmra.mrb[12].mxu1 %vm504_vm0, %v5257_v51  ;;  %v3859_v51 = vpack.c.bf16 %v1971_v55, %v1969_v24  ;;  %v1933_v24 = vld [vmem:[#allocation6 + $0x108] sm:$0xff]  ;;  %v1935_v55 = vld [vmem:[#allocation6 + $0x118] sm:$0xff] }
 0x178   : > { %1779 = vmatprep.mubr.f32.mxu1 %v4856_v0 }
 0x179   : > { %3860 = vmatpush1.bf16.msra.mxu1 %v3859_v51 }
 0x17b   : > { %3663 = vmatmul.mubr.msk.f32.gmra.mrb[14].mxu1 %vm504_vm0, %v5311_v16  ;;  %v3865_v16 = vpack.c.bf16 %v1980_v14, %v1978_v13  ;;  %v1998_v13 = vld [vmem:[#allocation6 + $0x2e8] sm:$0xff]  ;;  %v2000_v14 = vld [vmem:[#allocation6 + $0x2f8] sm:$0xff] }
 0x17c   : > { %1785 = vmatprep.mubr.f32.mxu1 %v4856_v0  ;;  %v3885_v17 = vpack.c.bf16 %v2000_v14, %v1998_v13  ;;  %v2013_v13 = vld [vmem:[#allocation6 + $0x360] sm:$0xff]  ;;  %v2015_v14 = vld [vmem:[#allocation6 + $0x370] sm:$0xff] }
 0x17f   : > { %3664 = vmatmul.mubr.msk.f32.gmra.mrb[16].mxu1 %vm504_vm0, %v3651_v56  ;;  %v1992_v56 = vld [vmem:[#allocation6 + $0x2b8] sm:$0xff] }
 0x180   : > { %1791 = vmatprep.mubr.f32.mxu1 %v4856_v0  ;;  %v3877_v58 = vpack.c.bf16 %v1992_v56, %v1990_v54  ;;  %v1949_v54 = vld [vmem:[#allocation6 + $0x188] sm:$0xff] }
 0x183   : > { %3665 = vmatmul.mubr.msk.f32.gmra.mrb[18].mxu1 %vm504_vm0, %v5192_v1  ;;  %v3933_v1 = vpack.c.bf16 %v1915_v2, %v1913_v63  ;;  %v3953_v63 = vpack.c.bf16 %v1935_v55, %v1933_v24  ;;  %v1994_v2 = vld [vmem:[#allocation6 + $0x2c8] sm:$0xff]  ;;  %v1950_v24 = vld [vmem:[#allocation6 + $0x190] sm:$0xff] }
 0x184   : > { %1797 = vmatprep.mubr.f32.mxu1 %v4856_v0 }
 0x185   : > { %3934 = vmatprep.subr.bf16.mxu0 %v3933_v1  ;;  %v1996_v1 = vld [vmem:[#allocation6 + $0x2d8] sm:$0xff] }
 0x186   : > { %3936 = vmatpush1.bf16.msra.mxu0 %v3935_v8  ;;  %v3881_v5 = vpack.c.bf16 %v1996_v1, %v1994_v2  ;;  %v3883_v8 = vpack.c.bf16 %v1995_v6, %v1993_v38  ;;  %v2009_v1 = vld [vmem:[#allocation6 + $0x340] sm:$0xff]  ;;  %v1955_v38 = vld [vmem:[#allocation6 + $0x1b8] sm:$0xff] }
 0x187   : > { %3666 = vmatmul.mubr.msk.f32.gmra.mrb[20].mxu1 %vm504_vm0, %v5285_v23  ;;  %v3861_v23 = vpack.c.bf16 %v1976_v4, %v1974_v3  ;;  %3938 = vmatprep.subr.bf16.mxu0 %v3937_v12  ;;  %v1932_v3 = vld [vmem:[#allocation6 + $0x100] sm:$0xff] }
 0x188   : > { %1803 = vmatprep.mubr.f32.mxu1 %v4856_v0 }
 0x189   : > { %3862 = vmatprep.subr.bf16.mxu1 %v3861_v23  ;;  %v1934_v23 = vld [vmem:[#allocation6 + $0x110] sm:$0xff] }
 0x18a   : > { %3864 = vmatpush1.bf16.msra.mxu1 %v3863_v9  ;;  %3940 = vmatpush1.bf16.msra.mxu0 %v3939_v19  ;;  %v3955_v7 = vpack.c.bf16 %v1934_v23, %v1932_v3  ;;  %v1937_v9 = vld [vmem:[#allocation6 + $0x128] sm:$0xff]  ;;  %v1999_v19 = vld [vmem:[#allocation6 + $0x2f0] sm:$0xff] }
 0x18b   : > { %3667 = vmatmul.mubr.msk.f32.gmra.mrb[22].mxu1 %vm504_vm0, %v5339_v26  ;;  %3866 = vmatprep.subr.bf16.mxu1 %v3865_v16  ;;  %v1982_v26 = vld [vmem:[#allocation6 + $0x268] sm:$0xff]  ;;  %v3957_v12 = vpack.c.bf16 %v1939_v10, %v1937_v9  ;;  %v3887_v21 = vpack.c.bf16 %v1999_v19, %v1997_v18  ;;  %v2011_v3 = vld [vmem:[#allocation6 + $0x350] sm:$0xff]  ;;  %v1952_v9 = vld [vmem:[#allocation6 + $0x1a0] sm:$0xff] }
 0x18c   : > { %1809 = vmatprep.mubr.f32.mxu1 %v4856_v0  ;;  %v3869_v29 = vpack.c.bf16 %v1984_v27, %v1982_v26  ;;  %3942 = vmatprep.subr.bf16.mxu0 %v3941_v25  ;;  %v1943_v25 = vld [vmem:[#allocation6 + $0x158] sm:$0xff]  ;;  %v1953_v23 = vld [vmem:[#allocation6 + $0x1a8] sm:$0xff] }
 0x18d   : > { %v3961_v27 = vpack.c.bf16 %v1943_v25, %v1941_v22  ;;  %v3973_v6 = vpack.c.bf16 %v1955_v38, %v1953_v23  ;;  %v1959_v18 = vld [vmem:[#allocation6 + $0x1d8] sm:$0xff]  ;;  %v1956_v25 = vld [vmem:[#allocation6 + $0x1c0] sm:$0xff] }
 0x18e   : > { %3868 = vmatpush1.bf16.msra.mxu1 %v3867_v20  ;;  %3944 = vmatpush1.bf16.msra.mxu0 %v3943_v32  ;;  %v3959_v20 = vpack.c.bf16 %v1938_v37, %v1936_v15  ;;  %v1942_v32 = vld [vmem:[#allocation6 + $0x150] sm:$0xff]  ;;  %v1957_v37 = vld [vmem:[#allocation6 + $0x1c8] sm:$0xff] }
 0x18f   : > { %3668 = vmatmul.mubr.msk.f32.gmra.mrb[24].mxu1 %vm504_vm0, %v3652_v62  ;;  %3870 = vmatprep.subr.bf16.mxu1 %v3869_v29  ;;  %v3879_v62 = vpack.c.bf16 %v1991_v60, %v1989_v43  ;;  %v2004_v29 = vld [vmem:[#allocation6 + $0x318] sm:$0xff]  ;;  %v3963_v35 = vpack.c.bf16 %v1942_v32, %v1940_v44  ;;  %v3977_v19 = vpack.c.bf16 %v1959_v18, %v1957_v37  ;;  %v2019_v44 = vld [vmem:[#allocation6 + $0x390] sm:$0xff]  ;;  %v1961_v32 = vld [vmem:[#allocation6 + $0x1e8] sm:$0xff] }
 0x190   : > { %3946 = vmatprep.subr.bf16.mxu0 %v3945_v36  ;;  %v3889_v31 = vpack.c.bf16 %v2004_v29, %v2002_v28  ;;  %v2012_v43 = vld [vmem:[#allocation6 + $0x358] sm:$0xff]  ;;  %v2017_v28 = vld [vmem:[#allocation6 + $0x380] sm:$0xff] }
 0x192   : > { %3872 = vmatpush1.bf16.msra.mxu1 %v3871_v33  ;;  %3948 = vmatpush1.bf16.msra.mxu0 %v3947_v48  ;;  %v2001_v33 = vld [vmem:[#allocation6 + $0x300] sm:$0xff] }
 0x193   : > { %3874 = vmatprep.subr.bf16.mxu1 %v3873_v42  ;;  %3950 = vmatprep.subr.bf16.mxu0 %v3949_v53  ;;  %v3891_v36 = vpack.c.bf16 %v2003_v34, %v2001_v33  ;;  %v3965_v42 = vpack.c.bf16 %v1947_v40, %v1945_v39  ;;  %v2007_v53 = vld [vmem:[#allocation6 + $0x330] sm:$0xff]  ;;  %v1963_v33 = vld [vmem:[#allocation6 + $0x1f8] sm:$0xff]  ;;  %v1960_v39 = vld [vmem:[#allocation6 + $0x1e0] sm:$0xff] }
 0x194   : > { %v3895_v57 = vpack.c.bf16 %v2007_v53, %v2005_v52  ;;  %v3981_v34 = vpack.c.bf16 %v1963_v33, %v1961_v32  ;;  %v2026_v53 = vld [vmem:[#allocation6 + $0x3c8] sm:$0xff]  ;;  %v1848_v32 = vld [vmem:[#allocation4] sm:$0x3] }
 0x196   : > { %3876 = vmatpush1.bf16.msra.mxu1 %v3875_v49  ;;  %3952 = vmatpush1.bf16.msra.mxu0 %v3951_v61  ;;  %v3893_v49 = vpack.c.bf16 %v2008_v45, %v2006_v41  ;;  %v3897_v61 = vpack.c.bf16 %v2012_v43, %v2010_v59  ;;  %v1962_v41 = vld [vmem:[#allocation6 + $0x1f0] sm:$0xff] }
 0x197   : > { %3878 = vmatprep.subr.bf16.mxu1 %v3877_v58  ;;  %3954 = vmatprep.subr.bf16.mxu0 %v3953_v63  ;;  %v1951_v58 = vld [vmem:[#allocation6 + $0x198] sm:$0xff]  ;;  %v2023_v45 = vld [vmem:[#allocation6 + $0x3b0] sm:$0xff]  ;;  %v3983_v46 = vpack.c.bf16 %v1962_v41, %v1960_v39 }
 0x198   : > { %v3969_v60 = vpack.c.bf16 %v1951_v58, %v1949_v54  ;;  %v2028_v54 = vld [vmem:[#allocation6 + $0x3d8] sm:$0xff]  ;;  %v2025_v58 = vld [vmem:[#allocation6 + $0x3c0] sm:$0xff]  ;;  %v2027_v59 = vld [vmem:[#allocation6 + $0x3d0] sm:$0xff] }
 0x199   : > { %v3915_v43 = vpack.c.bf16 %v2027_v59, %v2025_v58 }
 0x19a   : > { %3880 = vmatpush1.bf16.msra.mxu1 %v3879_v62  ;;  %3956 = vmatpush1.bf16.msra.mxu0 %v3955_v7  ;;  %v1948_v62 = vld [vmem:[#allocation6 + $0x180] sm:$0xff]  ;;  %v2014_v7 = vld [vmem:[#allocation6 + $0x368] sm:$0xff] }
 0x19b   : > { %3882 = vmatprep.subr.bf16.mxu1 %v3881_v5  ;;  %3958 = vmatprep.subr.bf16.mxu0 %v3957_v12  ;;  %v3971_v63 = vpack.c.bf16 %v1950_v24, %v1948_v62  ;;  %v3899_v5 = vpack.c.bf16 %v2011_v3, %v2009_v1  ;;  %v1954_v12 = vld [vmem:[#allocation6 + $0x1b0] sm:$0xff]  ;;  %v2029_v24 = vld [vmem:[#allocation6 + $0x3e0] sm:$0xff] }
 0x19c   : > { %v3975_v15 = vpack.c.bf16 %v1954_v12, %v1952_v9 }
 0x19e   : > { %3884 = vmatpush1.bf16.msra.mxu1 %v3883_v8  ;;  %3960 = vmatpush1.bf16.msra.mxu0 %v3959_v20  ;;  %v2016_v8 = vld [vmem:[#allocation6 + $0x378] sm:$0xff]  ;;  %v2018_v20 = vld [vmem:[#allocation6 + $0x388] sm:$0xff] }
 0x19f   : > { %3886 = vmatprep.subr.bf16.mxu1 %v3885_v17  ;;  %3962 = vmatprep.subr.bf16.mxu0 %v3961_v27  ;;  %v3901_v10 = vpack.c.bf16 %v2016_v8, %v2014_v7  ;;  %v3903_v17 = vpack.c.bf16 %v2015_v14, %v2013_v13  ;;  %v1958_v27 = vld [vmem:[#allocation6 + $0x1d0] sm:$0xff] }
 0x1a0   : > { %v3979_v29 = vpack.c.bf16 %v1958_v27, %v1956_v25  ;;  %v1860_v27 = vlaneseq }
 0x1a2   : > { %3888 = vmatpush1.bf16.msra.mxu1 %v3887_v21  ;;  %3964 = vmatpush1.bf16.msra.mxu0 %v3963_v35  ;;  %v2020_v21 = vld [vmem:[#allocation6 + $0x398] sm:$0xff]  ;;  %v2022_v35 = vld [vmem:[#allocation6 + $0x3a8] sm:$0xff] }
 0x1a3   : > { %3890 = vmatprep.subr.bf16.mxu1 %v3889_v31  ;;  %3966 = vmatprep.subr.bf16.mxu0 %v3965_v42  ;;  %v3905_v22 = vpack.c.bf16 %v2020_v21, %v2018_v20  ;;  %v3907_v31 = vpack.c.bf16 %v2019_v44, %v2017_v28  ;;  %v2021_v42 = vld [vmem:[#allocation6 + $0x3a0] sm:$0xff]  ;;  %v5471_v28 = vshrl.u32 %v1860_v27, 7 }
 0x1a4   : > { %v3911_v47 = vpack.c.bf16 %v2023_v45, %v2021_v42 }
 0x1a6   : > { %3892 = vmatpush1.bf16.msra.mxu1 %v3891_v36  ;;  %3968 = vmatpush1.bf16.msra.mxu0 %v3967_v50  ;;  %v2024_v36 = vld [vmem:[#allocation6 + $0x3b8] sm:$0xff] }
 0x1a7   : > { %3894 = vmatprep.subr.bf16.mxu1 %v3893_v49  ;;  %3970 = vmatprep.subr.bf16.mxu0 %v3969_v60  ;;  %v3909_v40 = vpack.c.bf16 %v2024_v36, %v2022_v35  ;;  %v2217_v49 = vld [vmem:[#allocation6 + $0x408] sm:$0xff]  ;;  %v2219_v50 = vld [vmem:[#allocation6 + $0x418] sm:$0xff] }
 0x1a8   : > { %v3985_v52 = vpack.c.bf16 %v2219_v50, %v2217_v49  ;;  %v2030_v60 = vld [vmem:[#allocation6 + $0x3e8] sm:$0xff]  ;;  %v2218_v49 = vld [vmem:[#allocation6 + $0x410] sm:$0xff] }
 0x1aa   : > { %3896 = vmatpush1.bf16.msra.mxu1 %v3895_v57  ;;  %3972 = vmatpush1.bf16.msra.mxu0 %v3971_v63  ;;  %v3913_v57 = vpack.c.bf16 %v2028_v54, %v2026_v53  ;;  %v2031_v63 = vld [vmem:[#allocation6 + $0x3f0] sm:$0xff]  ;;  %v2221_v53 = vld [vmem:[#allocation6 + $0x428] sm:$0xff]  ;;  %v2223_v54 = vld [vmem:[#allocation6 + $0x438] sm:$0xff] }
 0x1ab   : > { %3898 = vmatprep.subr.bf16.mxu1 %v3897_v61  ;;  %3974 = vmatprep.subr.bf16.mxu0 %v3973_v6  ;;  %v2032_v61 = vld [vmem:[#allocation6 + $0x3f8] sm:$0xff]  ;;  %v3919_v1 = vpack.c.bf16 %v2031_v63, %v2029_v24  ;;  %v2220_v24 = vld [vmem:[#allocation6 + $0x420] sm:$0xff]  ;;  %v2222_v63 = vld [vmem:[#allocation6 + $0x430] sm:$0xff] }
 0x1ac   : > { %v3917_v62 = vpack.c.bf16 %v2032_v61, %v2030_v60 }
 0x1ae   : > { %3900 = vmatpush1.bf16.msra.mxu1 %v3899_v5  ;;  %3976 = vmatpush1.bf16.msra.mxu0 %v3975_v15 }
 0x1af   : > { %3902 = vmatprep.subr.bf16.mxu1 %v3901_v10  ;;  %3978 = vmatprep.subr.bf16.mxu0 %v3977_v19 }
 0x1b2   : > { %v5421_v51 = vpop.f32.mrb[0].mxu1  ;;  %3904 = vmatpush1.bf16.msra.mxu1 %v3903_v17  ;;  %3980 = vmatpush1.bf16.msra.mxu0 %v3979_v29 }
 0x1b3   : > { %v5423_v4 = vpop.f32.mrb[1].mxu1  ;;  %3906 = vmatprep.subr.bf16.mxu1 %v3905_v22  ;;  %3982 = vmatprep.subr.bf16.mxu0 %v3981_v34 }
 0x1b6   : > { %v5425_v11 = vpop.f32.mrb[2].mxu1  ;;  %3908 = vmatpush1.bf16.msra.mxu1 %v3907_v31  ;;  %3984 = vmatpush1.bf16.msra.mxu0 %v3983_v46 }
 0x1b7   : > { %v5427_v16 = vpop.f32.mrb[3].mxu1  ;;  %3910 = vmatprep.subr.bf16.mxu1 %v3909_v40  ;;  %3986 = vmatprep.subr.bf16.mxu0 %v3985_v52 }
 0x1ba   : > { %v5429_v26 = vpop.f32.mrb[4].mxu1  ;;  %3912 = vmatpush1.bf16.msra.mxu1 %v3911_v47  ;;  %v2216_v47 = vld [vmem:[#allocation6 + $0x400] sm:$0xff] }
 0x1bb   : > { %v5431_v30 = vpop.f32.mrb[5].mxu1  ;;  %3914 = vmatprep.subr.bf16.mxu1 %v3913_v57  ;;  %v3987_v59 = vpack.c.bf16 %v2218_v49, %v2216_v47 }
 0x1be   : > { %v5433_v48 = vpop.f32.mrb[6].mxu1  ;;  %3916 = vmatpush1.bf16.msra.mxu1 %v3915_v43 }
 0x1bf   : > { %v5435_v56 = vpop.f32.mrb[7].mxu1  ;;  %3918 = vmatprep.subr.bf16.mxu1 %v3917_v62  ;;  %v3989_v62 = vpack.c.bf16 %v2223_v54, %v2221_v53 }
 0x1c2   : > { %v5437_v55 = vpop.f32.mrb[8].mxu1  ;;  %3920 = vmatpush1.bf16.msra.mxu1 %v3919_v1 }
 0x1c3   : > { %v5439_v2 = vpop.f32.mrb[9].mxu1 }
 0x21e   : > { %v1656_v3 = vpop.f32.mrb[0].mxu0 }
 0x21f   : > { %v1658_v5 = vpop.f32.mrb[1].mxu0 }
 0x222   : > { %v1662_v23 = vpop.f32.mrb[2].mxu0 }
 0x223   : > { %v1664_v38 = vpop.f32.mrb[3].mxu0 }
 0x226   : > { %v5441_v6 = vpop.f32.mrb[4].mxu0 }
 0x227   : > { %v5443_v7 = vpop.f32.mrb[5].mxu0 }
 0x22a   : > { %v1674_v8 = vpop.f32.mrb[6].mxu0 }
 0x22b   : > { %v4327_v9 = vadd.f32 %v1674_v8, %v5421_v51  ;;  %v1676_v10 = vpop.f32.mrb[7].mxu0 }
 0x22c   : > { %v4328_v12 = vadd.f32 %v1676_v10, %v5423_v4 }
 0x22e   : > { %v1680_v13 = vpop.f32.mrb[8].mxu0 }
 0x22f   : > { %v5448_v14 = vadd.f32 %v1680_v13, %v5425_v11  ;;  %v1682_v15 = vpop.f32.mrb[9].mxu0 }
 0x230   : > { %v5451_v17 = vadd.f32 %v1682_v15, %v5427_v16  ;;  %v2224_v15 = vld [vmem:[#allocation6 + $0x440] sm:$0xff] }
 0x232   : > { %v1686_v37 = vpop.f32.mrb[10].mxu0 }
 0x233   : > { %v5454_v18 = vadd.f32 %v1686_v37, %v5429_v26  ;;  %v1688_v19 = vpop.f32.mrb[11].mxu0 }
 0x234   : > { %v5457_v20 = vadd.f32 %v1688_v19, %v5431_v30 }
 0x236   : > { %v1692_v51 = vpop.f32.mrb[12].mxu0 }
 0x237   : > { %v5460_v21 = vadd.f32 %v1692_v51, %v5433_v48  ;;  %v1694_v4 = vpop.f32.mrb[13].mxu0  ;;  %v1862_v48 = vsub.s32 0, %v5471_v28  ;;  %v2229_v51 = vld [vmem:[#allocation6 + $0x468] sm:$0xff] }
 0x238   : > { %v5463_v11 = vadd.f32 %v1694_v4, %v5435_v56  ;;  %v1866_v56 = vsub.s32 1, %v5471_v28  ;;  %v2231_v4 = vld [vmem:[#allocation6 + $0x478] sm:$0xff] }
 0x23a   : > { %v1698_v22 = vpop.f32.mrb[14].mxu0 }
 0x23b   : > { %v5466_v16 = vadd.f32 %v1698_v22, %v5437_v55  ;;  %v1700_v25 = vpop.f32.mrb[15].mxu0  ;;  %v5475_v55 = vrot.slane %v1848_v32, %v1862_v48  ;;  %v2228_v48 = vld [vmem:[#allocation6 + $0x460] sm:$0xff] }
 0x23c   : > { %v5469_v26 = vadd.f32 %v1700_v25, %v5439_v2  ;;  %v5477_v2 = vrot.slane %v1848_v32, %v1866_v56  ;;  %v2233_v56 = vld [vmem:[#allocation6 + $0x488] sm:$0xff] }
 0x246   : > { %v1769_v30 = vpop.f32.mrb[10].mxu1 }
 0x247   : > { %v1849_v29 = vmax.f32 %v1656_v3, %v1769_v30  ;;  %v1771_v44 = vpop.f32.mrb[11].mxu1  ;;  %v2225_v3 = vld [vmem:[#allocation6 + $0x448] sm:$0xff] }
 0x248   : > { %v1850_v31 = vmax.f32 %v1658_v5, %v1771_v44  ;;  %v2227_v5 = vld [vmem:[#allocation6 + $0x458] sm:$0xff]  ;;  %v3997_v44 = vpack.c.bf16 %v2231_v4, %v2229_v51  ;;  %v2249_v51 = vld [vmem:[#allocation6 + $0x508] sm:$0xff] }
 0x249   : > { %v3993_v13 = vpack.c.bf16 %v2227_v5, %v2225_v3 }
 0x24a   : > { %v1775_v33 = vpop.f32.mrb[12].mxu1 }
 0x24b   : > { %v1851_v34 = vmax.f32 %v1662_v23, %v1775_v33  ;;  %v1777_v35 = vpop.f32.mrb[13].mxu1  ;;  %v2235_v33 = vld [vmem:[#allocation6 + $0x498] sm:$0xff] }
 0x24c   : > { %v1852_v36 = vmax.f32 %v1664_v38, %v1777_v35 }
 0x24d   : > { %v1857_v39 = vmax.f32 %v1849_v29, %v1851_v34 }
 0x24e   : > { %v1858_v40 = vmax.f32 %v1850_v31, %v1852_v36  ;;  %v1781_v41 = vpop.f32.mrb[14].mxu1  ;;  %v2230_v31 = vld [vmem:[#allocation6 + $0x470] sm:$0xff] }
 0x24f   : > { %v1870_v42 = vadd.f32 %v5475_v55, %v1857_v39  ;;  %v1853_v45 = vmax.f32 %v5441_v6, %v1781_v41  ;;  %v1783_v46 = vpop.f32.mrb[15].mxu1  ;;  %v4001_v41 = vpack.c.bf16 %v2235_v33, %v2233_v56  ;;  %v2252_v56 = vld [vmem:[#allocation6 + $0x520] sm:$0xff]  ;;  %v2254_v33 = vld [vmem:[#allocation6 + $0x530] sm:$0xff] }
 0x250   : > { %v1854_v50 = vmax.f32 %v5443_v7, %v1783_v46  ;;  %v1871_v52 = vadd.f32 %v5477_v2, %v1858_v40  ;;  %v3991_v7 = vpack.c.bf16 %v2222_v63, %v2220_v24  ;;  %v2234_v46 = vld [vmem:[#allocation6 + $0x490] sm:$0xff]  ;;  %v2241_v63 = vld [vmem:[#allocation6 + $0x4c8] sm:$0xff] }
 0x251   : > { %v5485_v43 = vmax.f32 %v1870_v42, 0.0 }
 0x252   : > { %v1787_v57 = vpop.f32.mrb[16].mxu1  ;;  %v5483_v58 = vmax.f32 %v1871_v52, 0.0  ;;  %v2239_v52 = vld [vmem:[#allocation6 + $0x4b8] sm:$0xff] }
 0x253   : > { %v1855_v60 = vmax.f32 %v4327_v9, %v1787_v57  ;;  %v1789_v61 = vpop.f32.mrb[17].mxu1  ;;  %v1964_v40 = vrot.slane %v5485_v43, 1 }
 0x254   : > { %v1856_v1 = vmax.f32 %v4328_v12, %v1789_v61  ;;  %2186 = vmatprep.mubr.f32.mxu0 %v5483_v58  ;;  %v2226_v12 = vld [vmem:[#allocation6 + $0x450] sm:$0xff] }
 0x255   : > { %v1874_v23 = vmax.f32 %v1853_v45, %v1855_v60  ;;  %2187 = vmatmul.mubr.f32.vlgmr.msra.gmra.mrb[16].mxu0 %v5485_v43  ;;  %v3995_v27 = vpack.c.bf16 %v2226_v12, %v2224_v15  ;;  %v2232_v45 = vld [vmem:[#allocation6 + $0x480] sm:$0xff] }
 0x256   : > { %v1875_v38 = vmax.f32 %v1854_v50, %v1856_v1  ;;  %3988 = vmatpush1.bf16.msra.mxu0 %v3987_v59  ;;  %v1793_v6 = vpop.f32.mrb[18].mxu1  ;;  %v2237_v50 = vld [vmem:[#allocation6 + $0x4a8] sm:$0xff]  ;;  %v4003_v54 = vpack.c.bf16 %v2234_v46, %v2232_v45  ;;  %v2243_v1 = vld [vmem:[#allocation6 + $0x4d8] sm:$0xff]  ;;  %v2260_v46 = vld [vmem:[#allocation6 + $0x560] sm:$0xff] }
 0x257   : > { %v1876_v8 = vadd.f32 %v1874_v23, %v5475_v55  ;;  %v1880_v9 = vmax.f32 %v5448_v14, %v1793_v6  ;;  %v1795_v10 = vpop.f32.mrb[19].mxu1  ;;  %3990 = vmatprep.subr.bf16.mxu0 %v3989_v62  ;;  %v4005_v61 = vpack.c.bf16 %v2239_v52, %v2237_v50  ;;  %v2238_v62 = vld [vmem:[#allocation6 + $0x4b0] sm:$0xff]  ;;  %v2240_v6 = vld [vmem:[#allocation6 + $0x4c0] sm:$0xff]  ;;  %v2267_v50 = vld [vmem:[#allocation6 + $0x598] sm:$0xff] }
 0x258   : > { %v1877_v37 = vadd.f32 %v1875_v38, %v5477_v2  ;;  %v1881_v19 = vmax.f32 %v5451_v17, %v1795_v10  ;;  %v1965_v17 = vrot.slane %v5483_v58, 1  ;;  %v4009_v38 = vpack.c.bf16 %v2243_v1, %v2241_v63  ;;  %v2270_v63 = vld [vmem:[#allocation6 + $0x5b0] sm:$0xff]  ;;  %v2273_v1 = vld [vmem:[#allocation6 + $0x5c8] sm:$0xff] }
 0x259   : > { %v5495_v30 = vmax.f32 %v1876_v8, 0.0 }
 0x25a   : > { %v5493_v22 = vmax.f32 %v1877_v37, 0.0  ;;  %3992 = vmatpush1.bf16.msra.mxu0 %v3991_v7  ;;  %v1799_v25 = vpop.f32.mrb[20].mxu1  ;;  %v2242_v7 = vld [vmem:[#allocation6 + $0x4d0] sm:$0xff]  ;;  %v2244_v37 = vld [vmem:[#allocation6 + $0x4e0] sm:$0xff] }
 0x25b   : > { %v1882_v14 = vmax.f32 %v5454_v18, %v1799_v25  ;;  %v1801_v29 = vpop.f32.mrb[21].mxu1  ;;  %3994 = vmatprep.subr.bf16.mxu0 %v3993_v13  ;;  %v4011_v13 = vpack.c.bf16 %v2242_v7, %v2240_v6  ;;  %v2277_v6 = vld [vmem:[#allocation6 + $0x5e8] sm:$0xff]  ;;  %v2279_v7 = vld [vmem:[#allocation6 + $0x5f8] sm:$0xff] }
 0x25c   : > { %v1883_v32 = vmax.f32 %v5457_v20, %v1801_v29  ;;  %2097 = vmatprep.mubr.f32.mxu1 %v5493_v22  ;;  %2192 = vmatprep.mubr.f32.mxu0 %v5493_v22  ;;  %v3999_v20 = vpack.c.bf16 %v2230_v31, %v2228_v48  ;;  %v2250_v29 = vld [vmem:[#allocation6 + $0x510] sm:$0xff]  ;;  %v2255_v48 = vld [vmem:[#allocation6 + $0x538] sm:$0xff] }
 0x25d   : > { %v1888_v34 = vmax.f32 %v1880_v9, %v1882_v14  ;;  %2098 = vmatmul.mubr.f32.vlgmr.msra.gmra.mrb[26].mxu1 %v5495_v30  ;;  %2193 = vmatmul.mubr.f32.gmra.mrb[18].mxu0 %v5495_v30  ;;  %v2245_v9 = vld [vmem:[#allocation6 + $0x4e8] sm:$0xff]  ;;  %v2248_v14 = vld [vmem:[#allocation6 + $0x500] sm:$0xff] }
 0x25e   : > { %v1889_v18 = vmax.f32 %v1881_v19, %v1883_v32  ;;  %3996 = vmatpush1.bf16.msra.mxu0 %v3995_v27  ;;  %v1805_v35 = vpop.f32.mrb[22].mxu1  ;;  %2103 = vmatprep.mubr.f32.mxu1 %v1965_v17  ;;  %v2246_v19 = vld [vmem:[#allocation6 + $0x4f0] sm:$0xff]  ;;  %v4019_v31 = vpack.c.bf16 %v2250_v29, %v2248_v14  ;;  %v2389_v14 = vld [vmem:[#allocation6 + $0x638] sm:$0xff] }
 0x25f   : > { %v1884_v36 = vmax.f32 %v5460_v21, %v1805_v35  ;;  %v1807_v39 = vpop.f32.mrb[23].mxu1  ;;  %3998 = vmatprep.subr.bf16.mxu0 %v3997_v44  ;;  %v1890_v42 = vadd.f32 %v1888_v34, %v5475_v55  ;;  %v4015_v4 = vpack.c.bf16 %v2246_v19, %v2244_v37  ;;  %v2253_v44 = vld [vmem:[#allocation6 + $0x528] sm:$0xff]  ;;  %v2259_v34 = vld [vmem:[#allocation6 + $0x558] sm:$0xff] }
 0x260   : > { %v1885_v47 = vmax.f32 %v5463_v11, %v1807_v39  ;;  %v1891_v49 = vadd.f32 %v1889_v18, %v5477_v2  ;;  %v2236_v11 = vld [vmem:[#allocation6 + $0x4a0] sm:$0xff]  ;;  %v4021_v32 = vpack.c.bf16 %v2255_v48, %v2253_v44  ;;  %v4023_v18 = vpack.c.bf16 %v2254_v33, %v2252_v56  ;;  %v2261_v39 = vld [vmem:[#allocation6 + $0x568] sm:$0xff]  ;;  %v2385_v37 = vld [vmem:[#allocation6 + $0x618] sm:$0xff] }
 0x261   : > { %2104 = vmatmul.mubr.f32.gmra.mrb[28].mxu1 %v1964_v40  ;;  %v5516_v60 = vmax.f32 %v1890_v42, 0.0  ;;  %v4007_v23 = vpack.c.bf16 %v2238_v62, %v2236_v11  ;;  %v2386_v48 = vld [vmem:[#allocation6 + $0x620] sm:$0xff]  ;;  %v2391_v56 = vld [vmem:[#allocation6 + $0x648] sm:$0xff]  ;;  %v2393_v33 = vld [vmem:[#allocation6 + $0x658] sm:$0xff] }
 0x262   : > { %4000 = vmatpush1.bf16.msra.mxu0 %v3999_v20  ;;  %v1811_v21 = vpop.f32.mrb[24].mxu1  ;;  %v5513_v53 = vmax.f32 %v1891_v49, 0.0  ;;  %v2256_v20 = vld [vmem:[#allocation6 + $0x540] sm:$0xff]  ;;  %v2265_v49 = vld [vmem:[#allocation6 + $0x588] sm:$0xff] }
 0x263   : > { %v1886_v57 = vmax.f32 %v5466_v16, %v1811_v21  ;;  %v1813_v59 = vpop.f32.mrb[25].mxu1  ;;  %4002 = vmatprep.subr.bf16.mxu0 %v4001_v41  ;;  %v1966_v25 = vrot.slane %v5516_v60, 1  ;;  %v2263_v41 = vld [vmem:[#allocation6 + $0x578] sm:$0xff]  ;;  %v4033_v21 = vpack.c.bf16 %v2267_v50, %v2265_v49 }
 0x264   : > { %v1887_v24 = vmax.f32 %v5469_v26, %v1813_v59  ;;  %2198 = vmatprep.mubr.f32.mxu0 %v5513_v53  ;;  %v2247_v26 = vld [vmem:[#allocation6 + $0x4f8] sm:$0xff]  ;;  %v4029_v45 = vpack.c.bf16 %v2263_v41, %v2261_v39  ;;  %v2269_v59 = vld [vmem:[#allocation6 + $0x5a8] sm:$0xff] }
 0x265   : > { %v1894_v3 = vmax.f32 %v1884_v36, %v1886_v57  ;;  %2199 = vmatmul.mubr.f32.gmra.mrb[20].mxu0 %v5516_v60  ;;  %v4013_v12 = vpack.c.bf16 %v2247_v26, %v2245_v9  ;;  %v2258_v36 = vld [vmem:[#allocation6 + $0x550] sm:$0xff]  ;;  %v4045_v9 = vpack.c.bf16 %v2279_v7, %v2277_v6  ;;  %v2276_v26 = vld [vmem:[#allocation6 + $0x5e0] sm:$0xff]  ;;  %v2397_v39 = vld [vmem:[#allocation6 + $0x678] sm:$0xff] }
 0x266   : > { %v1895_v5 = vmax.f32 %v1885_v47, %v1887_v24  ;;  %4004 = vmatpush1.bf16.msra.mxu0 %v4003_v54  ;;  %v4027_v42 = vpack.c.bf16 %v2258_v36, %v2256_v20  ;;  %v2262_v47 = vld [vmem:[#allocation6 + $0x570] sm:$0xff]  ;;  %v2264_v54 = vld [vmem:[#allocation6 + $0x580] sm:$0xff]  ;;  %v2395_v36 = vld [vmem:[#allocation6 + $0x668] sm:$0xff] }
 0x267   : > { %v1896_v16 = vadd.f32 %v1894_v3, %v5475_v55  ;;  %4006 = vmatprep.subr.bf16.mxu0 %v4005_v61  ;;  %v1967_v55 = vrot.slane %v5513_v53, 1  ;;  %v4031_v52 = vpack.c.bf16 %v2262_v47, %v2260_v46  ;;  %v2266_v57 = vld [vmem:[#allocation6 + $0x590] sm:$0xff]  ;;  %v2271_v61 = vld [vmem:[#allocation6 + $0x5b8] sm:$0xff]  ;;  %v2268_v24 = vld [vmem:[#allocation6 + $0x5a0] sm:$0xff] }
 0x268   : > { %v1897_v8 = vadd.f32 %v1895_v5, %v5477_v2  ;;  %v2251_v2 = vld [vmem:[#allocation6 + $0x518] sm:$0xff]  ;;  %v4035_v11 = vpack.c.bf16 %v2266_v57, %v2264_v54  ;;  %v4037_v62 = vpack.c.bf16 %v2271_v61, %v2269_v59  ;;  %v4039_v5 = vpack.c.bf16 %v2270_v63, %v2268_v24  ;;  %v2392_v20 = vld [vmem:[#allocation6 + $0x650] sm:$0xff]  ;;  %v2399_v47 = vld [vmem:[#allocation6 + $0x688] sm:$0xff] }
 0x269   : > { %v5525_v15 = vmax.f32 %v1896_v16, 0.0  ;;  %v4017_v27 = vpack.c.bf16 %v2251_v2, %v2249_v51  ;;  %v2275_v3 = vld [vmem:[#allocation6 + $0x5d8] sm:$0xff]  ;;  %v2272_v16 = vld [vmem:[#allocation6 + $0x5c0] sm:$0xff]  ;;  %v2400_v54 = vld [vmem:[#allocation6 + $0x690] sm:$0xff] }
 0x26a   : > { %v5523_v10 = vmax.f32 %v1897_v8, 0.0  ;;  %4008 = vmatpush1.bf16.msra.mxu0 %v4007_v23  ;;  %v4041_v23 = vpack.c.bf16 %v2275_v3, %v2273_v1  ;;  %v2382_v2 = vld [vmem:[#allocation6 + $0x600] sm:$0xff]  ;;  %v2401_v49 = vld [vmem:[#allocation6 + $0x698] sm:$0xff]  ;;  %v2403_v57 = vld [vmem:[#allocation6 + $0x6a8] sm:$0xff] }
 0x26b   : > { %4010 = vmatprep.subr.bf16.mxu0 %v4009_v38  ;;  %v2274_v38 = vld [vmem:[#allocation6 + $0x5d0] sm:$0xff]  ;;  %v2405_v59 = vld [vmem:[#allocation6 + $0x6b8] sm:$0xff]  ;;  %v2407_v24 = vld [vmem:[#allocation6 + $0x6c8] sm:$0xff] }
 0x26c   : > { %2109 = vmatprep.mubr.f32.mxu1 %v5523_v10  ;;  %2204 = vmatprep.mubr.f32.mxu0 %v5523_v10  ;;  %v4043_v8 = vpack.c.bf16 %v2274_v38, %v2272_v16  ;;  %v2214_v46 = vrot.slane %v5523_v10, 1  ;;  %v2409_v63 = vld [vmem:[#allocation6 + $0x6d8] sm:$0xff]  ;;  %v2411_v16 = vld [vmem:[#allocation6 + $0x6e8] sm:$0xff] }
 0x26d   : > { %2110 = vmatmul.mubr.f32.gmra.mrb[30].mxu1 %v5525_v15  ;;  %2205 = vmatmul.mubr.f32.gmra.mrb[22].mxu0 %v5525_v15  ;;  %v4073_v3 = vpack.c.bf16 %v2409_v63, %v2407_v24  ;;  %v2413_v38 = vld [vmem:[#allocation6 + $0x6f8] sm:$0xff]  ;;  %v2440_v24 = vld [vmem:[#allocation6 + $0x7d0] sm:$0xff] }
 0x26e   : > { %4012 = vmatpush1.bf16.msra.mxu0 %v4011_v13  ;;  %2115 = vmatprep.mubr.f32.mxu1 %v1967_v55  ;;  %v2278_v13 = vld [vmem:[#allocation6 + $0x5f0] sm:$0xff]  ;;  %v4077_v7 = vpack.c.bf16 %v2413_v38, %v2411_v16 }
 0x26f   : > { %2344 = vmatprep.mubr.f32.mxu0 %v1965_v17  ;;  %4014 = vmatprep.subr.bf16.mxu0 %v4013_v12  ;;  %v2257_v17 = vld [vmem:[#allocation6 + $0x548] sm:$0xff]  ;;  %v4047_v19 = vpack.c.bf16 %v2278_v13, %v2276_v26  ;;  %v2417_v13 = vld [vmem:[#allocation6 + $0x718] sm:$0xff] }
 0x270   : > { %v4025_v35 = vpack.c.bf16 %v2259_v34, %v2257_v17  ;;  %v2383_v12 = vld [vmem:[#allocation6 + $0x608] sm:$0xff]  ;;  %v2211_v34 = vrot.slane %v5495_v30, 1  ;;  %v2732_v16 = vld [vmem:[#allocation9 + $0x30] sm:$0xff] }
 0x271   : > { %2116 = vmatmul.mubr.f32.gmra.mrb[32].mxu1 %v1966_v25  ;;  %v4049_v51 = vpack.c.bf16 %v2385_v37, %v2383_v12  ;;  %v2415_v26 = vld [vmem:[#allocation6 + $0x708] sm:$0xff] }
 0x272   : > { %4016 = vmatpush1.bf16.msra.mxu0 %v4015_v4  ;;  %2886 = vmatprep.mubr.f32.mxu1 %v4856_v0  ;;  %v2384_v4 = vld [vmem:[#allocation6 + $0x610] sm:$0xff]  ;;  %v4081_v37 = vpack.c.bf16 %v2417_v13, %v2415_v26  ;;  %v2738_v26 = vld [vmem:[#allocation9 + $0x60] sm:$0xff] }
 0x273   : > { %4018 = vmatprep.subr.bf16.mxu0 %v4017_v27  ;;  %v2387_v27 = vld [vmem:[#allocation6 + $0x628] sm:$0xff]  ;;  %v4051_v29 = vpack.c.bf16 %v2384_v4, %v2382_v2  ;;  %v2421_v4 = vld [vmem:[#allocation6 + $0x738] sm:$0xff] }
 0x274   : > { %v4053_v44 = vpack.c.bf16 %v2389_v14, %v2387_v27  ;;  %v2419_v2 = vld [vmem:[#allocation6 + $0x728] sm:$0xff]  ;;  %v2744_v13 = vld [vmem:[#allocation9 + $0x90] sm:$0xff] }
 0x275   : > { %v4085_v14 = vpack.c.bf16 %v2421_v4, %v2419_v2  ;;  %v2727_v63 = vld [vmem:[#allocation9 + $0x8] sm:$0xff]  ;;  %v4183_v2 = vpack.c.bf16 %v2744_v13, %v2738_v26 }
 0x276   : > { %4020 = vmatpush1.bf16.msra.mxu0 %v4019_v31  ;;  %v2388_v31 = vld [vmem:[#allocation6 + $0x630] sm:$0xff] }
 0x277   : > { %4022 = vmatprep.subr.bf16.mxu0 %v4021_v32  ;;  %v2212_v32 = vrot.slane %v5493_v22, 1  ;;  %v4055_v17 = vpack.c.bf16 %v2388_v31, %v2386_v48  ;;  %v2423_v48 = vld [vmem:[#allocation6 + $0x748] sm:$0xff]  ;;  %v2425_v31 = vld [vmem:[#allocation6 + $0x758] sm:$0xff] }
 0x278   : > { %v2739_v38 = vld [vmem:[#allocation9 + $0x68] sm:$0xff] }
 0x27a   : > { %4024 = vmatpush1.bf16.msra.mxu0 %v4023_v18  ;;  %v4057_v18 = vpack.c.bf16 %v2393_v33, %v2391_v56  ;;  %v4089_v56 = vpack.c.bf16 %v2425_v31, %v2423_v48  ;;  %v2422_v33 = vld [vmem:[#allocation6 + $0x740] sm:$0xff]  ;;  %v2444_v31 = vld [vmem:[#allocation6 + $0x7f0] sm:$0xff] }
 0x27b   : > { %4026 = vmatprep.subr.bf16.mxu0 %v4025_v35  ;;  %v2390_v35 = vld [vmem:[#allocation6 + $0x640] sm:$0xff] }
 0x27c   : > { %v4059_v41 = vpack.c.bf16 %v2392_v20, %v2390_v35  ;;  %v2429_v35 = vld [vmem:[#allocation6 + $0x778] sm:$0xff] }
 0x27e   : > { %4028 = vmatpush1.bf16.msra.mxu0 %v4027_v42  ;;  %v2394_v42 = vld [vmem:[#allocation6 + $0x660] sm:$0xff] }
 0x27f   : > { %4030 = vmatprep.subr.bf16.mxu0 %v4029_v45  ;;  %v2396_v45 = vld [vmem:[#allocation6 + $0x670] sm:$0xff] }
 0x280   : > { %v4063_v50 = vpack.c.bf16 %v2396_v45, %v2394_v42  ;;  %v2433_v42 = vld [vmem:[#allocation6 + $0x798] sm:$0xff] }
 0x282   : > { %4032 = vmatpush1.bf16.msra.mxu0 %v4031_v52  ;;  %v4065_v52 = vpack.c.bf16 %v2401_v49, %v2399_v47  ;;  %v2430_v49 = vld [vmem:[#allocation6 + $0x780] sm:$0xff] }
 0x283   : > { %4034 = vmatprep.subr.bf16.mxu0 %v4033_v21  ;;  %v2398_v21 = vld [vmem:[#allocation6 + $0x680] sm:$0xff] }
 0x284   : > { %v4067_v61 = vpack.c.bf16 %v2400_v54, %v2398_v21  ;;  %v2437_v21 = vld [vmem:[#allocation6 + $0x7b8] sm:$0xff] }
 0x286   : > { %4036 = vmatpush1.bf16.msra.mxu0 %v4035_v11  ;;  %v2402_v11 = vld [vmem:[#allocation6 + $0x6a0] sm:$0xff] }
 0x287   : > { %4038 = vmatprep.subr.bf16.mxu0 %v4037_v62  ;;  %v2404_v62 = vld [vmem:[#allocation6 + $0x6b0] sm:$0xff] }
 0x288   : > { %v4071_v1 = vpack.c.bf16 %v2404_v62, %v2402_v11  ;;  %v2441_v11 = vld [vmem:[#allocation6 + $0x7d8] sm:$0xff]  ;;  %v2438_v62 = vld [vmem:[#allocation6 + $0x7c0] sm:$0xff] }
 0x289   : > { %v4107_v4 = vpack.c.bf16 %v2440_v24, %v2438_v62  ;;  %v2559_v62 = vld [vmem:[#allocation6 + $0x858] sm:$0xff] }
 0x28a   : > { %4040 = vmatpush1.bf16.msra.mxu0 %v4039_v5  ;;  %v2406_v5 = vld [vmem:[#allocation6 + $0x6c0] sm:$0xff] }
 0x28b   : > { %4042 = vmatprep.subr.bf16.mxu0 %v4041_v23  ;;  %v2408_v23 = vld [vmem:[#allocation6 + $0x6d0] sm:$0xff] }
 0x28c   : > { %v4075_v6 = vpack.c.bf16 %v2408_v23, %v2406_v5 }
 0x28e   : > { %4044 = vmatpush1.bf16.msra.mxu0 %v4043_v8  ;;  %v2410_v8 = vld [vmem:[#allocation6 + $0x6e0] sm:$0xff] }
 0x28f   : > { %4046 = vmatprep.subr.bf16.mxu0 %v4045_v9  ;;  %v2412_v9 = vld [vmem:[#allocation6 + $0x6f0] sm:$0xff] }
 0x290   : > { %v4079_v12 = vpack.c.bf16 %v2412_v9, %v2410_v8 }
 0x292   : > { %4048 = vmatpush1.bf16.msra.mxu0 %v4047_v19  ;;  %v2414_v19 = vld [vmem:[#allocation6 + $0x700] sm:$0xff] }
 0x293   : > { %4050 = vmatprep.subr.bf16.mxu0 %v4049_v51  ;;  %v2416_v51 = vld [vmem:[#allocation6 + $0x710] sm:$0xff] }
 0x294   : > { %v4083_v27 = vpack.c.bf16 %v2416_v51, %v2414_v19  ;;  %v2445_v19 = vld [vmem:[#allocation6 + $0x7f8] sm:$0xff] }
 0x295   : > { %2345 = vmatmul.mubr.f32.vlgmr.msra.gmra.mrb[16].mxu0 %v1964_v40  ;;  %v4061_v40 = vpack.c.bf16 %v2397_v39, %v2395_v36  ;;  %v2426_v39 = vld [vmem:[#allocation6 + $0x760] sm:$0xff] }
 0x296   : > { %2350 = vmatprep.mubr.f32.mxu0 %v2212_v32  ;;  %4052 = vmatpush1.bf16.msra.mxu0 %v4051_v29  ;;  %v2418_v29 = vld [vmem:[#allocation6 + $0x720] sm:$0xff] }
 0x297   : > { %4054 = vmatprep.subr.bf16.mxu0 %v4053_v44  ;;  %v2420_v44 = vld [vmem:[#allocation6 + $0x730] sm:$0xff]  ;;  %v2757_v51 = vld [vmem:[#allocation9 + $0xf8] sm:$0xff] }
 0x299   : > { %2351 = vmatmul.mubr.f32.gmra.mrb[18].mxu0 %v2211_v34 }
 0x29a   : > { %2356 = vmatprep.mubr.f32.mxu0 %v1967_v55  ;;  %4056 = vmatpush1.bf16.msra.mxu0 %v4055_v17  ;;  %v2213_v55 = vrot.slane %v5525_v15, 1  ;;  %v2424_v17 = vld [vmem:[#allocation6 + $0x750] sm:$0xff] }
 0x29b   : > { %4058 = vmatprep.subr.bf16.mxu0 %v4057_v18  ;;  %v2427_v18 = vld [vmem:[#allocation6 + $0x768] sm:$0xff]  ;;  %v4091_v20 = vpack.c.bf16 %v2424_v17, %v2422_v33  ;;  %v2551_v17 = vld [vmem:[#allocation6 + $0x818] sm:$0xff] }
 0x29c   : > { %v4093_v36 = vpack.c.bf16 %v2429_v35, %v2427_v18  ;;  %v2549_v33 = vld [vmem:[#allocation6 + $0x808] sm:$0xff] }
 0x29d   : > { %2357 = vmatmul.mubr.f32.gmra.mrb[20].mxu0 %v1966_v25  ;;  %v4069_v25 = vpack.c.bf16 %v2405_v59, %v2403_v57  ;;  %v2434_v59 = vld [vmem:[#allocation6 + $0x7a0] sm:$0xff] }
 0x29e   : > { %2362 = vmatprep.mubr.f32.mxu0 %v2214_v46  ;;  %4060 = vmatpush1.bf16.msra.mxu0 %v4059_v41  ;;  %v2428_v41 = vld [vmem:[#allocation6 + $0x770] sm:$0xff] }
 0x29f   : > { %4062 = vmatprep.subr.bf16.mxu0 %v4061_v40  ;;  %v2431_v40 = vld [vmem:[#allocation6 + $0x788] sm:$0xff]  ;;  %v4095_v45 = vpack.c.bf16 %v2428_v41, %v2426_v39  ;;  %v2768_v39 = vld [vmem:[#allocation9 + $0x150] sm:$0xff]  ;;  %v4113_v41 = vpack.c.bf16 %v2551_v17, %v2549_v33 }
 0x2a0   : > { %v4097_v47 = vpack.c.bf16 %v2433_v42, %v2431_v40  ;;  %v2548_v40 = vld [vmem:[#allocation6 + $0x800] sm:$0xff]  ;;  %v2550_v42 = vld [vmem:[#allocation6 + $0x810] sm:$0xff]  ;;  %v2579_v33 = vld [vmem:[#allocation6 + $0x8f8] sm:$0xff] }
 0x2a1   : > { %2363 = vmatmul.mubr.f32.gmra.mrb[22].mxu0 %v2213_v55 }
 0x2a2   : > { %4064 = vmatpush1.bf16.msra.mxu0 %v4063_v50  ;;  %2510 = vmatprep.mubr.f32.mxu0 %v2212_v32  ;;  %v4087_v32 = vpack.c.bf16 %v2420_v44, %v2418_v29  ;;  %v2432_v50 = vld [vmem:[#allocation6 + $0x790] sm:$0xff]  ;;  %v2750_v29 = vld [vmem:[#allocation9 + $0xc0] sm:$0xff] }
 0x2a3   : > { %4066 = vmatprep.subr.bf16.mxu0 %v4065_v52  ;;  %v2435_v52 = vld [vmem:[#allocation6 + $0x7a8] sm:$0xff]  ;;  %v4099_v54 = vpack.c.bf16 %v2432_v50, %v2430_v49  ;;  %v2756_v44 = vld [vmem:[#allocation9 + $0xf0] sm:$0xff]  ;;  %v2781_v50 = vld [vmem:[#allocation9 + $0x1b8] sm:$0xff] }
 0x2a4   : > { %v4101_v57 = vpack.c.bf16 %v2437_v21, %v2435_v52  ;;  %v4187_v18 = vpack.c.bf16 %v2756_v44, %v2750_v29  ;;  %v2775_v49 = vld [vmem:[#allocation9 + $0x188] sm:$0xff]  ;;  %v4115_v21 = vpack.c.bf16 %v2550_v42, %v2548_v40  ;;  %v2575_v29 = vld [vmem:[#allocation6 + $0x8d8] sm:$0xff]  ;;  %v2580_v42 = vld [vmem:[#allocation6 + $0x900] sm:$0xff] }
 0x2a6   : > { %4068 = vmatpush1.bf16.msra.mxu0 %v4067_v61  ;;  %v2436_v61 = vld [vmem:[#allocation6 + $0x7b0] sm:$0xff] }
 0x2a7   : > { %4070 = vmatprep.subr.bf16.mxu0 %v4069_v25  ;;  %v2439_v25 = vld [vmem:[#allocation6 + $0x7c8] sm:$0xff]  ;;  %v4103_v5 = vpack.c.bf16 %v2436_v61, %v2434_v59  ;;  %v2554_v59 = vld [vmem:[#allocation6 + $0x830] sm:$0xff]  ;;  %v4193_v61 = vpack.c.bf16 %v2781_v50, %v2775_v49  ;;  %v2587_v49 = vld [vmem:[#allocation6 + $0x938] sm:$0xff] }
 0x2aa   : > { %4072 = vmatpush1.bf16.msra.mxu0 %v4071_v1  ;;  %v2733_v1 = vld [vmem:[#allocation9 + $0x38] sm:$0xff] }
 0x2ab   : > { %4074 = vmatprep.subr.bf16.mxu0 %v4073_v3  ;;  %v2726_v3 = vld [vmem:[#allocation9] sm:$0xff]  ;;  %v4177_v23 = vpack.c.bf16 %v2733_v1, %v2727_v63  ;;  %v2377_v63 = vrot.slane %v5485_v43, 2 }
 0x2ac   : > { %v4179_v8 = vpack.c.bf16 %v2732_v16, %v2726_v3  ;;  %v2556_v3 = vld [vmem:[#allocation6 + $0x840] sm:$0xff]  ;;  %v2563_v16 = vld [vmem:[#allocation6 + $0x878] sm:$0xff] }
 0x2ad   : > { %4178 = vmatprep.subr.bf16.mxu1 %v4177_v23  ;;  %v2561_v23 = vld [vmem:[#allocation6 + $0x868] sm:$0xff] }
 0x2ae   : > { %4076 = vmatpush1.bf16.msra.mxu0 %v4075_v6  ;;  %v2745_v6 = vld [vmem:[#allocation9 + $0x98] sm:$0xff]  ;;  %4180 = vmatpush1.bf16.msra.mxu1 %v4179_v8  ;;  %v2565_v8 = vld [vmem:[#allocation6 + $0x888] sm:$0xff] }
 0x2af   : > { %4078 = vmatprep.subr.bf16.mxu0 %v4077_v7  ;;  %v4105_v7 = vpack.c.bf16 %v2441_v11, %v2439_v25  ;;  %v4181_v9 = vpack.c.bf16 %v2745_v6, %v2739_v38  ;;  %v2378_v25 = vrot.slane %v5483_v58, 2  ;;  %v2557_v11 = vld [vmem:[#allocation6 + $0x848] sm:$0xff]  ;;  %v2560_v38 = vld [vmem:[#allocation6 + $0x860] sm:$0xff]  ;;  %v2562_v6 = vld [vmem:[#allocation6 + $0x870] sm:$0xff] }
 0x2b0   : > { %v4121_v1 = vpack.c.bf16 %v2559_v62, %v2557_v11  ;;  %v4127_v26 = vpack.c.bf16 %v2562_v6, %v2560_v38  ;;  %v2588_v11 = vld [vmem:[#allocation6 + $0x940] sm:$0xff]  ;;  %v2590_v62 = vld [vmem:[#allocation6 + $0x950] sm:$0xff] }
 0x2b1   : > { %4182 = vmatprep.subr.bf16.mxu1 %v4181_v9  ;;  %v2567_v9 = vld [vmem:[#allocation6 + $0x898] sm:$0xff] }
 0x2b2   : > { %4080 = vmatpush1.bf16.msra.mxu0 %v4079_v12  ;;  %v2751_v12 = vld [vmem:[#allocation9 + $0xc8] sm:$0xff]  ;;  %4184 = vmatpush1.bf16.msra.mxu1 %v4183_v2  ;;  %v4129_v13 = vpack.c.bf16 %v2567_v9, %v2565_v8  ;;  %v2596_v8 = vld [vmem:[#allocation6 + $0x980] sm:$0xff] }
 0x2b3   : > { %4082 = vmatprep.subr.bf16.mxu0 %v4081_v37  ;;  %v2443_v37 = vld [vmem:[#allocation6 + $0x7e8] sm:$0xff]  ;;  %v2598_v9 = vld [vmem:[#allocation6 + $0x990] sm:$0xff] }
 0x2b4   : > { %v4109_v48 = vpack.c.bf16 %v2445_v19, %v2443_v37  ;;  %v2566_v37 = vld [vmem:[#allocation6 + $0x890] sm:$0xff]  ;;  %v2569_v19 = vld [vmem:[#allocation6 + $0x8a8] sm:$0xff] }
 0x2b6   : > { %4084 = vmatpush1.bf16.msra.mxu0 %v4083_v27  ;;  %v2442_v27 = vld [vmem:[#allocation6 + $0x7e0] sm:$0xff] }
 0x2b7   : > { %4086 = vmatprep.subr.bf16.mxu0 %v4085_v14  ;;  %v4185_v14 = vpack.c.bf16 %v2757_v51, %v2751_v12  ;;  %v4111_v35 = vpack.c.bf16 %v2444_v31, %v2442_v27  ;;  %v2564_v12 = vld [vmem:[#allocation6 + $0x880] sm:$0xff]  ;;  %v2571_v51 = vld [vmem:[#allocation6 + $0x8b8] sm:$0xff]  ;;  %v2570_v27 = vld [vmem:[#allocation6 + $0x8b0] sm:$0xff] }
 0x2b8   : > { %v4131_v2 = vpack.c.bf16 %v2566_v37, %v2564_v12  ;;  %v2572_v31 = vld [vmem:[#allocation6 + $0x8c0] sm:$0xff]  ;;  %v4163_v12 = vpack.c.bf16 %v2598_v9, %v2596_v8 }
 0x2b9   : > { %4186 = vmatprep.subr.bf16.mxu1 %v4185_v14  ;;  %v2573_v14 = vld [vmem:[#allocation6 + $0x8c8] sm:$0xff] }
 0x2ba   : > { %4088 = vmatpush1.bf16.msra.mxu0 %v4087_v32  ;;  %v2763_v32 = vld [vmem:[#allocation9 + $0x128] sm:$0xff]  ;;  %4188 = vmatpush1.bf16.msra.mxu1 %v4187_v18 }
 0x2bb   : > { %4090 = vmatprep.subr.bf16.mxu0 %v4089_v56  ;;  %v2769_v56 = vld [vmem:[#allocation9 + $0x158] sm:$0xff] }
 0x2be   : > { %4092 = vmatpush1.bf16.msra.mxu0 %v4091_v20  ;;  %v4189_v20 = vpack.c.bf16 %v2769_v56, %v2763_v32  ;;  %v2574_v32 = vld [vmem:[#allocation6 + $0x8d0] sm:$0xff]  ;;  %v2577_v56 = vld [vmem:[#allocation6 + $0x8e8] sm:$0xff] }
 0x2bf   : > { %4094 = vmatprep.subr.bf16.mxu0 %v4093_v36  ;;  %v2762_v36 = vld [vmem:[#allocation9 + $0x120] sm:$0xff]  ;;  %v4139_v17 = vpack.c.bf16 %v2574_v32, %v2572_v31  ;;  %v4141_v18 = vpack.c.bf16 %v2579_v33, %v2577_v56  ;;  %v2610_v33 = vld [vmem:[#allocation6 + $0x9f0] sm:$0xff] }
 0x2c0   : > { %v4191_v52 = vpack.c.bf16 %v2768_v39, %v2762_v36  ;;  %4190 = vmatprep.subr.bf16.mxu1 %v4189_v20  ;;  %v2578_v20 = vld [vmem:[#allocation6 + $0x8f0] sm:$0xff]  ;;  %v2581_v36 = vld [vmem:[#allocation6 + $0x908] sm:$0xff]  ;;  %v2583_v39 = vld [vmem:[#allocation6 + $0x918] sm:$0xff] }
 0x2c1   : > { %v4145_v40 = vpack.c.bf16 %v2583_v39, %v2581_v36  ;;  %v2608_v56 = vld [vmem:[#allocation6 + $0x9e0] sm:$0xff]  ;;  %v2545_v36 = vrot.slane %v5525_v15, 2  ;;  %v2799_v15 = vld [vmem:[#allocation9 + $0x248] sm:$0xff] }
 0x2c2   : > { %4096 = vmatpush1.bf16.msra.mxu0 %v4095_v45  ;;  %v2553_v45 = vld [vmem:[#allocation6 + $0x828] sm:$0xff]  ;;  %4192 = vmatpush1.bf16.msra.mxu1 %v4191_v52 }
 0x2c3   : > { %4098 = vmatprep.subr.bf16.mxu0 %v4097_v47  ;;  %v2555_v47 = vld [vmem:[#allocation6 + $0x838] sm:$0xff]  ;;  %4194 = vmatprep.subr.bf16.mxu1 %v4193_v61 }
 0x2c6   : > { %4100 = vmatpush1.bf16.msra.mxu0 %v4099_v54  ;;  %v4117_v54 = vpack.c.bf16 %v2555_v47, %v2553_v45  ;;  %v2582_v45 = vld [vmem:[#allocation6 + $0x910] sm:$0xff]  ;;  %v2585_v47 = vld [vmem:[#allocation6 + $0x928] sm:$0xff] }
 0x2c7   : > { %4102 = vmatprep.subr.bf16.mxu0 %v4101_v57  ;;  %v2552_v57 = vld [vmem:[#allocation6 + $0x820] sm:$0xff]  ;;  %v4147_v50 = vpack.c.bf16 %v2582_v45, %v2580_v42  ;;  %v4149_v52 = vpack.c.bf16 %v2587_v49, %v2585_v47  ;;  %v2792_v49 = vld [vmem:[#allocation9 + $0x210] sm:$0xff] }
 0x2c8   : > { %v4119_v24 = vpack.c.bf16 %v2554_v59, %v2552_v57  ;;  %v2589_v57 = vld [vmem:[#allocation6 + $0x948] sm:$0xff]  ;;  %v2591_v59 = vld [vmem:[#allocation6 + $0x958] sm:$0xff] }
 0x2c9   : > { %v2774_v45 = vld [vmem:[#allocation9 + $0x180] sm:$0xff]  ;;  %v2793_v47 = vld [vmem:[#allocation9 + $0x218] sm:$0xff] }
 0x2ca   : > { %4104 = vmatpush1.bf16.msra.mxu0 %v4103_v5  ;;  %v2558_v5 = vld [vmem:[#allocation6 + $0x850] sm:$0xff] }
 0x2cb   : > { %4106 = vmatprep.subr.bf16.mxu0 %v4105_v7  ;;  %v4123_v58 = vpack.c.bf16 %v2558_v5, %v2556_v3  ;;  %v2380_v7 = vrot.slane %v5513_v53, 2  ;;  %v4155_v3 = vpack.c.bf16 %v2590_v62, %v2588_v11  ;;  %v2780_v53 = vld [vmem:[#allocation9 + $0x1b0] sm:$0xff]  ;;  %v2810_v62 = vld [vmem:[#allocation9 + $0x2a0] sm:$0xff] }
 0x2ce   : > { %4108 = vmatpush1.bf16.msra.mxu0 %v4107_v4  ;;  %v2568_v4 = vld [vmem:[#allocation6 + $0x8a0] sm:$0xff] }
 0x2cf   : > { %4110 = vmatprep.subr.bf16.mxu0 %v4109_v48  ;;  %v4135_v44 = vpack.c.bf16 %v2570_v27, %v2568_v4  ;;  %v4137_v48 = vpack.c.bf16 %v2575_v29, %v2573_v14  ;;  %v2604_v14 = vld [vmem:[#allocation6 + $0x9c0] sm:$0xff]  ;;  %v2606_v29 = vld [vmem:[#allocation6 + $0x9d0] sm:$0xff] }
 0x2d0   : > { %v4171_v31 = vpack.c.bf16 %v2606_v29, %v2604_v14  ;;  %v2734_v14 = vld [vmem:[#allocation9 + $0x40] sm:$0xff]  ;;  %v2741_v29 = vld [vmem:[#allocation9 + $0x78] sm:$0xff] }
 0x2d2   : > { %4112 = vmatpush1.bf16.msra.mxu0 %v4111_v35  ;;  %v2576_v35 = vld [vmem:[#allocation6 + $0x8e0] sm:$0xff] }
 0x2d3   : > { %4114 = vmatprep.subr.bf16.mxu0 %v4113_v41  ;;  %v4143_v41 = vpack.c.bf16 %v2578_v20, %v2576_v35  ;;  %v2543_v35 = vrot.slane %v5495_v30, 2  ;;  %v2546_v20 = vrot.slane %v5523_v10, 2  ;;  %v2787_v10 = vld [vmem:[#allocation9 + $0x1e8] sm:$0xff] }
 0x2d5   : > { %2511 = vmatmul.mubr.f32.vlgmr.msra.gmra.mrb[16].mxu0 %v2211_v34  ;;  %v4125_v34 = vpack.c.bf16 %v2563_v16, %v2561_v23  ;;  %v2592_v23 = vld [vmem:[#allocation6 + $0x960] sm:$0xff]  ;;  %v2594_v16 = vld [vmem:[#allocation6 + $0x970] sm:$0xff] }
 0x2d6   : > { %2516 = vmatprep.mubr.f32.mxu0 %v2378_v25  ;;  %4116 = vmatpush1.bf16.msra.mxu0 %v4115_v21  ;;  %v2584_v21 = vld [vmem:[#allocation6 + $0x920] sm:$0xff]  ;;  %v4159_v38 = vpack.c.bf16 %v2594_v16, %v2592_v23 }
 0x2d7   : > { %4118 = vmatprep.subr.bf16.mxu0 %v4117_v54  ;;  %v2586_v54 = vld [vmem:[#allocation6 + $0x930] sm:$0xff] }
 0x2d8   : > { %v4151_v61 = vpack.c.bf16 %v2586_v54, %v2584_v21  ;;  %v2798_v54 = vld [vmem:[#allocation9 + $0x240] sm:$0xff] }
 0x2d9   : > { %2517 = vmatmul.mubr.f32.gmra.mrb[18].mxu0 %v2377_v63 }
 0x2da   : > { %2522 = vmatprep.mubr.f32.mxu0 %v2214_v46  ;;  %4120 = vmatpush1.bf16.msra.mxu0 %v4119_v24  ;;  %v2379_v46 = vrot.slane %v5516_v60, 2  ;;  %v2593_v24 = vld [vmem:[#allocation6 + $0x968] sm:$0xff]  ;;  %v4197_v60 = vpack.c.bf16 %v2793_v47, %v2787_v10 }
 0x2db   : > { %4122 = vmatprep.subr.bf16.mxu0 %v4121_v1  ;;  %v2595_v1 = vld [vmem:[#allocation6 + $0x978] sm:$0xff]  ;;  %v2771_v10 = vld [vmem:[#allocation9 + $0x168] sm:$0xff] }
 0x2dc   : > { %v4157_v5 = vpack.c.bf16 %v2595_v1, %v2593_v24  ;;  %v2816_v24 = vld [vmem:[#allocation9 + $0x2d0] sm:$0xff] }
 0x2dd   : > { %2523 = vmatmul.mubr.f32.gmra.mrb[20].mxu0 %v2213_v55  ;;  %v4133_v55 = vpack.c.bf16 %v2571_v51, %v2569_v19  ;;  %v2600_v19 = vld [vmem:[#allocation6 + $0x9a0] sm:$0xff]  ;;  %v2602_v51 = vld [vmem:[#allocation6 + $0x9b0] sm:$0xff]  ;;  %v4207_v1 = vpack.c.bf16 %v2816_v24, %v2810_v62 }
 0x2de   : > { %2528 = vmatprep.mubr.f32.mxu0 %v2380_v7  ;;  %4124 = vmatpush1.bf16.msra.mxu0 %v4123_v58  ;;  %v2597_v58 = vld [vmem:[#allocation6 + $0x988] sm:$0xff]  ;;  %v4167_v4 = vpack.c.bf16 %v2602_v51, %v2600_v19  ;;  %v3669_v19 = vld [vmem:[#allocation7] ss:$0 sm:$0xff]  ;;  %v2788_v24 = vld [vmem:[#allocation9 + $0x1f0] sm:$0xff] }
 0x2df   : > { %4126 = vmatprep.subr.bf16.mxu0 %v4125_v34  ;;  %v2599_v34 = vld [vmem:[#allocation6 + $0x998] sm:$0xff] }
 0x2e0   : > { %v4161_v6 = vpack.c.bf16 %v2599_v34, %v2597_v58 }
 0x2e1   : > { %2529 = vmatmul.mubr.f32.gmra.mrb[22].mxu0 %v2379_v46 }
 0x2e2   : > { %4128 = vmatpush1.bf16.msra.mxu0 %v4127_v26  ;;  %2676 = vmatprep.mubr.f32.mxu0 %v2378_v25  ;;  %v4153_v25 = vpack.c.bf16 %v2591_v59, %v2589_v57  ;;  %v2601_v26 = vld [vmem:[#allocation6 + $0x9a8] sm:$0xff]  ;;  %v2804_v57 = vld [vmem:[#allocation9 + $0x270] sm:$0xff] }
 0x2e3   : > { %4130 = vmatprep.subr.bf16.mxu0 %v4129_v13  ;;  %v2603_v13 = vld [vmem:[#allocation6 + $0x9b8] sm:$0xff]  ;;  %v4203_v59 = vpack.c.bf16 %v2804_v57, %v2798_v54 }
 0x2e4   : > { %v4165_v37 = vpack.c.bf16 %v2603_v13, %v2601_v26  ;;  %v2776_v57 = vld [vmem:[#allocation9 + $0x190] sm:$0xff] }
 0x2e6   : > { %4132 = vmatpush1.bf16.msra.mxu0 %v4131_v2  ;;  %v2605_v2 = vld [vmem:[#allocation6 + $0x9c8] sm:$0xff] }
 0x2e7   : > { %4134 = vmatprep.subr.bf16.mxu0 %v4133_v55  ;;  %v2607_v55 = vld [vmem:[#allocation6 + $0x9d8] sm:$0xff] }
 0x2e8   : > { %v4169_v27 = vpack.c.bf16 %v2607_v55, %v2605_v2 }
 0x2ea   : > { %4136 = vmatpush1.bf16.msra.mxu0 %v4135_v44  ;;  %v2609_v44 = vld [vmem:[#allocation6 + $0x9e8] sm:$0xff] }
 0x2eb   : > { %4138 = vmatprep.subr.bf16.mxu0 %v4137_v48  ;;  %v2611_v48 = vld [vmem:[#allocation6 + $0x9f8] sm:$0xff] }
 0x2ec   : > { %v4173_v32 = vpack.c.bf16 %v2611_v48, %v2609_v44  ;;  %v2747_v44 = vld [vmem:[#allocation9 + $0xa8] sm:$0xff] }
 0x2ee   : > { %4140 = vmatpush1.bf16.msra.mxu0 %v4139_v17  ;;  %v4175_v17 = vpack.c.bf16 %v2610_v33, %v2608_v56 }
 0x2ef   : > { %4142 = vmatprep.subr.bf16.mxu0 %v4141_v18  ;;  %v2544_v18 = vrot.slane %v5493_v22, 2 }
 0x2f2   : > { %4144 = vmatpush1.bf16.msra.mxu0 %v4143_v41 }
 0x2f3   : > { %4146 = vmatprep.subr.bf16.mxu0 %v4145_v40 }
 0x2f6   : > { %4148 = vmatpush1.bf16.msra.mxu0 %v4147_v50 }
 0x2f7   : > { %4150 = vmatprep.subr.bf16.mxu0 %v4149_v52  ;;  %v2805_v52 = vld [vmem:[#allocation9 + $0x278] sm:$0xff] }
 0x2f8   : > { %v4201_v21 = vpack.c.bf16 %v2805_v52, %v2799_v15  ;;  %v2777_v15 = vld [vmem:[#allocation9 + $0x198] sm:$0xff]  ;;  %v2783_v52 = vld [vmem:[#allocation9 + $0x1c8] sm:$0xff] }
 0x2f9   : > { %v4225_v54 = vpack.c.bf16 %v2783_v52, %v2777_v15  ;;  %v2803_v15 = vld [vmem:[#allocation9 + $0x268] sm:$0xff]  ;;  %v2809_v52 = vld [vmem:[#allocation9 + $0x298] sm:$0xff] }
 0x2fa   : > { %4152 = vmatpush1.bf16.msra.mxu0 %v4151_v61  ;;  %v2811_v61 = vld [vmem:[#allocation9 + $0x2a8] sm:$0xff] }
 0x2fb   : > { %4154 = vmatprep.subr.bf16.mxu0 %v4153_v25  ;;  %v2817_v25 = vld [vmem:[#allocation9 + $0x2d8] sm:$0xff] }
 0x2fc   : > { %v4205_v11 = vpack.c.bf16 %v2817_v25, %v2811_v61  ;;  %v2789_v61 = vld [vmem:[#allocation9 + $0x1f8] sm:$0xff]  ;;  %v2795_v25 = vld [vmem:[#allocation9 + $0x228] sm:$0xff] }
 0x2fd   : > { %v4229_v62 = vpack.c.bf16 %v2795_v25, %v2789_v61  ;;  %v2815_v61 = vld [vmem:[#allocation9 + $0x2c8] sm:$0xff]  ;;  %v2821_v25 = vld [vmem:[#allocation9 + $0x2f8] sm:$0xff] }
 0x2fe   : > { %4156 = vmatpush1.bf16.msra.mxu0 %v4155_v3  ;;  %v2729_v3 = vld [vmem:[#allocation9 + $0x18] sm:$0xff] }
 0x2ff   : > { %4158 = vmatprep.subr.bf16.mxu0 %v4157_v5  ;;  %v2735_v5 = vld [vmem:[#allocation9 + $0x48] sm:$0xff] }
 0x300   : > { %v4209_v23 = vpack.c.bf16 %v2735_v5, %v2729_v3  ;;  %v2801_v3 = vld [vmem:[#allocation9 + $0x258] sm:$0xff]  ;;  %v2807_v5 = vld [vmem:[#allocation9 + $0x288] sm:$0xff] }
 0x302   : > { %4160 = vmatpush1.bf16.msra.mxu0 %v4159_v38 }
 0x303   : > { %4162 = vmatprep.subr.bf16.mxu0 %v4161_v6 }
 0x306   : > { %4164 = vmatpush1.bf16.msra.mxu0 %v4163_v12 }
 0x307   : > { %4166 = vmatprep.subr.bf16.mxu0 %v4165_v37 }
 0x30a   : > { %4168 = vmatpush1.bf16.msra.mxu0 %v4167_v4 }
 0x30b   : > { %4170 = vmatprep.subr.bf16.mxu0 %v4169_v27  ;;  %v2728_v27 = vld [vmem:[#allocation9 + $0x10] sm:$0xff] }
 0x30e   : > { %4172 = vmatpush1.bf16.msra.mxu0 %v4171_v31 }
 0x30f   : > { %4174 = vmatprep.subr.bf16.mxu0 %v4173_v32 }
 0x312   : > { %4176 = vmatpush1.bf16.msra.mxu0 %v4175_v17  ;;  %v4211_v17 = vpack.c.bf16 %v2734_v14, %v2728_v27  ;;  %v2749_v27 = vld [vmem:[#allocation9 + $0xb8] sm:$0xff] }
 0x315   : > { %2677 = vmatmul.mubr.f32.vlgmr.msra.gmra.mrb[16].mxu0 %v2377_v63 }
 0x316   : > { %2682 = vmatprep.mubr.f32.mxu0 %v2544_v18 }
 0x319   : > { %2683 = vmatmul.mubr.f32.gmra.mrb[18].mxu0 %v2543_v35 }
 0x31a   : > { %2688 = vmatprep.mubr.f32.mxu0 %v2380_v7  ;;  %v4195_v7 = vpack.c.bf16 %v2780_v53, %v2774_v45  ;;  %v2752_v45 = vld [vmem:[#allocation9 + $0xd0] sm:$0xff]  ;;  %v2758_v53 = vld [vmem:[#allocation9 + $0x100] sm:$0xff] }
 0x31b   : > { %v4219_v47 = vpack.c.bf16 %v2758_v53, %v2752_v45  ;;  %v2778_v53 = vld [vmem:[#allocation9 + $0x1a0] sm:$0xff] }
 0x31c   : > { %4196 = vmatpush1.bf16.msra.mxu1 %v4195_v7  ;;  %v2765_v7 = vld [vmem:[#allocation9 + $0x138] sm:$0xff] }
 0x31d   : > { %2689 = vmatmul.mubr.f32.gmra.mrb[20].mxu0 %v2379_v46  ;;  %v2786_v46 = vld [vmem:[#allocation9 + $0x1e0] sm:$0xff]  ;;  %4198 = vmatprep.subr.bf16.mxu1 %v4197_v60 }
 0x31e   : > { %2694 = vmatprep.mubr.f32.mxu0 %v2546_v20  ;;  %v4199_v50 = vpack.c.bf16 %v2792_v49, %v2786_v46  ;;  %v4213_v20 = vpack.c.bf16 %v2747_v44, %v2741_v29  ;;  %v4221_v46 = vpack.c.bf16 %v2771_v10, %v2765_v7  ;;  %v2764_v49 = vld [vmem:[#allocation9 + $0x130] sm:$0xff]  ;;  %v2742_v44 = vld [vmem:[#allocation9 + $0x80] sm:$0xff]  ;;  %v2791_v10 = vld [vmem:[#allocation9 + $0x208] sm:$0xff] }
 0x31f   : > { %v2784_v7 = vld [vmem:[#allocation9 + $0x1d0] sm:$0xff] }
 0x320   : > { %4200 = vmatpush1.bf16.msra.mxu1 %v4199_v50  ;;  %v2770_v50 = vld [vmem:[#allocation9 + $0x160] sm:$0xff] }
 0x321   : > { %2695 = vmatmul.mubr.f32.gmra.mrb[22].mxu0 %v2545_v36  ;;  %4202 = vmatprep.subr.bf16.mxu1 %v4201_v21  ;;  %v2740_v36 = vld [vmem:[#allocation9 + $0x70] sm:$0xff]  ;;  %v4223_v21 = vpack.c.bf16 %v2770_v50, %v2764_v49  ;;  %v2790_v49 = vld [vmem:[#allocation9 + $0x200] sm:$0xff] }
 0x322   : > { %v2796_v50 = vld [vmem:[#allocation9 + $0x230] sm:$0xff] }
 0x324   : > { %4204 = vmatpush1.bf16.msra.mxu1 %v4203_v59  ;;  %v2782_v59 = vld [vmem:[#allocation9 + $0x1c0] sm:$0xff] }
 0x325   : > { %4206 = vmatprep.subr.bf16.mxu1 %v4205_v11  ;;  %v4227_v11 = vpack.c.bf16 %v2782_v59, %v2776_v57  ;;  %v2802_v57 = vld [vmem:[#allocation9 + $0x260] sm:$0xff]  ;;  %v2808_v59 = vld [vmem:[#allocation9 + $0x290] sm:$0xff] }
 0x328   : > { %4208 = vmatpush1.bf16.msra.mxu1 %v4207_v1  ;;  %v2794_v1 = vld [vmem:[#allocation9 + $0x220] sm:$0xff] }
 0x329   : > { %4210 = vmatprep.subr.bf16.mxu1 %v4209_v23  ;;  %v4231_v23 = vpack.c.bf16 %v2794_v1, %v2788_v24  ;;  %v2814_v24 = vld [vmem:[#allocation9 + $0x2c0] sm:$0xff]  ;;  %v2820_v1 = vld [vmem:[#allocation9 + $0x2f0] sm:$0xff] }
 0x330   : > { %v2099_v22 = vpop.f32.mrb[26].mxu1 }
 0x331   : > { %v2101_v39 = vpop.f32.mrb[27].mxu1 }
 0x334   : > { %v2105_v43 = vpop.f32.mrb[28].mxu1 }
 0x335   : > { %v2107_v63 = vpop.f32.mrb[29].mxu1 }
 0x340   : > { %v2111_v41 = vpop.f32.mrb[30].mxu1 }
 0x341   : > { %v2113_v40 = vpop.f32.mrb[31].mxu1 }
 0x344   : > { %v2117_v30 = vpop.f32.mrb[32].mxu1 }
 0x345   : > { %v2119_v42 = vpop.f32.mrb[33].mxu1 }
 0x3e8   : > { %v2678_v16 = vpop.f32.mrb[16].mxu0 }
 0x3e9   : > { %v4337_v58 = vadd.f32 %v2678_v16, %v2099_v22  ;;  %v2680_v34 = vpop.f32.mrb[17].mxu0  ;;  %v2746_v22 = vld [vmem:[#allocation9 + $0xa0] sm:$0xff]  ;;  %v4233_v16 = vpack.c.bf16 %v2807_v5, %v2801_v3  ;;  %v4271_v3 = vpack.c.bf16 %v2820_v1, %v2814_v24 }
 0x3ea   : > { %v4338_v38 = vadd.f32 %v2680_v34, %v2101_v39  ;;  %v2753_v39 = vld [vmem:[#allocation9 + $0xd8] sm:$0xff]  ;;  %v2806_v34 = vld [vmem:[#allocation9 + $0x280] sm:$0xff] }
 0x3eb   : > { %v3148_v5 = vld [vmem:[#allocation12] sm:$0xff] }
 0x3ec   : > { %v2710_v6 = vmax.f32 %v4337_v58, %v4338_v38  ;;  %v2684_v8 = vpop.f32.mrb[18].mxu0  ;;  %v2800_v58 = vld [vmem:[#allocation9 + $0x250] sm:$0xff]  ;;  %v2813_v38 = vld [vmem:[#allocation9 + $0x2b8] sm:$0xff] }
 0x3ed   : > { %v4339_v9 = vadd.f32 %v2684_v8, %v2105_v43  ;;  %v2686_v26 = vpop.f32.mrb[19].mxu0  ;;  %v2759_v43 = vld [vmem:[#allocation9 + $0x108] sm:$0xff]  ;;  %v4235_v8 = vpack.c.bf16 %v2806_v34, %v2800_v58  ;;  %v4857_v58 = vmov 0.0|0.0   ;;  %v3150_v34 = vld [vmem:[#allocation12 + $0x10] sm:$0xff] }
 0x3ee   : > { %v4340_v13 = vadd.f32 %v2686_v26, %v2107_v63  ;;  %v2812_v26 = vld [vmem:[#allocation9 + $0x2b0] sm:$0xff] }
 0x3f0   : > { %v2711_v12 = vmax.f32 %v4339_v9, %v4340_v13  ;;  %v2690_v37 = vpop.f32.mrb[20].mxu0  ;;  %v2818_v13 = vld [vmem:[#allocation9 + $0x2e0] sm:$0xff] }
 0x3f1   : > { %v4341_v51 = vadd.f32 %v2690_v37, %v2111_v41  ;;  %v2692_v2 = vpop.f32.mrb[21].mxu0  ;;  %v4215_v41 = vpack.c.bf16 %v2746_v22, %v2740_v36  ;;  %v2737_v37 = vld [vmem:[#allocation9 + $0x58] sm:$0xff] }
 0x3f2   : > { %v2712_v55 = vmax.f32 %v2710_v6, %v2711_v12  ;;  %v4342_v4 = vadd.f32 %v2692_v2, %v2113_v40  ;;  %v2819_v6 = vld [vmem:[#allocation9 + $0x2e8] sm:$0xff]  ;;  %v2730_v2 = vld [vmem:[#allocation9 + $0x20] sm:$0xff]  ;;  %v2773_v36 = vld [vmem:[#allocation9 + $0x178] sm:$0xff] }
 0x3f3   : > { %v4237_v9 = vpack.c.bf16 %v2819_v6, %v2813_v38  ;;  %v2731_v12 = vld [vmem:[#allocation9 + $0x28] sm:$0xff]  ;;  %v3151_v38 = vld [vmem:[#allocation12 + $0x18] sm:$0xff] }
 0x3f4   : > { %v2719_v48 = vadd.f32 %v3669_v19, %v2712_v55  ;;  %v2721_v31 = vmax.f32 %v4341_v51, %v4342_v4  ;;  %v2696_v32 = vpop.f32.mrb[22].mxu0  ;;  %v4241_v51 = vpack.c.bf16 %v2737_v37, %v2731_v12  ;;  %v2736_v55 = vld [vmem:[#allocation9 + $0x50] sm:$0xff]  ;;  %v2743_v4 = vld [vmem:[#allocation9 + $0x88] sm:$0xff]  ;;  %v5602_v6 = vpack.c.bf16 %v3151_v38, %v3150_v34 }
 0x3f5   : > { %v4343_v56 = vadd.f32 %v2696_v32, %v2117_v30  ;;  %v2698_v33 = vpop.f32.mrb[23].mxu0  ;;  %v4217_v30 = vpack.c.bf16 %v2759_v43, %v2753_v39  ;;  %v4243_v14 = vpack.c.bf16 %v2736_v55, %v2730_v2  ;;  %v4245_v29 = vpack.c.bf16 %v2749_v27, %v2743_v4  ;;  %v2761_v32 = vld [vmem:[#allocation9 + $0x118] sm:$0xff]  ;;  %v2766_v43 = vld [vmem:[#allocation9 + $0x140] sm:$0xff]  ;;  %v3157_v37 = vld [vmem:[#allocation12 + $0x48] sm:$0xff] }
 0x3f6   : > { %v5582_v18 = vmax.f32 %v2719_v48, 0.0  ;;  %v4344_v35 = vadd.f32 %v2698_v33, %v2119_v42  ;;  %v2748_v48 = vld [vmem:[#allocation9 + $0xb0] sm:$0xff]  ;;  %v3156_v12 = vld [vmem:[#allocation12 + $0x40] sm:$0xff]  ;;  %v3159_v2 = vld [vmem:[#allocation12 + $0x58] sm:$0xff] }
 0x3f7   : > { %v3160_v4 = vld [vmem:[#allocation12 + $0x60] sm:$0xff]  ;;  %v3161_v27 = vld [vmem:[#allocation12 + $0x68] sm:$0xff] }
 0x3f8   : > { %v2722_v63 = vmax.f32 %v4343_v56, %v4344_v35  ;;  %2887 = vmatmul.mubr.f32.vlgmr.msra.gmra.mrb[34].mxu1 %v5582_v18  ;;  %v4247_v56 = vpack.c.bf16 %v2748_v48, %v2742_v44  ;;  %v2760_v35 = vld [vmem:[#allocation9 + $0x110] sm:$0xff]  ;;  %v3163_v44 = vld [vmem:[#allocation12 + $0x78] sm:$0xff] }
 0x3f9   : > { %4212 = vmatpush1.bf16.msra.mxu1 %v4211_v17  ;;  %2892 = vmatprep.mubr.f32.mxu1 %v4856_v0  ;;  %v2754_v17 = vld [vmem:[#allocation9 + $0xe0] sm:$0xff] }
 0x3fa   : > { %v2723_v40 = vmax.f32 %v2721_v31, %v2722_v63  ;;  %4214 = vmatprep.subr.bf16.mxu1 %v4213_v20  ;;  %v2755_v31 = vld [vmem:[#allocation9 + $0xe8] sm:$0xff]  ;;  %v4251_v22 = vpack.c.bf16 %v2760_v35, %v2754_v17  ;;  %v2772_v63 = vld [vmem:[#allocation9 + $0x170] sm:$0xff] }
 0x3fb   : > { %v4249_v33 = vpack.c.bf16 %v2761_v32, %v2755_v31  ;;  %v2767_v20 = vld [vmem:[#allocation9 + $0x148] sm:$0xff]  ;;  %v4859_v31 = vmov 1966171168  }
 0x3fc   : > { %v2724_v42 = vadd.f32 %v3669_v19, %v2723_v40  ;;  %v4239_v19 = vpack.c.bf16 %v2818_v13, %v2812_v26  ;;  %v4253_v39 = vpack.c.bf16 %v2773_v36, %v2767_v20  ;;  %v2785_v40 = vld [vmem:[#allocation9 + $0x1d8] sm:$0xff]  ;;  %v3057_v32 = vunpack.c.l.s4 %v4859_v31  ;;  %v3053_v36 = vld [vmem:[#allocation10] sm:$0x1] }
 0x3fd   : > { %4216 = vmatpush1.bf16.msra.mxu1 %v4215_v41  ;;  %v2779_v41 = vld [vmem:[#allocation9 + $0x1a8] sm:$0xff]  ;;  %v3155_v26 = vld [vmem:[#allocation12 + $0x38] sm:$0xff] }
 0x3fe   : > { %4218 = vmatprep.subr.bf16.mxu1 %v4217_v30  ;;  %v5586_v60 = vmax.f32 %v2724_v42, 0.0  ;;  %v4255_v30 = vpack.c.bf16 %v2772_v63, %v2766_v43  ;;  %v4257_v45 = vpack.c.bf16 %v2785_v40, %v2779_v41  ;;  %v2797_v42 = vld [vmem:[#allocation9 + $0x238] sm:$0xff] }
 0x400   : > { %2893 = vmatmul.mubr.f32.gmra.mrb[36].mxu1 %v5586_v60 }
 0x401   : > { %4220 = vmatpush1.bf16.msra.mxu1 %v4219_v47  ;;  %2963 = vmatprep.mubr.f32.mxu1 %v4856_v0  ;;  %v4259_v47 = vpack.c.bf16 %v2784_v7, %v2778_v53 }
 0x402   : > { %4222 = vmatprep.subr.bf16.mxu1 %v4221_v46  ;;  %v4261_v46 = vpack.c.bf16 %v2797_v42, %v2791_v10 }
 0x405   : > { %4224 = vmatpush1.bf16.msra.mxu1 %v4223_v21  ;;  %v4263_v21 = vpack.c.bf16 %v2796_v50, %v2790_v49 }
 0x406   : > { %4226 = vmatprep.subr.bf16.mxu1 %v4225_v54  ;;  %v4265_v54 = vpack.c.bf16 %v2809_v52, %v2803_v15 }
 0x409   : > { %4228 = vmatpush1.bf16.msra.mxu1 %v4227_v11  ;;  %v4267_v11 = vpack.c.bf16 %v2808_v59, %v2802_v57 }
 0x40a   : > { %4230 = vmatprep.subr.bf16.mxu1 %v4229_v62  ;;  %v4269_v62 = vpack.c.bf16 %v2821_v25, %v2815_v61 }
 0x40d   : > { %4232 = vmatpush1.bf16.msra.mxu1 %v4231_v23  ;;  %v3149_v23 = vld [vmem:[#allocation12 + $0x8] sm:$0xff] }
 0x40e   : > { %4234 = vmatprep.subr.bf16.mxu1 %v4233_v16  ;;  %v5597_v16 = vpack.c.bf16 %v3149_v23, %v3148_v5 }
 0x411   : > { %4236 = vmatpush1.bf16.msra.mxu1 %v4235_v8  ;;  %v3153_v8 = vld [vmem:[#allocation12 + $0x28] sm:$0xff] }
 0x412   : > { %4238 = vmatprep.subr.bf16.mxu1 %v4237_v9  ;;  %v3154_v9 = vld [vmem:[#allocation12 + $0x30] sm:$0xff] }
 0x413   : > { %v5609_v13 = vpack.c.bf16 %v3155_v26, %v3154_v9 }
 0x415   : > { %4240 = vmatpush1.bf16.msra.mxu1 %v4239_v19  ;;  %v5613_v19 = vpack.c.bf16 %v3157_v37, %v3156_v12 }
 0x416   : > { %4242 = vmatprep.subr.bf16.mxu1 %v4241_v51  ;;  %v3158_v51 = vld [vmem:[#allocation12 + $0x50] sm:$0xff] }
 0x417   : > { %v5618_v55 = vpack.c.bf16 %v3159_v2, %v3158_v51 }
 0x418   : > { %2964 = vmatmul.mubr.f32.vlgmr.msra.gmra.mrb[38].mxu1 %v5582_v18 }
 0x419   : > { %4244 = vmatpush1.bf16.msra.mxu1 %v4243_v14  ;;  %2969 = vmatprep.mubr.f32.mxu1 %v4856_v0  ;;  %v5622_v14 = vpack.c.bf16 %v3161_v27, %v3160_v4 }
 0x41a   : > { %4246 = vmatprep.subr.bf16.mxu1 %v4245_v29  ;;  %v3162_v29 = vld [vmem:[#allocation12 + $0x70] sm:$0xff] }
 0x41b   : > { %v5626_v48 = vpack.c.bf16 %v3163_v44, %v3162_v29 }
 0x41c   : > { %2970 = vmatmul.mubr.f32.gmra.mrb[40].mxu1 %v5586_v60 }
 0x41d   : > { %4248 = vmatpush1.bf16.msra.mxu1 %v4247_v56  ;;  %3040 = vmatprep.mubr.f32.mxu1 %v4856_v0  ;;  %v3058_v56 = vunpack.c.0.s8 %v3057_v32 }
 0x41e   : > { %4250 = vmatprep.subr.bf16.mxu1 %v4249_v33 }
 0x41f   : > { %v3061_v33 = vsub.s32 %v3058_v56, %v5471_v28 }
 0x421   : > { %4252 = vmatpush1.bf16.msra.mxu1 %v4251_v22 }
 0x422   : > { %4254 = vmatprep.subr.bf16.mxu1 %v4253_v39 }
 0x425   : > { %4256 = vmatpush1.bf16.msra.mxu1 %v4255_v30 }
 0x426   : > { %4258 = vmatprep.subr.bf16.mxu1 %v4257_v45 }
 0x429   : > { %4260 = vmatpush1.bf16.msra.mxu1 %v4259_v47 }
 0x42a   : > { %4262 = vmatprep.subr.bf16.mxu1 %v4261_v46 }
 0x42d   : > { %4264 = vmatpush1.bf16.msra.mxu1 %v4263_v21 }
 0x42e   : > { %4266 = vmatprep.subr.bf16.mxu1 %v4265_v54 }
 0x431   : > { %4268 = vmatpush1.bf16.msra.mxu1 %v4267_v11 }
 0x432   : > { %4270 = vmatprep.subr.bf16.mxu1 %v4269_v62 }
 0x435   : > { %4272 = vmatpush1.bf16.msra.mxu1 %v4271_v3 }
 0x436   : > { %4273 = vmatprep.subr.bf16.mxu1 %v4857_v58 }
 0x438   : > { %3041 = vmatmul.mubr.f32.vlgmr.msra.gmra.mrb[42].mxu1 %v5582_v18  ;;  %v3152_v18 = vld [vmem:[#allocation12 + $0x20] sm:$0xff] }
 0x439   : > { %3046 = vmatprep.mubr.f32.mxu1 %v4856_v0  ;;  %4275 = vmatpush3.bf16.msra.mxu1 %v5597_v16 }
 0x43a   : > { %4276 = vmatprep.subr.bf16.mxu1 %v4857_v58 }
 0x43c   : > { %3047 = vmatmul.mubr.f32.gmra.mrb[44].mxu1 %v5586_v60  ;;  %v5605_v60 = vpack.c.bf16 %v3153_v8, %v3152_v18 }
 0x43d   : > { %4278 = vmatpush3.bf16.msra.mxu1 %v5602_v6  ;;  %3739 = vmatprep.mubr.msk.f32.mxu1 %vm4858_vm1, %v4856_v0 }
 0x43e   : > { %4279 = vmatprep.subr.bf16.mxu1 %v4857_v58 }
 0x441   : > { %4281 = vmatpush3.bf16.msra.mxu1 %v5605_v60 }
 0x442   : > { %4282 = vmatprep.subr.bf16.mxu1 %v4857_v58 }
 0x445   : > { %4284 = vmatpush3.bf16.msra.mxu1 %v5609_v13 }
 0x446   : > { %4285 = vmatprep.subr.bf16.mxu1 %v4857_v58 }
 0x449   : > { %4287 = vmatpush3.bf16.msra.mxu1 %v5613_v19 }
 0x44a   : > { %4288 = vmatprep.subr.bf16.mxu1 %v4857_v58 }
 0x44d   : > { %4290 = vmatpush3.bf16.msra.mxu1 %v5618_v55 }
 0x44e   : > { %4291 = vmatprep.subr.bf16.mxu1 %v4857_v58 }
 0x451   : > { %4293 = vmatpush3.bf16.msra.mxu1 %v5622_v14 }
 0x452   : > { %4294 = vmatprep.subr.bf16.mxu1 %v4857_v58 }
 0x455   : > { %4296 = vmatpush3.bf16.msra.mxu1 %v5626_v48 }
 0x456   : > { %4297 = vmatprep.subr.bf16.mxu1 %v4857_v58 }
 0x4cb   : > { %v2888_v17 = vpop.f32.mrb[34].mxu1 }
 0x4cc   : > { %v2890_v35 = vpop.f32.mrb[35].mxu1  ;;  %v3054_v39 = vadd.f32 %v3053_v36, %v2888_v17 }
 0x4cd   : > { %v3062_v20 = vrot.slane %v2890_v35, %v3061_v33 }
 0x4cf   : > { %v3063_v22 = vcombine.high %v3062_v20, %v3062_v20 }
 0x4d1   : > { %v3070_v43 = vrot.slane %v3063_v22, %v3061_v33 }
 0x4d3   : > { %v3072_v63 = vadd.f32 %v3070_v43, %v3054_v39  ;;  %v2894_v41 = vpop.f32.mrb[36].mxu1 }
 0x4d4   : > { %v2896_v40 = vpop.f32.mrb[37].mxu1  ;;  %v3236_v53 = vadd.f32 %v3053_v36, %v2894_v41 }
 0x4d5   : > { %v3244_v30 = vrot.slane %v2896_v40, %v3061_v33 }
 0x4d7   : > { %v3245_v45 = vcombine.high %v3244_v30, %v3244_v30 }
 0x4d9   : > { %v3252_v7 = vrot.slane %v3245_v45, %v3061_v33 }
 0x4db   : > { %v3254_v10 = vadd.f32 %v3252_v7, %v3236_v53 }
 0x4eb   : > { %v2965_v42 = vpop.f32.mrb[38].mxu1 }
 0x4ec   : > { %v3080_v47 = vrot.slane %v2965_v42, %v3061_v33  ;;  %v2967_v46 = vpop.f32.mrb[39].mxu1 }
 0x4ed   : > { %v3098_v49 = vrot.slane %v2967_v46, %v3061_v33 }
 0x4ee   : > { %v3087_v28 = vrot.slane %v3080_v47, %v3061_v33 }
 0x4ef   : > { %v3099_v50 = vcombine.high %v3098_v49, %v3098_v49  ;;  %v2971_v15 = vpop.f32.mrb[40].mxu1 }
 0x4f0   : > { %v3088_v52 = vcombine.high %v3087_v28, %v3087_v28  ;;  %v3262_v21 = vrot.slane %v2971_v15, %v3061_v33  ;;  %v2973_v54 = vpop.f32.mrb[41].mxu1 }
 0x4f1   : > { %v3106_v57 = vrot.slane %v3099_v50, %v3061_v33  ;;  %v3280_v59 = vrot.slane %v2973_v54, %v3061_v33 }
 0x4f2   : > { %v3090_v61 = vadd.f32 %v3088_v52, %v3072_v63  ;;  %v3269_v25 = vrot.slane %v3262_v21, %v3061_v33 }
 0x4f3   : > { %v3107_v11 = vcombine.high %v3106_v57, %v3106_v57  ;;  %v3281_v62 = vcombine.high %v3280_v59, %v3280_v59 }
 0x4f4   : > { %v3270_v24 = vcombine.high %v3269_v25, %v3269_v25 }
 0x4f5   : > { %v3109_v1 = vadd.f32 %v3107_v11, %v3090_v61  ;;  %v3288_v3 = vrot.slane %v3281_v62, %v3061_v33 }
 0x4f6   : > { %v3272_v5 = vadd.f32 %v3270_v24, %v3254_v10 }
 0x4f7   : > { %v3289_v23 = vcombine.high %v3288_v3, %v3288_v3 }
 0x4f9   : > { %v3291_v34 = vadd.f32 %v3289_v23, %v3272_v5 }
 0x50b   : > { %v3042_v38 = vpop.f32.mrb[42].mxu1 }
 0x50c   : > { %v3111_v18 = vcombine.high %v3042_v38, %v3042_v38  ;;  %v3044_v8 = vpop.f32.mrb[43].mxu1 }
 0x50d   : > { %v3129_v9 = vcombine.high %v3044_v8, %v3044_v8 }
 0x50e   : > { %v3118_v26 = vrot.slane %v3111_v18, %v3061_v33 }
 0x50f   : > { %v3136_v12 = vrot.slane %v3129_v9, %v3061_v33  ;;  %v3048_v37 = vpop.f32.mrb[44].mxu1 }
 0x510   : > { %v3125_v51 = vrot.slane %v3118_v26, %v3061_v33  ;;  %v3293_v2 = vcombine.high %v3048_v37, %v3048_v37  ;;  %v3050_v4 = vpop.f32.mrb[45].mxu1 }
 0x511   : > { %v3137_v27 = vcombine.high %v3136_v12, %v3136_v12  ;;  %v3311_v29 = vcombine.high %v3050_v4, %v3050_v4 }
 0x512   : > { %v3127_v44 = vadd.f32 %v3125_v51, %v3109_v1  ;;  %v3300_v31 = vrot.slane %v3293_v2, %v3061_v33 }
 0x513   : > { %v3144_v32 = vrot.slane %v3137_v27, %v3061_v33  ;;  %v3318_v56 = vrot.slane %v3311_v29, %v3061_v33 }
 0x514   : > { %v3307_v17 = vrot.slane %v3300_v31, %v3061_v33 }
 0x515   : > { %v3146_v35 = vadd.f32 %v3144_v32, %v3127_v44  ;;  %v3319_v20 = vcombine.high %v3318_v56, %v3318_v56 }
 0x516   : > { %v3309_v36 = vadd.f32 %v3307_v17, %v3291_v34 }
 0x517   : > { %v3147_v22 = vmax.f32 %v3146_v35, 0.0  ;;  %v3326_v39 = vrot.slane %v3319_v20, %v3061_v33 }
 0x519   : > { %v3328_v43 = vadd.f32 %v3326_v39, %v3309_v36  ;;  %3740 = vmatmul.mubr.f32.vlgmr.msra.gmra.mrb[46].mxu1 %v3147_v22 }
 0x51a   : > { %4299 = vmatpush3.bf16.msra.mxu1 %v5597_v16  ;;  %3774 = vmatprep.mubr.msk.f32.mxu1 %vm4858_vm1, %v4856_v0  ;;  %v3164_v16 = vld [vmem:[#allocation13] sm:$0x1] }
 0x51b   : > { %4300 = vmatprep.subr.bf16.mxu1 %v4857_v58  ;;  %v3329_v0 = vmax.f32 %v3328_v43, 0.0 }
 0x51e   : > { %4302 = vmatpush3.bf16.msra.mxu1 %v5602_v6 }
 0x51f   : > { %4303 = vmatprep.subr.bf16.mxu1 %v4857_v58 }
 0x522   : > { %4305 = vmatpush3.bf16.msra.mxu1 %v5605_v60 }
 0x523   : > { %4306 = vmatprep.subr.bf16.mxu1 %v4857_v58 }
 0x526   : > { %4308 = vmatpush3.bf16.msra.mxu1 %v5609_v13 }
 0x527   : > { %4309 = vmatprep.subr.bf16.mxu1 %v4857_v58 }
 0x52a   : > { %4311 = vmatpush3.bf16.msra.mxu1 %v5613_v19  ;;  %v3346_v19 = vld [vmem:[#allocation13] sm:$0x1] }
 0x52b   : > { %4312 = vmatprep.subr.bf16.mxu1 %v4857_v58 }
 0x52e   : > { %4314 = vmatpush3.bf16.msra.mxu1 %v5618_v55 }
 0x52f   : > { %4315 = vmatprep.subr.bf16.mxu1 %v4857_v58 }
 0x532   : > { %4317 = vmatpush3.bf16.msra.mxu1 %v5622_v14 }
 0x533   : > { %4318 = vmatprep.subr.bf16.mxu1 %v4857_v58 }
 0x536   : > { %4320 = vmatpush3.bf16.msra.mxu1 %v5626_v48 }
 0x539   : > { %3775 = vmatmul.mubr.f32.vlgmr.msra.gmra.mrb[48].mxu1 %v3329_v0 }
 0x5ec   : > { %v3231_v6 = vpop.f32.mrb[46].mxu1 }
 0x5ed   : > { %v3232_v60 = vadd.f32 %v3231_v6, %v3164_v16  ;;  %v3741_v13 = vpop.f32.mrb[47].mxu1 }
 0x5ef   : > { %3235 = vst [vmem:[%s5637_s21] sm:$0x1] %v3232_v60 }
 0x60c   : > { %v3413_v33 = vpop.f32.mrb[48].mxu1 }
 0x60d   : > { %v3414_v63 = vadd.f32 %v3413_v33, %v3346_v19  ;;  %v3776_v55 = vpop.f32.mrb[49].mxu1 }
 0x60f   : > { %3417 = vst [vmem:[%s5637_s21 + $0x1] sm:$0x1] %v3414_v63 }
 0x610 PF: > { %s24_s30 = sadd.s32 1, %s4838_s30  }
 0x611   : > { %p21_p0 = scmp.ge.s32.totalorder %s24_s30, 4  }
 0x613   :  { %23 = sbr.rel (!%p21_p0) target bundleno = 5 (0x5), region = 134 }
 0x61a   :  { %3437 = vsyncpa [#allocation3], 1 }
 0x61b   :  { %3439 = vsyncpa [#allocation3 + $0x1], 1 }
 0x61c   :  { %3440 = vsyncpa [#allocation5], 1 }
 0x61d   :  { %3441 = vsyncpa [#allocation8], 1 }
 0x61e   :  { %3442 = vsyncpa [#allocation11], 1 }
 0x61f   :  { %3443 = vsyncpa [#allocation14], 1 }

</bundles_post_ra>
